<compile_context>
chip_gen: v6e
topology: v6e:2x2x1
jax: 0.10.0
libtpu: 0.0.40
codegen_flags: <defaults>
</compile_context>

<pallas_src>
import functools
import math

import jax
import jax.numpy as jnp
import numpy as np
from jax.experimental import pallas as pl
from jax.experimental.pallas import tpu as pltpu


# ----------------------------------------------------------------------------
# Glue: ERP sine positional embedding (parameter-free, plain JAX)
# ----------------------------------------------------------------------------
def position_embedding_sine_erp(h, w, lat_range, long_range, num_pos_feats,
                                temperature=10000.0):
    """Returns PE in NCHW: (B, 2*num_pos_feats, H, W)."""
    B = lat_range.shape[0]
    ys = (jnp.arange(h, dtype=jnp.float32) + 0.5) / h
    xs = (jnp.arange(w, dtype=jnp.float32) + 0.5) / w
    lat = lat_range[:, :1] + (lat_range[:, 1:] - lat_range[:, :1]) * ys[None, :]     # (B,H)
    lon = long_range[:, :1] + (long_range[:, 1:] - long_range[:, :1]) * xs[None, :]  # (B,W)
    y_embed = jnp.broadcast_to(lat[:, :, None], (B, h, w))
    x_embed = jnp.broadcast_to(lon[:, None, :], (B, h, w))
    dim_t = jnp.arange(num_pos_feats, dtype=jnp.float32)
    dim_t = temperature ** (2.0 * jnp.floor(dim_t / 2.0) / num_pos_feats)
    pos_x = x_embed[..., None] / dim_t
    pos_y = y_embed[..., None] / dim_t
    pos_x = jnp.stack([jnp.sin(pos_x[..., 0::2]), jnp.cos(pos_x[..., 1::2])],
                      axis=-1).reshape(B, h, w, num_pos_feats)
    pos_y = jnp.stack([jnp.sin(pos_y[..., 0::2]), jnp.cos(pos_y[..., 1::2])],
                      axis=-1).reshape(B, h, w, num_pos_feats)
    pos = jnp.concatenate([pos_y, pos_x], axis=-1)            # (B, H, W, pe_dim)
    return jnp.transpose(pos, (0, 3, 1, 2))                    # NCHW


# ----------------------------------------------------------------------------
# Pallas kernel: full AFP for ONE resolution (whole batch, all depth iterations)
# ----------------------------------------------------------------------------
def afp_kernel(n_ref, src_ref, sink_ref, wq_ref, wk_ref, wvo_ref, w1_ref, w2_ref,
               vecl_ref, vecd_ref, b1_ref, out_ref, *,
               batch, num_heads, depth, latent_dim, pe_dim, src_dim, hidden, ln_eps):
    f32, bf16 = jnp.float32, jnp.bfloat16
    B = batch
    L, P, D = latent_dim, pe_dim, src_dim
    dh = hidden // num_heads
    scale = 1.0 / math.sqrt(dh)

    n_valid = n_ref[pl.program_id(0)]          # valid (unpadded) source tokens, this resolution

    src = src_ref[0]                           # (B*N, D+P)  batch-stacked, token-padded
    sink = sink_ref[0]                         # (B*S, L+P)  batch-stacked initial latents
    N = src.shape[0] // B
    S = sink.shape[0] // B
    src_c, src_pe = src[:, :D], src[:, D:]
    sink_c, sink_pe = sink[:, :L], sink[:, L:]

    vec_l = vecl_ref[0]                        # (6, L) packed LN / bias vectors
    ln_sink_g, ln_sink_b = vec_l[0:1], vec_l[1:2]
    ln_mlp_g, ln_mlp_b = vec_l[2:3], vec_l[3:4]
    bo, b2 = vec_l[4:5], vec_l[5:6]
    vec_d = vecd_ref[0]                        # (2, D)
    ln_src_g, ln_src_b = vec_d[0:1], vec_d[1:2]
    b1 = b1_ref[0]                             # (1, bott)
    bott = b1.shape[-1]

    wq = wq_ref[0]                             # (L+P, hidden)      bf16
    wk = wk_ref[0]                             # (D+P, hidden)      bf16
    wvo = wvo_ref[0]                           # (D, num_heads*L)   bf16, lane-dense fused V*Wo
    w1 = w1_ref[0]                             # (L, bott)          bf16
    w2 = w2_ref[0]                             # (bott, L)          bf16

    def layer_norm(x, g, b):
        mu = jnp.mean(x, axis=-1, keepdims=True)
        var = jnp.mean((x - mu) ** 2, axis=-1, keepdims=True)
        return (x - mu) * jax.lax.rsqrt(var + ln_eps) * g + b

    # Hoisted broadcasts / casts (JAX does not CSE broadcast_in_dim; depth loop is unrolled).
    bo_b = jnp.broadcast_to(bo, (S, L))
    b1_b = jnp.broadcast_to(b1, (B * S, bott))
    b2_b = jnp.broadcast_to(b2, (B * S, L))
    key_idx = jax.lax.broadcasted_iota(jnp.int32, (S, N), 1)
    neg_mask = jnp.where(key_idx < n_valid, 0.0, -1e30).astype(f32)   # mask padded keys
    sink_pe_bf = sink_pe.astype(bf16)
    src_pe_bf = src_pe.astype(bf16)

    # ---- K / V path: depends only on source tokens -> computed ONCE per grid step -------
    src_n = layer_norm(src_c, ln_src_g, ln_src_b)                     # (B*N, D)   f32
    src_n_bf = src_n.astype(bf16)
    k_bf = (jnp.dot(src_n_bf, wk[:D], preferred_element_type=f32)
            + jnp.dot(src_pe_bf, wk[D:], preferred_element_type=f32)).astype(bf16)  # (B*N, hidden)
    # single lane-dense fused value+output projection: one (B*N,D)x(D,H*L) MXU pass
    v_bf = jnp.dot(src_n_bf, wvo, preferred_element_type=f32).astype(bf16)          # (B*N, H*L)

    # ---- depth iterations: cross-attn + residual + MLP + residual ------------------------
    for _ in range(depth):                                            # static unroll
        sink_n = layer_norm(sink_c, ln_sink_g, ln_sink_b)             # (B*S, L)
        q_bf = (jnp.dot(sink_n.astype(bf16), wq[:L], preferred_element_type=f32)
                + jnp.dot(sink_pe_bf, wq[L:], preferred_element_type=f32)).astype(bf16)

        attn_blocks = []
        for b in range(B):                                            # static unroll
            qb = q_bf[b * S:(b + 1) * S]                              # (S, hidden)
            kb = k_bf[b * N:(b + 1) * N]                              # (N, hidden)
            vb = v_bf[b * N:(b + 1) * N]                              # (N, H*L)
            acc = bo_b                                                # output-proj bias
            for h in range(num_heads):                                # static unroll
                logits = jax.lax.dot_general(
                    qb[:, h * dh:(h + 1) * dh], kb[:, h * dh:(h + 1) * dh],
                    (((1,), (1,)), ((), ())), preferred_element_type=f32)  # (S, N)
                logits = logits * scale + neg_mask
                logits = logits - jnp.max(logits, axis=-1, keepdims=True)
                p = jnp.exp(logits)
                p = p * pl.reciprocal(jnp.sum(p, axis=-1, keepdims=True), approx=True)
                acc = acc + jnp.dot(p.astype(bf16), vb[:, h * L:(h + 1) * L],
                                    preferred_element_type=f32)       # (S, L)
            attn_blocks.append(acc)
        attn = jnp.concatenate(attn_blocks, axis=0)                   # (B*S, L)

        # idrs <- idrs + cross_attn(...)   (content channels only)
        x = sink_c + attn
        # idrs[:, :, :L] <- x + MLP(LN(x))
        xn = layer_norm(x, ln_mlp_g, ln_mlp_b)
        h1 = jnp.dot(xn.astype(bf16), w1, preferred_element_type=f32) + b1_b
        h1 = h1 * jax.nn.sigmoid(h1)                                  # SiLU (f32)
        sink_c = x + jnp.dot(h1.astype(bf16), w2, preferred_element_type=f32) + b2_b

    out_ref[0] = sink_c                                               # one store per grid step


def make_afp_call(R, B, S, N, L, P, D, num_heads, hidden, bott, depth, ln_eps):
    def res_spec(shape):
        nd = len(shape)
        return pl.BlockSpec((1,) + shape, lambda r, n, nd=nd: (r,) + (0,) * nd)

    in_specs = [
        res_spec((B * N, D + P)),            # src (content|PE), batch-stacked, padded
        res_spec((B * S, L + P)),            # initial latents (content|PE), batch-stacked
        res_spec((L + P, hidden)),           # wq
        res_spec((D + P, hidden)),           # wk
        res_spec((D, num_heads * L)),        # fused W_vo (lane-dense)
        res_spec((L, bott)),                 # w1
        res_spec((bott, L)),                 # w2
        res_spec((6, L)),                    # packed LN/bias vectors (L-sized)
        res_spec((2, D)),                    # packed LN vectors (D-sized)
        res_spec((1, bott)),                 # b1
    ]
    kernel = functools.partial(afp_kernel, batch=B, num_heads=num_heads, depth=depth,
                               latent_dim=L, pe_dim=P, src_dim=D, hidden=hidden,
                               ln_eps=ln_eps)
    return pl.pallas_call(
        kernel,
        out_shape=jax.ShapeDtypeStruct((R, B * S, L), jnp.float32),
        grid_spec=pltpu.PrefetchScalarGridSpec(
            num_scalar_prefetch=1,            # n_valid per resolution (SMEM)
            grid=(R,),
            in_specs=in_specs,
            out_specs=pl.BlockSpec((1, B * S, L), lambda r, n: (r, 0, 0)),
        ),
        compiler_params=pltpu.CompilerParams(dimension_semantics=("parallel",)),
    )


# ----------------------------------------------------------------------------
# Parameter init (deterministic, mirrors the PyTorch module's parameter shapes)
# ----------------------------------------------------------------------------
def init_afp_params(key, num_resolutions, latent_dim, pixel_dim, pe_dim,
                    num_latents, expansion):
    hidden = latent_dim
    bott = expansion * latent_dim
    params = []

    def lin(k, fan_in, shape, scl=1.0):
        return (jax.random.normal(k, shape, jnp.float32) * scl) / jnp.sqrt(float(fan_in))

    for _ in range(num_resolutions):
        key, *ks = jax.random.split(key, 12)
        params.append(dict(
            mu=jax.random.normal(ks[0], (1, num_latents, latent_dim + pe_dim), jnp.float32),
            ln_sink_g=jnp.ones((1, latent_dim), jnp.float32),
            ln_sink_b=jnp.zeros((1, latent_dim), jnp.float32),
            ln_src_g=jnp.ones((1, pixel_dim), jnp.float32),
            ln_src_b=jnp.zeros((1, pixel_dim), jnp.float32),
            wq=lin(ks[1], latent_dim + pe_dim, (latent_dim + pe_dim, hidden)),
            wk=lin(ks[2], pixel_dim + pe_dim, (pixel_dim + pe_dim, hidden)),
            wv=lin(ks[3], pixel_dim, (pixel_dim, latent_dim)),
            wo=lin(ks[4], latent_dim, (latent_dim, latent_dim)),
            bo=lin(ks[5], latent_dim, (1, latent_dim), 0.1),
            ln_mlp_g=jnp.ones((1, latent_dim), jnp.float32),
            ln_mlp_b=jnp.zeros((1, latent_dim), jnp.float32),
            w1=lin(ks[6], latent_dim, (latent_dim, bott)),
            b1=lin(ks[7], latent_dim, (1, bott), 0.1),
            w2=lin(ks[8], bott, (bott, latent_dim)),
            b2=lin(ks[9], bott, (1, latent_dim), 0.1),
        ))
    return params


# ----------------------------------------------------------------------------
# AFP forward (Pallas-backed, one pallas_call for all resolutions)
# ----------------------------------------------------------------------------
def afp_forward(params, feature_maps, lat_range, long_range, *, depth, latent_dim,
                pe_dim, num_heads, expansion, ln_eps=1e-5):
    hp = jax.lax.Precision.HIGHEST
    bf16 = jnp.bfloat16
    B, D = feature_maps[0].shape[0], feature_maps[0].shape[1]
    R = len(feature_maps)
    L, P = latent_dim, pe_dim
    hidden = latent_dim
    bott = expansion * latent_dim
    dv = latent_dim // num_heads
    S = params[0]['mu'].shape[1]
    Ns = [f.shape[-2] * f.shape[-1] for f in feature_maps]
    N_max = max(Ns)

    # --- per-resolution source tokens: concat(content, PE), pad to N_max, stack over B ----
    src_list = []
    for fmap in feature_maps:
        _, _, H, W = fmap.shape
        pe = position_embedding_sine_erp(H, W, lat_range, long_range, pe_dim // 2)
        src_c = jnp.transpose(fmap, (0, 2, 3, 1)).reshape(B, H * W, D)
        src_pe = jnp.transpose(pe, (0, 2, 3, 1)).reshape(B, H * W, P)
        src = jnp.concatenate([src_c, src_pe], axis=-1)                   # (B, N, D+P)
        src = jnp.pad(src, ((0, 0), (0, N_max - H * W), (0, 0)))
        src_list.append(src.reshape(B * N_max, D + P))
    src_all = jnp.stack(src_list, axis=0)                                 # (R, B*Nmax, D+P)
    n_valid = jnp.asarray(Ns, dtype=jnp.int32)                            # (R,)

    # --- stacked per-resolution parameters (weights cast to bf16 for the MXU) -------------
    sink_all = jnp.stack([jnp.tile(p['mu'][0], (B, 1)) for p in params], 0)   # (R, B*S, L+P)
    wq = jnp.stack([p['wq'] for p in params], 0).astype(bf16)             # (R, L+P, hidden)
    wk = jnp.stack([p['wk'] for p in params], 0).astype(bf16)             # (R, D+P, hidden)
    wvo_list = []
    for p in params:
        # Algebraic fusion of V and output projection, lane-dense per-head concat:
        #   W_vo[:, h*L:(h+1)*L] = Wv[:, h*dv:(h+1)*dv] @ Wo[h*dv:(h+1)*dv, :]
        wv_h = jnp.transpose(p['wv'].reshape(D, num_heads, dv), (1, 0, 2))    # (H, D, dv)
        wo_h = p['wo'].reshape(num_heads, dv, L)                              # (H, dv, L)
        w = jnp.einsum('hdk,hkl->hdl', wv_h, wo_h, precision=hp)              # (H, D, L)
        wvo_list.append(jnp.transpose(w, (1, 0, 2)).reshape(D, num_heads * L))
    wvo = jnp.stack(wvo_list, 0).astype(bf16)                              # (R, D, H*L)
    w1 = jnp.stack([p['w1'] for p in params], 0).astype(bf16)              # (R, L, bott)
    w2 = jnp.stack([p['w2'] for p in params], 0).astype(bf16)              # (R, bott, L)
    vec_l = jnp.stack([jnp.concatenate([p['ln_sink_g'], p['ln_sink_b'],
                                        p['ln_mlp_g'], p['ln_mlp_b'],
                                        p['bo'], p['b2']], axis=0)
                       for p in params], 0)                                # (R, 6, L)
    vec_d = jnp.stack([jnp.concatenate([p['ln_src_g'], p['ln_src_b']], axis=0)
                       for p in params], 0)                                # (R, 2, D)
    b1 = jnp.stack([p['b1'] for p in params], 0)                           # (R, 1, bott)

    step = make_afp_call(R, B, S, N_max, L, P, D, num_heads, hidden, bott, depth, ln_eps)
    out_c = step(n_valid, src_all, sink_all, wq, wk, wvo, w1, w2, vec_l, vec_d, b1)  # (R,B*S,L)

    idrs = []
    for r in range(R):
        sink_pe_b = jnp.broadcast_to(params[r]['mu'][0, :, L:][None], (B, S, P))
        idrs.append(jnp.concatenate([out_c[r].reshape(B, S, L), sink_pe_b], axis=-1))
    return tuple(idrs)


# ----------------------------------------------------------------------------
# Pure-JAX reference (same math, f32 HIGHEST precision) for validation
# ----------------------------------------------------------------------------
def afp_forward_ref(params, feature_maps, lat_range, long_range, *, depth, latent_dim,
                    pe_dim, num_heads, expansion, ln_eps=1e-5):
    hp = jax.lax.Precision.HIGHEST

    def layer_norm(x, g, b):
        mu = jnp.mean(x, -1, keepdims=True)
        var = jnp.mean((x - mu) ** 2, -1, keepdims=True)
        return (x - mu) * jax.lax.rsqrt(var + ln_eps) * g + b

    B = feature_maps[0].shape[0]
    hidden = latent_dim
    dh = hidden // num_heads
    dv = latent_dim // num_heads
    scale = dh ** -0.5
    idrs = []
    for fmap, p in zip(feature_maps, params):
        _, D, H, W = fmap.shape
        pe = position_embedding_sine_erp(H, W, lat_range, long_range, pe_dim // 2)
        src = jnp.concatenate([
            jnp.transpose(fmap, (0, 2, 3, 1)).reshape(B, H * W, D),
            jnp.transpose(pe, (0, 2, 3, 1)).reshape(B, H * W, pe_dim)], -1)
        idr = jnp.broadcast_to(p['mu'], (B,) + p['mu'].shape[1:])
        for _ in range(depth):
            sink_c, sink_pe = idr[..., :latent_dim], idr[..., latent_dim:]
            src_c, src_pe = src[..., :D], src[..., D:]
            sn = layer_norm(sink_c, p['ln_sink_g'], p['ln_sink_b'])
            cn = layer_norm(src_c, p['ln_src_g'], p['ln_src_b'])
            q = jnp.einsum('bsi,io->bso', jnp.concatenate([sn, sink_pe], -1), p['wq'], precision=hp)
            k = jnp.einsum('bni,io->bno', jnp.concatenate([cn, src_pe], -1), p['wk'], precision=hp)
            v = jnp.einsum('bni,io->bno', cn, p['wv'], precision=hp)
            q = q.reshape(B, -1, num_heads, dh)
            k = k.reshape(B, -1, num_heads, dh)
            v = v.reshape(B, -1, num_heads, dv)
            logits = jnp.einsum('bshd,bnhd->bhsn', q, k, precision=hp) * scale
            attn = jax.nn.softmax(logits, axis=-1)
            o = jnp.einsum('bhsn,bnhd->bshd', attn, v, precision=hp).reshape(B, -1, latent_dim)
            o = jnp.einsum('bsi,io->bso', o, p['wo'], precision=hp) + p['bo']
            x = sink_c + o
            xn = layer_norm(x, p['ln_mlp_g'], p['ln_mlp_b'])
            h1 = jax.nn.silu(jnp.einsum('bsi,io->bso', xn, p['w1'], precision=hp) + p['b1'])
            x = x + jnp.einsum('bsi,io->bso', h1, p['w2'], precision=hp) + p['b2']
            idr = jnp.concatenate([x, sink_pe], -1)
        idrs.append(idr)
    return tuple(idrs)


# ----------------------------------------------------------------------------
if __name__ == "__main__":
    # Small AFP config
    num_resolutions = 2
    depth = 2
    pixel_dim = 32
    pe_dim = 16
    latent_dim = 32
    num_latents = 16
    num_heads = 4
    expansion = 2
    B = 2

    key = jax.random.PRNGKey(0)
    kp, kf1, kf2 = jax.random.split(key, 3)
    params = init_afp_params(kp, num_resolutions, latent_dim, pixel_dim, pe_dim,
                             num_latents, expansion)

    feature_maps = (
        jax.random.normal(kf1, (B, pixel_dim, 8, 8), jnp.float32),   # NCHW, N=64
        jax.random.normal(kf2, (B, pixel_dim, 4, 4), jnp.float32),   # NCHW, N=16 (exercises padding mask)
    )
    lat_range = jnp.array([[-1.2, 1.2], [-math.pi / 2, math.pi / 2]], jnp.float32)
    long_range = jnp.array([[-math.pi, math.pi], [-2.0, 2.0]], jnp.float32)

    cfg = dict(depth=depth, latent_dim=latent_dim, pe_dim=pe_dim,
               num_heads=num_heads, expansion=expansion)

    outs = afp_forward(params, feature_maps, lat_range, long_range, **cfg)
    outs = jax.block_until_ready(outs)
    refs = afp_forward_ref(params, feature_maps, lat_range, long_range, **cfg)
    refs = jax.block_until_ready(refs)

    # Tolerance note: kernel matmuls use bf16 operands with f32 accumulation (per the
    # v6e/v7x MXU guidance) plus an approx softmax reciprocal; outputs are O(1-2), so
    # structural bugs would show as O(1) errors — well outside these bounds.
    for o, r in zip(outs, refs):
        assert o.shape == (B, num_latents, latent_dim + pe_dim), o.shape
        np.testing.assert_allclose(np.asarray(o), np.asarray(r), rtol=2e-2, atol=5e-2)

    print("KERNEL_OK")
</pallas_src>

<mosaic_0001>
module attributes {stable_mosaic.version = 11 : i64} {
  func.func @afp_kernel(%arg0: i32, %arg1: memref<2xi32, #tpu.memory_space<smem>>, %arg2: memref<1x128x48xf32, #tpu.memory_space<vmem>>, %arg3: memref<1x32x48xf32, #tpu.memory_space<vmem>>, %arg4: memref<1x48x32xbf16, #tpu.memory_space<vmem>>, %arg5: memref<1x48x32xbf16, #tpu.memory_space<vmem>>, %arg6: memref<1x32x128xbf16, #tpu.memory_space<vmem>>, %arg7: memref<1x32x64xbf16, #tpu.memory_space<vmem>>, %arg8: memref<1x64x32xbf16, #tpu.memory_space<vmem>>, %arg9: memref<1x6x32xf32, #tpu.memory_space<vmem>>, %arg10: memref<1x2x32xf32, #tpu.memory_space<vmem>>, %arg11: memref<1x1x64xf32, #tpu.memory_space<vmem>>, %arg12: memref<1x32x32xf32, #tpu.memory_space<vmem>>) attributes {dimension_semantics = [#tpu.dimension_semantics<parallel>], iteration_bounds = array<i64: 2>, scalar_prefetch = 1 : i64, scratch_operands = 0 : i64, tpu.core_type = #tpu.core_type<tc>, window_params = [{transform_indices = @transform_0, window_bounds = array<i64: 1, 128, 48>}, {transform_indices = @transform_1, window_bounds = array<i64: 1, 32, 48>}, {transform_indices = @transform_2, window_bounds = array<i64: 1, 48, 32>}, {transform_indices = @transform_3, window_bounds = array<i64: 1, 48, 32>}, {transform_indices = @transform_4, window_bounds = array<i64: 1, 32, 128>}, {transform_indices = @transform_5, window_bounds = array<i64: 1, 32, 64>}, {transform_indices = @transform_6, window_bounds = array<i64: 1, 64, 32>}, {transform_indices = @transform_7, window_bounds = array<i64: 1, 6, 32>}, {transform_indices = @transform_8, window_bounds = array<i64: 1, 2, 32>}, {transform_indices = @transform_9, window_bounds = array<i64: 1, 1, 64>}, {transform_indices = @transform_10, window_bounds = array<i64: 1, 32, 32>}]} {
    %0 = arith.index_cast %arg0 : i32 to index
    %1 = memref.load %arg1[%0] : memref<2xi32, #tpu.memory_space<smem>>
    %c0 = arith.constant 0 : index
    %c0_0 = arith.constant 0 : index
    %c0_1 = arith.constant 0 : index
    %2 = vector.load %arg2[%c0, %c0_0, %c0_1] : memref<1x128x48xf32, #tpu.memory_space<vmem>>, vector<1x128x48xf32>
    %3 = vector.shape_cast %2 : vector<1x128x48xf32> to vector<128x48xf32>
    %c0_2 = arith.constant 0 : index
    %c0_3 = arith.constant 0 : index
    %c0_4 = arith.constant 0 : index
    %4 = vector.load %arg3[%c0_2, %c0_3, %c0_4] : memref<1x32x48xf32, #tpu.memory_space<vmem>>, vector<1x32x48xf32>
    %5 = vector.shape_cast %4 : vector<1x32x48xf32> to vector<32x48xf32>
    %6 = vector.extract_strided_slice %3 {offsets = [0, 0], sizes = [128, 32], strides = [1, 1]} : vector<128x48xf32> to vector<128x32xf32>
    %7 = vector.extract_strided_slice %3 {offsets = [0, 32], sizes = [128, 16], strides = [1, 1]} : vector<128x48xf32> to vector<128x16xf32>
    %8 = vector.extract_strided_slice %5 {offsets = [0, 0], sizes = [32, 32], strides = [1, 1]} : vector<32x48xf32> to vector<32x32xf32>
    %9 = vector.extract_strided_slice %5 {offsets = [0, 32], sizes = [32, 16], strides = [1, 1]} : vector<32x48xf32> to vector<32x16xf32>
    %c0_5 = arith.constant 0 : index
    %c0_6 = arith.constant 0 : index
    %c0_7 = arith.constant 0 : index
    %10 = vector.load %arg9[%c0_5, %c0_6, %c0_7] : memref<1x6x32xf32, #tpu.memory_space<vmem>>, vector<1x6x32xf32>
    %11 = vector.shape_cast %10 : vector<1x6x32xf32> to vector<6x32xf32>
    %12 = vector.extract_strided_slice %11 {offsets = [0, 0], sizes = [1, 32], strides = [1, 1]} : vector<6x32xf32> to vector<1x32xf32>
    %13 = vector.extract_strided_slice %11 {offsets = [1, 0], sizes = [1, 32], strides = [1, 1]} : vector<6x32xf32> to vector<1x32xf32>
    %14 = vector.extract_strided_slice %11 {offsets = [2, 0], sizes = [1, 32], strides = [1, 1]} : vector<6x32xf32> to vector<1x32xf32>
    %15 = vector.extract_strided_slice %11 {offsets = [3, 0], sizes = [1, 32], strides = [1, 1]} : vector<6x32xf32> to vector<1x32xf32>
    %16 = vector.extract_strided_slice %11 {offsets = [4, 0], sizes = [1, 32], strides = [1, 1]} : vector<6x32xf32> to vector<1x32xf32>
    %17 = vector.extract_strided_slice %11 {offsets = [5, 0], sizes = [1, 32], strides = [1, 1]} : vector<6x32xf32> to vector<1x32xf32>
    %c0_8 = arith.constant 0 : index
    %c0_9 = arith.constant 0 : index
    %c0_10 = arith.constant 0 : index
    %18 = vector.load %arg10[%c0_8, %c0_9, %c0_10] : memref<1x2x32xf32, #tpu.memory_space<vmem>>, vector<1x2x32xf32>
    %19 = vector.shape_cast %18 : vector<1x2x32xf32> to vector<2x32xf32>
    %20 = vector.extract_strided_slice %19 {offsets = [0, 0], sizes = [1, 32], strides = [1, 1]} : vector<2x32xf32> to vector<1x32xf32>
    %21 = vector.extract_strided_slice %19 {offsets = [1, 0], sizes = [1, 32], strides = [1, 1]} : vector<2x32xf32> to vector<1x32xf32>
    %c0_11 = arith.constant 0 : index
    %c0_12 = arith.constant 0 : index
    %c0_13 = arith.constant 0 : index
    %22 = vector.load %arg11[%c0_11, %c0_12, %c0_13] : memref<1x1x64xf32, #tpu.memory_space<vmem>>, vector<1x1x64xf32>
    %23 = vector.shape_cast %22 : vector<1x1x64xf32> to vector<1x64xf32>
    %c0_14 = arith.constant 0 : index
    %c0_15 = arith.constant 0 : index
    %c0_16 = arith.constant 0 : index
    %24 = vector.load %arg4[%c0_14, %c0_15, %c0_16] : memref<1x48x32xbf16, #tpu.memory_space<vmem>>, vector<1x48x32xbf16>
    %25 = vector.shape_cast %24 : vector<1x48x32xbf16> to vector<48x32xbf16>
    %c0_17 = arith.constant 0 : index
    %c0_18 = arith.constant 0 : index
    %c0_19 = arith.constant 0 : index
    %26 = vector.load %arg5[%c0_17, %c0_18, %c0_19] : memref<1x48x32xbf16, #tpu.memory_space<vmem>>, vector<1x48x32xbf16>
    %27 = vector.shape_cast %26 : vector<1x48x32xbf16> to vector<48x32xbf16>
    %c0_20 = arith.constant 0 : index
    %c0_21 = arith.constant 0 : index
    %c0_22 = arith.constant 0 : index
    %28 = vector.load %arg6[%c0_20, %c0_21, %c0_22] : memref<1x32x128xbf16, #tpu.memory_space<vmem>>, vector<1x32x128xbf16>
    %29 = vector.shape_cast %28 : vector<1x32x128xbf16> to vector<32x128xbf16>
    %c0_23 = arith.constant 0 : index
    %c0_24 = arith.constant 0 : index
    %c0_25 = arith.constant 0 : index
    %30 = vector.load %arg7[%c0_23, %c0_24, %c0_25] : memref<1x32x64xbf16, #tpu.memory_space<vmem>>, vector<1x32x64xbf16>
    %31 = vector.shape_cast %30 : vector<1x32x64xbf16> to vector<32x64xbf16>
    %c0_26 = arith.constant 0 : index
    %c0_27 = arith.constant 0 : index
    %c0_28 = arith.constant 0 : index
    %32 = vector.load %arg8[%c0_26, %c0_27, %c0_28] : memref<1x64x32xbf16, #tpu.memory_space<vmem>>, vector<1x64x32xbf16>
    %33 = vector.shape_cast %32 : vector<1x64x32xbf16> to vector<64x32xbf16>
    %34 = vector.shape_cast %16 : vector<1x32xf32> to vector<1x32xf32>
    %35 = vector.broadcast %34 : vector<1x32xf32> to vector<16x32xf32>
    %36 = vector.shape_cast %23 : vector<1x64xf32> to vector<1x64xf32>
    %37 = vector.broadcast %36 : vector<1x64xf32> to vector<32x64xf32>
    %38 = vector.shape_cast %17 : vector<1x32xf32> to vector<1x32xf32>
    %39 = vector.broadcast %38 : vector<1x32xf32> to vector<32x32xf32>
    %40 = tpu.iota {dimensions = array<i32: 1>} : vector<16x64xi32>
    %41 = vector.broadcast %1 : i32 to vector<16x64xi32>
    %42 = arith.cmpi slt, %40, %41 : vector<16x64xi32>
    %cst = arith.constant 0.000000e+00 : f32
    %cst_29 = arith.constant -1.000000e+30 : f32
    %43 = vector.broadcast %cst : f32 to vector<16x64xf32>
    %44 = vector.broadcast %cst_29 : f32 to vector<16x64xf32>
    %45 = arith.select %42, %43, %44 : vector<16x64xi1>, vector<16x64xf32>
    %46 = arith.truncf %9 : vector<32x16xf32> to vector<32x16xbf16>
    %47 = arith.truncf %7 : vector<128x16xf32> to vector<128x16xbf16>
    %cst_30 = arith.constant dense<0.000000e+00> : vector<128xf32>
    %48 = vector.multi_reduction <add>, %6, %cst_30 [1] : vector<128x32xf32> to vector<128xf32>
    %49 = vector.shape_cast %48 : vector<128xf32> to vector<128x1xf32>
    %cst_31 = arith.constant 3.200000e+01 : f32
    %50 = vector.broadcast %cst_31 : f32 to vector<128x1xf32>
    %51 = arith.divf %49, %50 : vector<128x1xf32>
    %52 = vector.broadcast %51 : vector<128x1xf32> to vector<128x32xf32>
    %53 = arith.subf %6, %52 : vector<128x32xf32>
    %54 = arith.mulf %53, %53 : vector<128x32xf32>
    %cst_32 = arith.constant dense<0.000000e+00> : vector<128xf32>
    %55 = vector.multi_reduction <add>, %54, %cst_32 [1] : vector<128x32xf32> to vector<128xf32>
    %56 = vector.shape_cast %55 : vector<128xf32> to vector<128x1xf32>
    %cst_33 = arith.constant 3.200000e+01 : f32
    %57 = vector.broadcast %cst_33 : f32 to vector<128x1xf32>
    %58 = arith.divf %56, %57 : vector<128x1xf32>
    %59 = vector.broadcast %51 : vector<128x1xf32> to vector<128x32xf32>
    %60 = arith.subf %6, %59 : vector<128x32xf32>
    %cst_34 = arith.constant 9.99999974E-6 : f32
    %61 = vector.broadcast %cst_34 : f32 to vector<128x1xf32>
    %62 = arith.addf %58, %61 : vector<128x1xf32>
    %63 = math.rsqrt %62 : vector<128x1xf32>
    %64 = vector.broadcast %63 : vector<128x1xf32> to vector<128x32xf32>
    %65 = arith.mulf %60, %64 : vector<128x32xf32>
    %66 = vector.broadcast %20 : vector<1x32xf32> to vector<128x32xf32>
    %67 = arith.mulf %65, %66 : vector<128x32xf32>
    %68 = vector.broadcast %21 : vector<1x32xf32> to vector<128x32xf32>
    %69 = arith.addf %67, %68 : vector<128x32xf32>
    %70 = arith.truncf %69 : vector<128x32xf32> to vector<128x32xbf16>
    %71 = vector.extract_strided_slice %27 {offsets = [0, 0], sizes = [32, 32], strides = [1, 1]} : vector<48x32xbf16> to vector<32x32xbf16>
    %cst_35 = arith.constant dense<0.000000e+00> : vector<128x32xf32>
    %72 = tpu.matmul %70, %71, %cst_35 {dimension_numbers = #tpu.dot_dimension_numbers<[1], [0], [0], [1], [0, 0, 1, 1], [], []>} : vector<128x32xbf16>, vector<32x32xbf16>, vector<128x32xf32> -> vector<128x32xf32>
    %73 = vector.extract_strided_slice %27 {offsets = [32, 0], sizes = [16, 32], strides = [1, 1]} : vector<48x32xbf16> to vector<16x32xbf16>
    %cst_36 = arith.constant dense<0.000000e+00> : vector<128x32xf32>
    %74 = tpu.matmul %47, %73, %cst_36 {dimension_numbers = #tpu.dot_dimension_numbers<[1], [0], [0], [1], [0, 0, 1, 1], [], []>} : vector<128x16xbf16>, vector<16x32xbf16>, vector<128x32xf32> -> vector<128x32xf32>
    %75 = arith.addf %72, %74 : vector<128x32xf32>
    %76 = arith.truncf %75 : vector<128x32xf32> to vector<128x32xbf16>
    %cst_37 = arith.constant dense<0.000000e+00> : vector<128x128xf32>
    %77 = tpu.matmul %70, %29, %cst_37 {dimension_numbers = #tpu.dot_dimension_numbers<[1], [0], [0], [1], [0, 0, 1, 1], [], []>} : vector<128x32xbf16>, vector<32x128xbf16>, vector<128x128xf32> -> vector<128x128xf32>
    %78 = arith.truncf %77 : vector<128x128xf32> to vector<128x128xbf16>
    %cst_38 = arith.constant dense<0.000000e+00> : vector<32xf32>
    %79 = vector.multi_reduction <add>, %8, %cst_38 [1] : vector<32x32xf32> to vector<32xf32>
    %80 = vector.shape_cast %79 : vector<32xf32> to vector<32x1xf32>
    %cst_39 = arith.constant 3.200000e+01 : f32
    %81 = vector.broadcast %cst_39 : f32 to vector<32x1xf32>
    %82 = arith.divf %80, %81 : vector<32x1xf32>
    %83 = vector.broadcast %82 : vector<32x1xf32> to vector<32x32xf32>
    %84 = arith.subf %8, %83 : vector<32x32xf32>
    %85 = arith.mulf %84, %84 : vector<32x32xf32>
    %cst_40 = arith.constant dense<0.000000e+00> : vector<32xf32>
    %86 = vector.multi_reduction <add>, %85, %cst_40 [1] : vector<32x32xf32> to vector<32xf32>
    %87 = vector.shape_cast %86 : vector<32xf32> to vector<32x1xf32>
    %cst_41 = arith.constant 3.200000e+01 : f32
    %88 = vector.broadcast %cst_41 : f32 to vector<32x1xf32>
    %89 = arith.divf %87, %88 : vector<32x1xf32>
    %90 = vector.broadcast %82 : vector<32x1xf32> to vector<32x32xf32>
    %91 = arith.subf %8, %90 : vector<32x32xf32>
    %cst_42 = arith.constant 9.99999974E-6 : f32
    %92 = vector.broadcast %cst_42 : f32 to vector<32x1xf32>
    %93 = arith.addf %89, %92 : vector<32x1xf32>
    %94 = math.rsqrt %93 : vector<32x1xf32>
    %95 = vector.broadcast %94 : vector<32x1xf32> to vector<32x32xf32>
    %96 = arith.mulf %91, %95 : vector<32x32xf32>
    %97 = vector.broadcast %12 : vector<1x32xf32> to vector<32x32xf32>
    %98 = arith.mulf %96, %97 : vector<32x32xf32>
    %99 = vector.broadcast %13 : vector<1x32xf32> to vector<32x32xf32>
    %100 = arith.addf %98, %99 : vector<32x32xf32>
    %101 = arith.truncf %100 : vector<32x32xf32> to vector<32x32xbf16>
    %102 = vector.extract_strided_slice %25 {offsets = [0, 0], sizes = [32, 32], strides = [1, 1]} : vector<48x32xbf16> to vector<32x32xbf16>
    %cst_43 = arith.constant dense<0.000000e+00> : vector<32x32xf32>
    %103 = tpu.matmul %101, %102, %cst_43 {dimension_numbers = #tpu.dot_dimension_numbers<[1], [0], [0], [1], [0, 0, 1, 1], [], []>} : vector<32x32xbf16>, vector<32x32xbf16>, vector<32x32xf32> -> vector<32x32xf32>
    %104 = vector.extract_strided_slice %25 {offsets = [32, 0], sizes = [16, 32], strides = [1, 1]} : vector<48x32xbf16> to vector<16x32xbf16>
    %cst_44 = arith.constant dense<0.000000e+00> : vector<32x32xf32>
    %105 = tpu.matmul %46, %104, %cst_44 {dimension_numbers = #tpu.dot_dimension_numbers<[1], [0], [0], [1], [0, 0, 1, 1], [], []>} : vector<32x16xbf16>, vector<16x32xbf16>, vector<32x32xf32> -> vector<32x32xf32>
    %106 = arith.addf %103, %105 : vector<32x32xf32>
    %107 = arith.truncf %106 : vector<32x32xf32> to vector<32x32xbf16>
    %108 = vector.extract_strided_slice %107 {offsets = [0, 0], sizes = [16, 32], strides = [1, 1]} : vector<32x32xbf16> to vector<16x32xbf16>
    %109 = vector.extract_strided_slice %76 {offsets = [0, 0], sizes = [64, 32], strides = [1, 1]} : vector<128x32xbf16> to vector<64x32xbf16>
    %110 = vector.extract_strided_slice %78 {offsets = [0, 0], sizes = [64, 128], strides = [1, 1]} : vector<128x128xbf16> to vector<64x128xbf16>
    %111 = vector.extract_strided_slice %108 {offsets = [0, 0], sizes = [16, 8], strides = [1, 1]} : vector<16x32xbf16> to vector<16x8xbf16>
    %112 = vector.extract_strided_slice %109 {offsets = [0, 0], sizes = [64, 8], strides = [1, 1]} : vector<64x32xbf16> to vector<64x8xbf16>
    %cst_45 = arith.constant dense<0.000000e+00> : vector<16x64xf32>
    %113 = tpu.matmul %111, %112, %cst_45 {dimension_numbers = #tpu.dot_dimension_numbers<[1], [1], [0], [0], [0, 0, 1, 0], [], []>} : vector<16x8xbf16>, vector<64x8xbf16>, vector<16x64xf32> -> vector<16x64xf32>
    %cst_46 = arith.constant 0.353553385 : f32
    %114 = vector.broadcast %cst_46 : f32 to vector<16x64xf32>
    %115 = arith.mulf %113, %114 : vector<16x64xf32>
    %116 = arith.addf %115, %45 : vector<16x64xf32>
    %cst_47 = arith.constant dense<0xFF800000> : vector<16xf32>
    %117 = vector.multi_reduction <maximumf>, %116, %cst_47 [1] : vector<16x64xf32> to vector<16xf32>
    %118 = vector.shape_cast %117 : vector<16xf32> to vector<16x1xf32>
    %119 = vector.broadcast %118 : vector<16x1xf32> to vector<16x64xf32>
    %120 = arith.subf %116, %119 : vector<16x64xf32>
    %121 = math.exp %120 : vector<16x64xf32>
    %cst_48 = arith.constant dense<0.000000e+00> : vector<16xf32>
    %122 = vector.multi_reduction <add>, %121, %cst_48 [1] : vector<16x64xf32> to vector<16xf32>
    %123 = vector.shape_cast %122 : vector<16xf32> to vector<16x1xf32>
    %124 = tpu.reciprocal %123 {approx = true} : vector<16x1xf32> -> vector<16x1xf32>
    %125 = vector.broadcast %124 : vector<16x1xf32> to vector<16x64xf32>
    %126 = arith.mulf %121, %125 : vector<16x64xf32>
    %127 = arith.truncf %126 : vector<16x64xf32> to vector<16x64xbf16>
    %128 = vector.extract_strided_slice %110 {offsets = [0, 0], sizes = [64, 32], strides = [1, 1]} : vector<64x128xbf16> to vector<64x32xbf16>
    %cst_49 = arith.constant dense<0.000000e+00> : vector<16x32xf32>
    %129 = tpu.matmul %127, %128, %cst_49 {dimension_numbers = #tpu.dot_dimension_numbers<[1], [0], [0], [1], [0, 0, 1, 1], [], []>} : vector<16x64xbf16>, vector<64x32xbf16>, vector<16x32xf32> -> vector<16x32xf32>
    %130 = arith.addf %35, %129 : vector<16x32xf32>
    %131 = vector.extract_strided_slice %108 {offsets = [0, 8], sizes = [16, 8], strides = [1, 1]} : vector<16x32xbf16> to vector<16x8xbf16>
    %132 = vector.extract_strided_slice %109 {offsets = [0, 8], sizes = [64, 8], strides = [1, 1]} : vector<64x32xbf16> to vector<64x8xbf16>
    %cst_50 = arith.constant dense<0.000000e+00> : vector<16x64xf32>
    %133 = tpu.matmul %131, %132, %cst_50 {dimension_numbers = #tpu.dot_dimension_numbers<[1], [1], [0], [0], [0, 0, 1, 0], [], []>} : vector<16x8xbf16>, vector<64x8xbf16>, vector<16x64xf32> -> vector<16x64xf32>
    %cst_51 = arith.constant 0.353553385 : f32
    %134 = vector.broadcast %cst_51 : f32 to vector<16x64xf32>
    %135 = arith.mulf %133, %134 : vector<16x64xf32>
    %136 = arith.addf %135, %45 : vector<16x64xf32>
    %cst_52 = arith.constant dense<0xFF800000> : vector<16xf32>
    %137 = vector.multi_reduction <maximumf>, %136, %cst_52 [1] : vector<16x64xf32> to vector<16xf32>
    %138 = vector.shape_cast %137 : vector<16xf32> to vector<16x1xf32>
    %139 = vector.broadcast %138 : vector<16x1xf32> to vector<16x64xf32>
    %140 = arith.subf %136, %139 : vector<16x64xf32>
    %141 = math.exp %140 : vector<16x64xf32>
    %cst_53 = arith.constant dense<0.000000e+00> : vector<16xf32>
    %142 = vector.multi_reduction <add>, %141, %cst_53 [1] : vector<16x64xf32> to vector<16xf32>
    %143 = vector.shape_cast %142 : vector<16xf32> to vector<16x1xf32>
    %144 = tpu.reciprocal %143 {approx = true} : vector<16x1xf32> -> vector<16x1xf32>
    %145 = vector.broadcast %144 : vector<16x1xf32> to vector<16x64xf32>
    %146 = arith.mulf %141, %145 : vector<16x64xf32>
    %147 = arith.truncf %146 : vector<16x64xf32> to vector<16x64xbf16>
    %148 = vector.extract_strided_slice %110 {offsets = [0, 32], sizes = [64, 32], strides = [1, 1]} : vector<64x128xbf16> to vector<64x32xbf16>
    %cst_54 = arith.constant dense<0.000000e+00> : vector<16x32xf32>
    %149 = tpu.matmul %147, %148, %cst_54 {dimension_numbers = #tpu.dot_dimension_numbers<[1], [0], [0], [1], [0, 0, 1, 1], [], []>} : vector<16x64xbf16>, vector<64x32xbf16>, vector<16x32xf32> -> vector<16x32xf32>
    %150 = arith.addf %130, %149 : vector<16x32xf32>
    %151 = vector.extract_strided_slice %108 {offsets = [0, 16], sizes = [16, 8], strides = [1, 1]} : vector<16x32xbf16> to vector<16x8xbf16>
    %152 = vector.extract_strided_slice %109 {offsets = [0, 16], sizes = [64, 8], strides = [1, 1]} : vector<64x32xbf16> to vector<64x8xbf16>
    %cst_55 = arith.constant dense<0.000000e+00> : vector<16x64xf32>
    %153 = tpu.matmul %151, %152, %cst_55 {dimension_numbers = #tpu.dot_dimension_numbers<[1], [1], [0], [0], [0, 0, 1, 0], [], []>} : vector<16x8xbf16>, vector<64x8xbf16>, vector<16x64xf32> -> vector<16x64xf32>
    %cst_56 = arith.constant 0.353553385 : f32
    %154 = vector.broadcast %cst_56 : f32 to vector<16x64xf32>
    %155 = arith.mulf %153, %154 : vector<16x64xf32>
    %156 = arith.addf %155, %45 : vector<16x64xf32>
    %cst_57 = arith.constant dense<0xFF800000> : vector<16xf32>
    %157 = vector.multi_reduction <maximumf>, %156, %cst_57 [1] : vector<16x64xf32> to vector<16xf32>
    %158 = vector.shape_cast %157 : vector<16xf32> to vector<16x1xf32>
    %159 = vector.broadcast %158 : vector<16x1xf32> to vector<16x64xf32>
    %160 = arith.subf %156, %159 : vector<16x64xf32>
    %161 = math.exp %160 : vector<16x64xf32>
    %cst_58 = arith.constant dense<0.000000e+00> : vector<16xf32>
    %162 = vector.multi_reduction <add>, %161, %cst_58 [1] : vector<16x64xf32> to vector<16xf32>
    %163 = vector.shape_cast %162 : vector<16xf32> to vector<16x1xf32>
    %164 = tpu.reciprocal %163 {approx = true} : vector<16x1xf32> -> vector<16x1xf32>
    %165 = vector.broadcast %164 : vector<16x1xf32> to vector<16x64xf32>
    %166 = arith.mulf %161, %165 : vector<16x64xf32>
    %167 = arith.truncf %166 : vector<16x64xf32> to vector<16x64xbf16>
    %168 = vector.extract_strided_slice %110 {offsets = [0, 64], sizes = [64, 32], strides = [1, 1]} : vector<64x128xbf16> to vector<64x32xbf16>
    %cst_59 = arith.constant dense<0.000000e+00> : vector<16x32xf32>
    %169 = tpu.matmul %167, %168, %cst_59 {dimension_numbers = #tpu.dot_dimension_numbers<[1], [0], [0], [1], [0, 0, 1, 1], [], []>} : vector<16x64xbf16>, vector<64x32xbf16>, vector<16x32xf32> -> vector<16x32xf32>
    %170 = arith.addf %150, %169 : vector<16x32xf32>
    %171 = vector.extract_strided_slice %108 {offsets = [0, 24], sizes = [16, 8], strides = [1, 1]} : vector<16x32xbf16> to vector<16x8xbf16>
    %172 = vector.extract_strided_slice %109 {offsets = [0, 24], sizes = [64, 8], strides = [1, 1]} : vector<64x32xbf16> to vector<64x8xbf16>
    %cst_60 = arith.constant dense<0.000000e+00> : vector<16x64xf32>
    %173 = tpu.matmul %171, %172, %cst_60 {dimension_numbers = #tpu.dot_dimension_numbers<[1], [1], [0], [0], [0, 0, 1, 0], [], []>} : vector<16x8xbf16>, vector<64x8xbf16>, vector<16x64xf32> -> vector<16x64xf32>
    %cst_61 = arith.constant 0.353553385 : f32
    %174 = vector.broadcast %cst_61 : f32 to vector<16x64xf32>
    %175 = arith.mulf %173, %174 : vector<16x64xf32>
    %176 = arith.addf %175, %45 : vector<16x64xf32>
    %cst_62 = arith.constant dense<0xFF800000> : vector<16xf32>
    %177 = vector.multi_reduction <maximumf>, %176, %cst_62 [1] : vector<16x64xf32> to vector<16xf32>
    %178 = vector.shape_cast %177 : vector<16xf32> to vector<16x1xf32>
    %179 = vector.broadcast %178 : vector<16x1xf32> to vector<16x64xf32>
    %180 = arith.subf %176, %179 : vector<16x64xf32>
    %181 = math.exp %180 : vector<16x64xf32>
    %cst_63 = arith.constant dense<0.000000e+00> : vector<16xf32>
    %182 = vector.multi_reduction <add>, %181, %cst_63 [1] : vector<16x64xf32> to vector<16xf32>
    %183 = vector.shape_cast %182 : vector<16xf32> to vector<16x1xf32>
    %184 = tpu.reciprocal %183 {approx = true} : vector<16x1xf32> -> vector<16x1xf32>
    %185 = vector.broadcast %184 : vector<16x1xf32> to vector<16x64xf32>
    %186 = arith.mulf %181, %185 : vector<16x64xf32>
    %187 = arith.truncf %186 : vector<16x64xf32> to vector<16x64xbf16>
    %188 = vector.extract_strided_slice %110 {offsets = [0, 96], sizes = [64, 32], strides = [1, 1]} : vector<64x128xbf16> to vector<64x32xbf16>
    %cst_64 = arith.constant dense<0.000000e+00> : vector<16x32xf32>
    %189 = tpu.matmul %187, %188, %cst_64 {dimension_numbers = #tpu.dot_dimension_numbers<[1], [0], [0], [1], [0, 0, 1, 1], [], []>} : vector<16x64xbf16>, vector<64x32xbf16>, vector<16x32xf32> -> vector<16x32xf32>
    %190 = arith.addf %170, %189 : vector<16x32xf32>
    %191 = vector.extract_strided_slice %107 {offsets = [16, 0], sizes = [16, 32], strides = [1, 1]} : vector<32x32xbf16> to vector<16x32xbf16>
    %192 = vector.extract_strided_slice %76 {offsets = [64, 0], sizes = [64, 32], strides = [1, 1]} : vector<128x32xbf16> to vector<64x32xbf16>
    %193 = vector.extract_strided_slice %78 {offsets = [64, 0], sizes = [64, 128], strides = [1, 1]} : vector<128x128xbf16> to vector<64x128xbf16>
    %194 = vector.extract_strided_slice %191 {offsets = [0, 0], sizes = [16, 8], strides = [1, 1]} : vector<16x32xbf16> to vector<16x8xbf16>
    %195 = vector.extract_strided_slice %192 {offsets = [0, 0], sizes = [64, 8], strides = [1, 1]} : vector<64x32xbf16> to vector<64x8xbf16>
    %cst_65 = arith.constant dense<0.000000e+00> : vector<16x64xf32>
    %196 = tpu.matmul %194, %195, %cst_65 {dimension_numbers = #tpu.dot_dimension_numbers<[1], [1], [0], [0], [0, 0, 1, 0], [], []>} : vector<16x8xbf16>, vector<64x8xbf16>, vector<16x64xf32> -> vector<16x64xf32>
    %cst_66 = arith.constant 0.353553385 : f32
    %197 = vector.broadcast %cst_66 : f32 to vector<16x64xf32>
    %198 = arith.mulf %196, %197 : vector<16x64xf32>
    %199 = arith.addf %198, %45 : vector<16x64xf32>
    %cst_67 = arith.constant dense<0xFF800000> : vector<16xf32>
    %200 = vector.multi_reduction <maximumf>, %199, %cst_67 [1] : vector<16x64xf32> to vector<16xf32>
    %201 = vector.shape_cast %200 : vector<16xf32> to vector<16x1xf32>
    %202 = vector.broadcast %201 : vector<16x1xf32> to vector<16x64xf32>
    %203 = arith.subf %199, %202 : vector<16x64xf32>
    %204 = math.exp %203 : vector<16x64xf32>
    %cst_68 = arith.constant dense<0.000000e+00> : vector<16xf32>
    %205 = vector.multi_reduction <add>, %204, %cst_68 [1] : vector<16x64xf32> to vector<16xf32>
    %206 = vector.shape_cast %205 : vector<16xf32> to vector<16x1xf32>
    %207 = tpu.reciprocal %206 {approx = true} : vector<16x1xf32> -> vector<16x1xf32>
    %208 = vector.broadcast %207 : vector<16x1xf32> to vector<16x64xf32>
    %209 = arith.mulf %204, %208 : vector<16x64xf32>
    %210 = arith.truncf %209 : vector<16x64xf32> to vector<16x64xbf16>
    %211 = vector.extract_strided_slice %193 {offsets = [0, 0], sizes = [64, 32], strides = [1, 1]} : vector<64x128xbf16> to vector<64x32xbf16>
    %cst_69 = arith.constant dense<0.000000e+00> : vector<16x32xf32>
    %212 = tpu.matmul %210, %211, %cst_69 {dimension_numbers = #tpu.dot_dimension_numbers<[1], [0], [0], [1], [0, 0, 1, 1], [], []>} : vector<16x64xbf16>, vector<64x32xbf16>, vector<16x32xf32> -> vector<16x32xf32>
    %213 = arith.addf %35, %212 : vector<16x32xf32>
    %214 = vector.extract_strided_slice %191 {offsets = [0, 8], sizes = [16, 8], strides = [1, 1]} : vector<16x32xbf16> to vector<16x8xbf16>
    %215 = vector.extract_strided_slice %192 {offsets = [0, 8], sizes = [64, 8], strides = [1, 1]} : vector<64x32xbf16> to vector<64x8xbf16>
    %cst_70 = arith.constant dense<0.000000e+00> : vector<16x64xf32>
    %216 = tpu.matmul %214, %215, %cst_70 {dimension_numbers = #tpu.dot_dimension_numbers<[1], [1], [0], [0], [0, 0, 1, 0], [], []>} : vector<16x8xbf16>, vector<64x8xbf16>, vector<16x64xf32> -> vector<16x64xf32>
    %cst_71 = arith.constant 0.353553385 : f32
    %217 = vector.broadcast %cst_71 : f32 to vector<16x64xf32>
    %218 = arith.mulf %216, %217 : vector<16x64xf32>
    %219 = arith.addf %218, %45 : vector<16x64xf32>
    %cst_72 = arith.constant dense<0xFF800000> : vector<16xf32>
    %220 = vector.multi_reduction <maximumf>, %219, %cst_72 [1] : vector<16x64xf32> to vector<16xf32>
    %221 = vector.shape_cast %220 : vector<16xf32> to vector<16x1xf32>
    %222 = vector.broadcast %221 : vector<16x1xf32> to vector<16x64xf32>
    %223 = arith.subf %219, %222 : vector<16x64xf32>
    %224 = math.exp %223 : vector<16x64xf32>
    %cst_73 = arith.constant dense<0.000000e+00> : vector<16xf32>
    %225 = vector.multi_reduction <add>, %224, %cst_73 [1] : vector<16x64xf32> to vector<16xf32>
    %226 = vector.shape_cast %225 : vector<16xf32> to vector<16x1xf32>
    %227 = tpu.reciprocal %226 {approx = true} : vector<16x1xf32> -> vector<16x1xf32>
    %228 = vector.broadcast %227 : vector<16x1xf32> to vector<16x64xf32>
    %229 = arith.mulf %224, %228 : vector<16x64xf32>
    %230 = arith.truncf %229 : vector<16x64xf32> to vector<16x64xbf16>
    %231 = vector.extract_strided_slice %193 {offsets = [0, 32], sizes = [64, 32], strides = [1, 1]} : vector<64x128xbf16> to vector<64x32xbf16>
    %cst_74 = arith.constant dense<0.000000e+00> : vector<16x32xf32>
    %232 = tpu.matmul %230, %231, %cst_74 {dimension_numbers = #tpu.dot_dimension_numbers<[1], [0], [0], [1], [0, 0, 1, 1], [], []>} : vector<16x64xbf16>, vector<64x32xbf16>, vector<16x32xf32> -> vector<16x32xf32>
    %233 = arith.addf %213, %232 : vector<16x32xf32>
    %234 = vector.extract_strided_slice %191 {offsets = [0, 16], sizes = [16, 8], strides = [1, 1]} : vector<16x32xbf16> to vector<16x8xbf16>
    %235 = vector.extract_strided_slice %192 {offsets = [0, 16], sizes = [64, 8], strides = [1, 1]} : vector<64x32xbf16> to vector<64x8xbf16>
    %cst_75 = arith.constant dense<0.000000e+00> : vector<16x64xf32>
    %236 = tpu.matmul %234, %235, %cst_75 {dimension_numbers = #tpu.dot_dimension_numbers<[1], [1], [0], [0], [0, 0, 1, 0], [], []>} : vector<16x8xbf16>, vector<64x8xbf16>, vector<16x64xf32> -> vector<16x64xf32>
    %cst_76 = arith.constant 0.353553385 : f32
    %237 = vector.broadcast %cst_76 : f32 to vector<16x64xf32>
    %238 = arith.mulf %236, %237 : vector<16x64xf32>
    %239 = arith.addf %238, %45 : vector<16x64xf32>
    %cst_77 = arith.constant dense<0xFF800000> : vector<16xf32>
    %240 = vector.multi_reduction <maximumf>, %239, %cst_77 [1] : vector<16x64xf32> to vector<16xf32>
    %241 = vector.shape_cast %240 : vector<16xf32> to vector<16x1xf32>
    %242 = vector.broadcast %241 : vector<16x1xf32> to vector<16x64xf32>
    %243 = arith.subf %239, %242 : vector<16x64xf32>
    %244 = math.exp %243 : vector<16x64xf32>
    %cst_78 = arith.constant dense<0.000000e+00> : vector<16xf32>
    %245 = vector.multi_reduction <add>, %244, %cst_78 [1] : vector<16x64xf32> to vector<16xf32>
    %246 = vector.shape_cast %245 : vector<16xf32> to vector<16x1xf32>
    %247 = tpu.reciprocal %246 {approx = true} : vector<16x1xf32> -> vector<16x1xf32>
    %248 = vector.broadcast %247 : vector<16x1xf32> to vector<16x64xf32>
    %249 = arith.mulf %244, %248 : vector<16x64xf32>
    %250 = arith.truncf %249 : vector<16x64xf32> to vector<16x64xbf16>
    %251 = vector.extract_strided_slice %193 {offsets = [0, 64], sizes = [64, 32], strides = [1, 1]} : vector<64x128xbf16> to vector<64x32xbf16>
    %cst_79 = arith.constant dense<0.000000e+00> : vector<16x32xf32>
    %252 = tpu.matmul %250, %251, %cst_79 {dimension_numbers = #tpu.dot_dimension_numbers<[1], [0], [0], [1], [0, 0, 1, 1], [], []>} : vector<16x64xbf16>, vector<64x32xbf16>, vector<16x32xf32> -> vector<16x32xf32>
    %253 = arith.addf %233, %252 : vector<16x32xf32>
    %254 = vector.extract_strided_slice %191 {offsets = [0, 24], sizes = [16, 8], strides = [1, 1]} : vector<16x32xbf16> to vector<16x8xbf16>
    %255 = vector.extract_strided_slice %192 {offsets = [0, 24], sizes = [64, 8], strides = [1, 1]} : vector<64x32xbf16> to vector<64x8xbf16>
    %cst_80 = arith.constant dense<0.000000e+00> : vector<16x64xf32>
    %256 = tpu.matmul %254, %255, %cst_80 {dimension_numbers = #tpu.dot_dimension_numbers<[1], [1], [0], [0], [0, 0, 1, 0], [], []>} : vector<16x8xbf16>, vector<64x8xbf16>, vector<16x64xf32> -> vector<16x64xf32>
    %cst_81 = arith.constant 0.353553385 : f32
    %257 = vector.broadcast %cst_81 : f32 to vector<16x64xf32>
    %258 = arith.mulf %256, %257 : vector<16x64xf32>
    %259 = arith.addf %258, %45 : vector<16x64xf32>
    %cst_82 = arith.constant dense<0xFF800000> : vector<16xf32>
    %260 = vector.multi_reduction <maximumf>, %259, %cst_82 [1] : vector<16x64xf32> to vector<16xf32>
    %261 = vector.shape_cast %260 : vector<16xf32> to vector<16x1xf32>
    %262 = vector.broadcast %261 : vector<16x1xf32> to vector<16x64xf32>
    %263 = arith.subf %259, %262 : vector<16x64xf32>
    %264 = math.exp %263 : vector<16x64xf32>
    %cst_83 = arith.constant dense<0.000000e+00> : vector<16xf32>
    %265 = vector.multi_reduction <add>, %264, %cst_83 [1] : vector<16x64xf32> to vector<16xf32>
    %266 = vector.shape_cast %265 : vector<16xf32> to vector<16x1xf32>
    %267 = tpu.reciprocal %266 {approx = true} : vector<16x1xf32> -> vector<16x1xf32>
    %268 = vector.broadcast %267 : vector<16x1xf32> to vector<16x64xf32>
    %269 = arith.mulf %264, %268 : vector<16x64xf32>
    %270 = arith.truncf %269 : vector<16x64xf32> to vector<16x64xbf16>
    %271 = vector.extract_strided_slice %193 {offsets = [0, 96], sizes = [64, 32], strides = [1, 1]} : vector<64x128xbf16> to vector<64x32xbf16>
    %cst_84 = arith.constant dense<0.000000e+00> : vector<16x32xf32>
    %272 = tpu.matmul %270, %271, %cst_84 {dimension_numbers = #tpu.dot_dimension_numbers<[1], [0], [0], [1], [0, 0, 1, 1], [], []>} : vector<16x64xbf16>, vector<64x32xbf16>, vector<16x32xf32> -> vector<16x32xf32>
    %273 = arith.addf %253, %272 : vector<16x32xf32>
    %274 = tpu.concatenate %190, %273 in 0 : vector<16x32xf32>, vector<16x32xf32> -> vector<32x32xf32>
    %275 = arith.addf %8, %274 : vector<32x32xf32>
    %cst_85 = arith.constant dense<0.000000e+00> : vector<32xf32>
    %276 = vector.multi_reduction <add>, %275, %cst_85 [1] : vector<32x32xf32> to vector<32xf32>
    %277 = vector.shape_cast %276 : vector<32xf32> to vector<32x1xf32>
    %cst_86 = arith.constant 3.200000e+01 : f32
    %278 = vector.broadcast %cst_86 : f32 to vector<32x1xf32>
    %279 = arith.divf %277, %278 : vector<32x1xf32>
    %280 = vector.broadcast %279 : vector<32x1xf32> to vector<32x32xf32>
    %281 = arith.subf %275, %280 : vector<32x32xf32>
    %282 = arith.mulf %281, %281 : vector<32x32xf32>
    %cst_87 = arith.constant dense<0.000000e+00> : vector<32xf32>
    %283 = vector.multi_reduction <add>, %282, %cst_87 [1] : vector<32x32xf32> to vector<32xf32>
    %284 = vector.shape_cast %283 : vector<32xf32> to vector<32x1xf32>
    %cst_88 = arith.constant 3.200000e+01 : f32
    %285 = vector.broadcast %cst_88 : f32 to vector<32x1xf32>
    %286 = arith.divf %284, %285 : vector<32x1xf32>
    %287 = vector.broadcast %279 : vector<32x1xf32> to vector<32x32xf32>
    %288 = arith.subf %275, %287 : vector<32x32xf32>
    %cst_89 = arith.constant 9.99999974E-6 : f32
    %289 = vector.broadcast %cst_89 : f32 to vector<32x1xf32>
    %290 = arith.addf %286, %289 : vector<32x1xf32>
    %291 = math.rsqrt %290 : vector<32x1xf32>
    %292 = vector.broadcast %291 : vector<32x1xf32> to vector<32x32xf32>
    %293 = arith.mulf %288, %292 : vector<32x32xf32>
    %294 = vector.broadcast %14 : vector<1x32xf32> to vector<32x32xf32>
    %295 = arith.mulf %293, %294 : vector<32x32xf32>
    %296 = vector.broadcast %15 : vector<1x32xf32> to vector<32x32xf32>
    %297 = arith.addf %295, %296 : vector<32x32xf32>
    %298 = arith.truncf %297 : vector<32x32xf32> to vector<32x32xbf16>
    %cst_90 = arith.constant dense<0.000000e+00> : vector<32x64xf32>
    %299 = tpu.matmul %298, %31, %cst_90 {dimension_numbers = #tpu.dot_dimension_numbers<[1], [0], [0], [1], [0, 0, 1, 1], [], []>} : vector<32x32xbf16>, vector<32x64xbf16>, vector<32x64xf32> -> vector<32x64xf32>
    %300 = arith.addf %299, %37 : vector<32x64xf32>
    %301 = arith.negf %300 : vector<32x64xf32>
    %302 = math.exp %301 : vector<32x64xf32>
    %cst_91 = arith.constant 1.000000e+00 : f32
    %303 = vector.broadcast %cst_91 : f32 to vector<32x64xf32>
    %304 = arith.addf %303, %302 : vector<32x64xf32>
    %305 = arith.divf %303, %304 : vector<32x64xf32>
    %306 = arith.mulf %300, %305 : vector<32x64xf32>
    %307 = arith.truncf %306 : vector<32x64xf32> to vector<32x64xbf16>
    %cst_92 = arith.constant dense<0.000000e+00> : vector<32x32xf32>
    %308 = tpu.matmul %307, %33, %cst_92 {dimension_numbers = #tpu.dot_dimension_numbers<[1], [0], [0], [1], [0, 0, 1, 1], [], []>} : vector<32x64xbf16>, vector<64x32xbf16>, vector<32x32xf32> -> vector<32x32xf32>
    %309 = arith.addf %275, %308 : vector<32x32xf32>
    %310 = arith.addf %309, %39 : vector<32x32xf32>
    %cst_93 = arith.constant dense<0.000000e+00> : vector<32xf32>
    %311 = vector.multi_reduction <add>, %310, %cst_93 [1] : vector<32x32xf32> to vector<32xf32>
    %312 = vector.shape_cast %311 : vector<32xf32> to vector<32x1xf32>
    %cst_94 = arith.constant 3.200000e+01 : f32
    %313 = vector.broadcast %cst_94 : f32 to vector<32x1xf32>
    %314 = arith.divf %312, %313 : vector<32x1xf32>
    %315 = vector.broadcast %314 : vector<32x1xf32> to vector<32x32xf32>
    %316 = arith.subf %310, %315 : vector<32x32xf32>
    %317 = arith.mulf %316, %316 : vector<32x32xf32>
    %cst_95 = arith.constant dense<0.000000e+00> : vector<32xf32>
    %318 = vector.multi_reduction <add>, %317, %cst_95 [1] : vector<32x32xf32> to vector<32xf32>
    %319 = vector.shape_cast %318 : vector<32xf32> to vector<32x1xf32>
    %cst_96 = arith.constant 3.200000e+01 : f32
    %320 = vector.broadcast %cst_96 : f32 to vector<32x1xf32>
    %321 = arith.divf %319, %320 : vector<32x1xf32>
    %322 = vector.broadcast %314 : vector<32x1xf32> to vector<32x32xf32>
    %323 = arith.subf %310, %322 : vector<32x32xf32>
    %cst_97 = arith.constant 9.99999974E-6 : f32
    %324 = vector.broadcast %cst_97 : f32 to vector<32x1xf32>
    %325 = arith.addf %321, %324 : vector<32x1xf32>
    %326 = math.rsqrt %325 : vector<32x1xf32>
    %327 = vector.broadcast %326 : vector<32x1xf32> to vector<32x32xf32>
    %328 = arith.mulf %323, %327 : vector<32x32xf32>
    %329 = vector.broadcast %12 : vector<1x32xf32> to vector<32x32xf32>
    %330 = arith.mulf %328, %329 : vector<32x32xf32>
    %331 = vector.broadcast %13 : vector<1x32xf32> to vector<32x32xf32>
    %332 = arith.addf %330, %331 : vector<32x32xf32>
    %333 = arith.truncf %332 : vector<32x32xf32> to vector<32x32xbf16>
    %334 = vector.extract_strided_slice %25 {offsets = [0, 0], sizes = [32, 32], strides = [1, 1]} : vector<48x32xbf16> to vector<32x32xbf16>
    %cst_98 = arith.constant dense<0.000000e+00> : vector<32x32xf32>
    %335 = tpu.matmul %333, %334, %cst_98 {dimension_numbers = #tpu.dot_dimension_numbers<[1], [0], [0], [1], [0, 0, 1, 1], [], []>} : vector<32x32xbf16>, vector<32x32xbf16>, vector<32x32xf32> -> vector<32x32xf32>
    %336 = vector.extract_strided_slice %25 {offsets = [32, 0], sizes = [16, 32], strides = [1, 1]} : vector<48x32xbf16> to vector<16x32xbf16>
    %cst_99 = arith.constant dense<0.000000e+00> : vector<32x32xf32>
    %337 = tpu.matmul %46, %336, %cst_99 {dimension_numbers = #tpu.dot_dimension_numbers<[1], [0], [0], [1], [0, 0, 1, 1], [], []>} : vector<32x16xbf16>, vector<16x32xbf16>, vector<32x32xf32> -> vector<32x32xf32>
    %338 = arith.addf %335, %337 : vector<32x32xf32>
    %339 = arith.truncf %338 : vector<32x32xf32> to vector<32x32xbf16>
    %340 = vector.extract_strided_slice %339 {offsets = [0, 0], sizes = [16, 32], strides = [1, 1]} : vector<32x32xbf16> to vector<16x32xbf16>
    %341 = vector.extract_strided_slice %76 {offsets = [0, 0], sizes = [64, 32], strides = [1, 1]} : vector<128x32xbf16> to vector<64x32xbf16>
    %342 = vector.extract_strided_slice %78 {offsets = [0, 0], sizes = [64, 128], strides = [1, 1]} : vector<128x128xbf16> to vector<64x128xbf16>
    %343 = vector.extract_strided_slice %340 {offsets = [0, 0], sizes = [16, 8], strides = [1, 1]} : vector<16x32xbf16> to vector<16x8xbf16>
    %344 = vector.extract_strided_slice %341 {offsets = [0, 0], sizes = [64, 8], strides = [1, 1]} : vector<64x32xbf16> to vector<64x8xbf16>
    %cst_100 = arith.constant dense<0.000000e+00> : vector<16x64xf32>
    %345 = tpu.matmul %343, %344, %cst_100 {dimension_numbers = #tpu.dot_dimension_numbers<[1], [1], [0], [0], [0, 0, 1, 0], [], []>} : vector<16x8xbf16>, vector<64x8xbf16>, vector<16x64xf32> -> vector<16x64xf32>
    %cst_101 = arith.constant 0.353553385 : f32
    %346 = vector.broadcast %cst_101 : f32 to vector<16x64xf32>
    %347 = arith.mulf %345, %346 : vector<16x64xf32>
    %348 = arith.addf %347, %45 : vector<16x64xf32>
    %cst_102 = arith.constant dense<0xFF800000> : vector<16xf32>
    %349 = vector.multi_reduction <maximumf>, %348, %cst_102 [1] : vector<16x64xf32> to vector<16xf32>
    %350 = vector.shape_cast %349 : vector<16xf32> to vector<16x1xf32>
    %351 = vector.broadcast %350 : vector<16x1xf32> to vector<16x64xf32>
    %352 = arith.subf %348, %351 : vector<16x64xf32>
    %353 = math.exp %352 : vector<16x64xf32>
    %cst_103 = arith.constant dense<0.000000e+00> : vector<16xf32>
    %354 = vector.multi_reduction <add>, %353, %cst_103 [1] : vector<16x64xf32> to vector<16xf32>
    %355 = vector.shape_cast %354 : vector<16xf32> to vector<16x1xf32>
    %356 = tpu.reciprocal %355 {approx = true} : vector<16x1xf32> -> vector<16x1xf32>
    %357 = vector.broadcast %356 : vector<16x1xf32> to vector<16x64xf32>
    %358 = arith.mulf %353, %357 : vector<16x64xf32>
    %359 = arith.truncf %358 : vector<16x64xf32> to vector<16x64xbf16>
    %360 = vector.extract_strided_slice %342 {offsets = [0, 0], sizes = [64, 32], strides = [1, 1]} : vector<64x128xbf16> to vector<64x32xbf16>
    %cst_104 = arith.constant dense<0.000000e+00> : vector<16x32xf32>
    %361 = tpu.matmul %359, %360, %cst_104 {dimension_numbers = #tpu.dot_dimension_numbers<[1], [0], [0], [1], [0, 0, 1, 1], [], []>} : vector<16x64xbf16>, vector<64x32xbf16>, vector<16x32xf32> -> vector<16x32xf32>
    %362 = arith.addf %35, %361 : vector<16x32xf32>
    %363 = vector.extract_strided_slice %340 {offsets = [0, 8], sizes = [16, 8], strides = [1, 1]} : vector<16x32xbf16> to vector<16x8xbf16>
    %364 = vector.extract_strided_slice %341 {offsets = [0, 8], sizes = [64, 8], strides = [1, 1]} : vector<64x32xbf16> to vector<64x8xbf16>
    %cst_105 = arith.constant dense<0.000000e+00> : vector<16x64xf32>
    %365 = tpu.matmul %363, %364, %cst_105 {dimension_numbers = #tpu.dot_dimension_numbers<[1], [1], [0], [0], [0, 0, 1, 0], [], []>} : vector<16x8xbf16>, vector<64x8xbf16>, vector<16x64xf32> -> vector<16x64xf32>
    %cst_106 = arith.constant 0.353553385 : f32
    %366 = vector.broadcast %cst_106 : f32 to vector<16x64xf32>
    %367 = arith.mulf %365, %366 : vector<16x64xf32>
    %368 = arith.addf %367, %45 : vector<16x64xf32>
    %cst_107 = arith.constant dense<0xFF800000> : vector<16xf32>
    %369 = vector.multi_reduction <maximumf>, %368, %cst_107 [1] : vector<16x64xf32> to vector<16xf32>
    %370 = vector.shape_cast %369 : vector<16xf32> to vector<16x1xf32>
    %371 = vector.broadcast %370 : vector<16x1xf32> to vector<16x64xf32>
    %372 = arith.subf %368, %371 : vector<16x64xf32>
    %373 = math.exp %372 : vector<16x64xf32>
    %cst_108 = arith.constant dense<0.000000e+00> : vector<16xf32>
    %374 = vector.multi_reduction <add>, %373, %cst_108 [1] : vector<16x64xf32> to vector<16xf32>
    %375 = vector.shape_cast %374 : vector<16xf32> to vector<16x1xf32>
    %376 = tpu.reciprocal %375 {approx = true} : vector<16x1xf32> -> vector<16x1xf32>
    %377 = vector.broadcast %376 : vector<16x1xf32> to vector<16x64xf32>
    %378 = arith.mulf %373, %377 : vector<16x64xf32>
    %379 = arith.truncf %378 : vector<16x64xf32> to vector<16x64xbf16>
    %380 = vector.extract_strided_slice %342 {offsets = [0, 32], sizes = [64, 32], strides = [1, 1]} : vector<64x128xbf16> to vector<64x32xbf16>
    %cst_109 = arith.constant dense<0.000000e+00> : vector<16x32xf32>
    %381 = tpu.matmul %379, %380, %cst_109 {dimension_numbers = #tpu.dot_dimension_numbers<[1], [0], [0], [1], [0, 0, 1, 1], [], []>} : vector<16x64xbf16>, vector<64x32xbf16>, vector<16x32xf32> -> vector<16x32xf32>
    %382 = arith.addf %362, %381 : vector<16x32xf32>
    %383 = vector.extract_strided_slice %340 {offsets = [0, 16], sizes = [16, 8], strides = [1, 1]} : vector<16x32xbf16> to vector<16x8xbf16>
    %384 = vector.extract_strided_slice %341 {offsets = [0, 16], sizes = [64, 8], strides = [1, 1]} : vector<64x32xbf16> to vector<64x8xbf16>
    %cst_110 = arith.constant dense<0.000000e+00> : vector<16x64xf32>
    %385 = tpu.matmul %383, %384, %cst_110 {dimension_numbers = #tpu.dot_dimension_numbers<[1], [1], [0], [0], [0, 0, 1, 0], [], []>} : vector<16x8xbf16>, vector<64x8xbf16>, vector<16x64xf32> -> vector<16x64xf32>
    %cst_111 = arith.constant 0.353553385 : f32
    %386 = vector.broadcast %cst_111 : f32 to vector<16x64xf32>
    %387 = arith.mulf %385, %386 : vector<16x64xf32>
    %388 = arith.addf %387, %45 : vector<16x64xf32>
    %cst_112 = arith.constant dense<0xFF800000> : vector<16xf32>
    %389 = vector.multi_reduction <maximumf>, %388, %cst_112 [1] : vector<16x64xf32> to vector<16xf32>
    %390 = vector.shape_cast %389 : vector<16xf32> to vector<16x1xf32>
    %391 = vector.broadcast %390 : vector<16x1xf32> to vector<16x64xf32>
    %392 = arith.subf %388, %391 : vector<16x64xf32>
    %393 = math.exp %392 : vector<16x64xf32>
    %cst_113 = arith.constant dense<0.000000e+00> : vector<16xf32>
    %394 = vector.multi_reduction <add>, %393, %cst_113 [1] : vector<16x64xf32> to vector<16xf32>
    %395 = vector.shape_cast %394 : vector<16xf32> to vector<16x1xf32>
    %396 = tpu.reciprocal %395 {approx = true} : vector<16x1xf32> -> vector<16x1xf32>
    %397 = vector.broadcast %396 : vector<16x1xf32> to vector<16x64xf32>
    %398 = arith.mulf %393, %397 : vector<16x64xf32>
    %399 = arith.truncf %398 : vector<16x64xf32> to vector<16x64xbf16>
    %400 = vector.extract_strided_slice %342 {offsets = [0, 64], sizes = [64, 32], strides = [1, 1]} : vector<64x128xbf16> to vector<64x32xbf16>
    %cst_114 = arith.constant dense<0.000000e+00> : vector<16x32xf32>
    %401 = tpu.matmul %399, %400, %cst_114 {dimension_numbers = #tpu.dot_dimension_numbers<[1], [0], [0], [1], [0, 0, 1, 1], [], []>} : vector<16x64xbf16>, vector<64x32xbf16>, vector<16x32xf32> -> vector<16x32xf32>
    %402 = arith.addf %382, %401 : vector<16x32xf32>
    %403 = vector.extract_strided_slice %340 {offsets = [0, 24], sizes = [16, 8], strides = [1, 1]} : vector<16x32xbf16> to vector<16x8xbf16>
    %404 = vector.extract_strided_slice %341 {offsets = [0, 24], sizes = [64, 8], strides = [1, 1]} : vector<64x32xbf16> to vector<64x8xbf16>
    %cst_115 = arith.constant dense<0.000000e+00> : vector<16x64xf32>
    %405 = tpu.matmul %403, %404, %cst_115 {dimension_numbers = #tpu.dot_dimension_numbers<[1], [1], [0], [0], [0, 0, 1, 0], [], []>} : vector<16x8xbf16>, vector<64x8xbf16>, vector<16x64xf32> -> vector<16x64xf32>
    %cst_116 = arith.constant 0.353553385 : f32
    %406 = vector.broadcast %cst_116 : f32 to vector<16x64xf32>
    %407 = arith.mulf %405, %406 : vector<16x64xf32>
    %408 = arith.addf %407, %45 : vector<16x64xf32>
    %cst_117 = arith.constant dense<0xFF800000> : vector<16xf32>
    %409 = vector.multi_reduction <maximumf>, %408, %cst_117 [1] : vector<16x64xf32> to vector<16xf32>
    %410 = vector.shape_cast %409 : vector<16xf32> to vector<16x1xf32>
    %411 = vector.broadcast %410 : vector<16x1xf32> to vector<16x64xf32>
    %412 = arith.subf %408, %411 : vector<16x64xf32>
    %413 = math.exp %412 : vector<16x64xf32>
    %cst_118 = arith.constant dense<0.000000e+00> : vector<16xf32>
    %414 = vector.multi_reduction <add>, %413, %cst_118 [1] : vector<16x64xf32> to vector<16xf32>
    %415 = vector.shape_cast %414 : vector<16xf32> to vector<16x1xf32>
    %416 = tpu.reciprocal %415 {approx = true} : vector<16x1xf32> -> vector<16x1xf32>
    %417 = vector.broadcast %416 : vector<16x1xf32> to vector<16x64xf32>
    %418 = arith.mulf %413, %417 : vector<16x64xf32>
    %419 = arith.truncf %418 : vector<16x64xf32> to vector<16x64xbf16>
    %420 = vector.extract_strided_slice %342 {offsets = [0, 96], sizes = [64, 32], strides = [1, 1]} : vector<64x128xbf16> to vector<64x32xbf16>
    %cst_119 = arith.constant dense<0.000000e+00> : vector<16x32xf32>
    %421 = tpu.matmul %419, %420, %cst_119 {dimension_numbers = #tpu.dot_dimension_numbers<[1], [0], [0], [1], [0, 0, 1, 1], [], []>} : vector<16x64xbf16>, vector<64x32xbf16>, vector<16x32xf32> -> vector<16x32xf32>
    %422 = arith.addf %402, %421 : vector<16x32xf32>
    %423 = vector.extract_strided_slice %339 {offsets = [16, 0], sizes = [16, 32], strides = [1, 1]} : vector<32x32xbf16> to vector<16x32xbf16>
    %424 = vector.extract_strided_slice %76 {offsets = [64, 0], sizes = [64, 32], strides = [1, 1]} : vector<128x32xbf16> to vector<64x32xbf16>
    %425 = vector.extract_strided_slice %78 {offsets = [64, 0], sizes = [64, 128], strides = [1, 1]} : vector<128x128xbf16> to vector<64x128xbf16>
    %426 = vector.extract_strided_slice %423 {offsets = [0, 0], sizes = [16, 8], strides = [1, 1]} : vector<16x32xbf16> to vector<16x8xbf16>
    %427 = vector.extract_strided_slice %424 {offsets = [0, 0], sizes = [64, 8], strides = [1, 1]} : vector<64x32xbf16> to vector<64x8xbf16>
    %cst_120 = arith.constant dense<0.000000e+00> : vector<16x64xf32>
    %428 = tpu.matmul %426, %427, %cst_120 {dimension_numbers = #tpu.dot_dimension_numbers<[1], [1], [0], [0], [0, 0, 1, 0], [], []>} : vector<16x8xbf16>, vector<64x8xbf16>, vector<16x64xf32> -> vector<16x64xf32>
    %cst_121 = arith.constant 0.353553385 : f32
    %429 = vector.broadcast %cst_121 : f32 to vector<16x64xf32>
    %430 = arith.mulf %428, %429 : vector<16x64xf32>
    %431 = arith.addf %430, %45 : vector<16x64xf32>
    %cst_122 = arith.constant dense<0xFF800000> : vector<16xf32>
    %432 = vector.multi_reduction <maximumf>, %431, %cst_122 [1] : vector<16x64xf32> to vector<16xf32>
    %433 = vector.shape_cast %432 : vector<16xf32> to vector<16x1xf32>
    %434 = vector.broadcast %433 : vector<16x1xf32> to vector<16x64xf32>
    %435 = arith.subf %431, %434 : vector<16x64xf32>
    %436 = math.exp %435 : vector<16x64xf32>
    %cst_123 = arith.constant dense<0.000000e+00> : vector<16xf32>
    %437 = vector.multi_reduction <add>, %436, %cst_123 [1] : vector<16x64xf32> to vector<16xf32>
    %438 = vector.shape_cast %437 : vector<16xf32> to vector<16x1xf32>
    %439 = tpu.reciprocal %438 {approx = true} : vector<16x1xf32> -> vector<16x1xf32>
    %440 = vector.broadcast %439 : vector<16x1xf32> to vector<16x64xf32>
    %441 = arith.mulf %436, %440 : vector<16x64xf32>
    %442 = arith.truncf %441 : vector<16x64xf32> to vector<16x64xbf16>
    %443 = vector.extract_strided_slice %425 {offsets = [0, 0], sizes = [64, 32], strides = [1, 1]} : vector<64x128xbf16> to vector<64x32xbf16>
    %cst_124 = arith.constant dense<0.000000e+00> : vector<16x32xf32>
    %444 = tpu.matmul %442, %443, %cst_124 {dimension_numbers = #tpu.dot_dimension_numbers<[1], [0], [0], [1], [0, 0, 1, 1], [], []>} : vector<16x64xbf16>, vector<64x32xbf16>, vector<16x32xf32> -> vector<16x32xf32>
    %445 = arith.addf %35, %444 : vector<16x32xf32>
    %446 = vector.extract_strided_slice %423 {offsets = [0, 8], sizes = [16, 8], strides = [1, 1]} : vector<16x32xbf16> to vector<16x8xbf16>
    %447 = vector.extract_strided_slice %424 {offsets = [0, 8], sizes = [64, 8], strides = [1, 1]} : vector<64x32xbf16> to vector<64x8xbf16>
    %cst_125 = arith.constant dense<0.000000e+00> : vector<16x64xf32>
    %448 = tpu.matmul %446, %447, %cst_125 {dimension_numbers = #tpu.dot_dimension_numbers<[1], [1], [0], [0], [0, 0, 1, 0], [], []>} : vector<16x8xbf16>, vector<64x8xbf16>, vector<16x64xf32> -> vector<16x64xf32>
    %cst_126 = arith.constant 0.353553385 : f32
    %449 = vector.broadcast %cst_126 : f32 to vector<16x64xf32>
    %450 = arith.mulf %448, %449 : vector<16x64xf32>
    %451 = arith.addf %450, %45 : vector<16x64xf32>
    %cst_127 = arith.constant dense<0xFF800000> : vector<16xf32>
    %452 = vector.multi_reduction <maximumf>, %451, %cst_127 [1] : vector<16x64xf32> to vector<16xf32>
    %453 = vector.shape_cast %452 : vector<16xf32> to vector<16x1xf32>
    %454 = vector.broadcast %453 : vector<16x1xf32> to vector<16x64xf32>
    %455 = arith.subf %451, %454 : vector<16x64xf32>
    %456 = math.exp %455 : vector<16x64xf32>
    %cst_128 = arith.constant dense<0.000000e+00> : vector<16xf32>
    %457 = vector.multi_reduction <add>, %456, %cst_128 [1] : vector<16x64xf32> to vector<16xf32>
    %458 = vector.shape_cast %457 : vector<16xf32> to vector<16x1xf32>
    %459 = tpu.reciprocal %458 {approx = true} : vector<16x1xf32> -> vector<16x1xf32>
    %460 = vector.broadcast %459 : vector<16x1xf32> to vector<16x64xf32>
    %461 = arith.mulf %456, %460 : vector<16x64xf32>
    %462 = arith.truncf %461 : vector<16x64xf32> to vector<16x64xbf16>
    %463 = vector.extract_strided_slice %425 {offsets = [0, 32], sizes = [64, 32], strides = [1, 1]} : vector<64x128xbf16> to vector<64x32xbf16>
    %cst_129 = arith.constant dense<0.000000e+00> : vector<16x32xf32>
    %464 = tpu.matmul %462, %463, %cst_129 {dimension_numbers = #tpu.dot_dimension_numbers<[1], [0], [0], [1], [0, 0, 1, 1], [], []>} : vector<16x64xbf16>, vector<64x32xbf16>, vector<16x32xf32> -> vector<16x32xf32>
    %465 = arith.addf %445, %464 : vector<16x32xf32>
    %466 = vector.extract_strided_slice %423 {offsets = [0, 16], sizes = [16, 8], strides = [1, 1]} : vector<16x32xbf16> to vector<16x8xbf16>
    %467 = vector.extract_strided_slice %424 {offsets = [0, 16], sizes = [64, 8], strides = [1, 1]} : vector<64x32xbf16> to vector<64x8xbf16>
    %cst_130 = arith.constant dense<0.000000e+00> : vector<16x64xf32>
    %468 = tpu.matmul %466, %467, %cst_130 {dimension_numbers = #tpu.dot_dimension_numbers<[1], [1], [0], [0], [0, 0, 1, 0], [], []>} : vector<16x8xbf16>, vector<64x8xbf16>, vector<16x64xf32> -> vector<16x64xf32>
    %cst_131 = arith.constant 0.353553385 : f32
    %469 = vector.broadcast %cst_131 : f32 to vector<16x64xf32>
    %470 = arith.mulf %468, %469 : vector<16x64xf32>
    %471 = arith.addf %470, %45 : vector<16x64xf32>
    %cst_132 = arith.constant dense<0xFF800000> : vector<16xf32>
    %472 = vector.multi_reduction <maximumf>, %471, %cst_132 [1] : vector<16x64xf32> to vector<16xf32>
    %473 = vector.shape_cast %472 : vector<16xf32> to vector<16x1xf32>
    %474 = vector.broadcast %473 : vector<16x1xf32> to vector<16x64xf32>
    %475 = arith.subf %471, %474 : vector<16x64xf32>
    %476 = math.exp %475 : vector<16x64xf32>
    %cst_133 = arith.constant dense<0.000000e+00> : vector<16xf32>
    %477 = vector.multi_reduction <add>, %476, %cst_133 [1] : vector<16x64xf32> to vector<16xf32>
    %478 = vector.shape_cast %477 : vector<16xf32> to vector<16x1xf32>
    %479 = tpu.reciprocal %478 {approx = true} : vector<16x1xf32> -> vector<16x1xf32>
    %480 = vector.broadcast %479 : vector<16x1xf32> to vector<16x64xf32>
    %481 = arith.mulf %476, %480 : vector<16x64xf32>
    %482 = arith.truncf %481 : vector<16x64xf32> to vector<16x64xbf16>
    %483 = vector.extract_strided_slice %425 {offsets = [0, 64], sizes = [64, 32], strides = [1, 1]} : vector<64x128xbf16> to vector<64x32xbf16>
    %cst_134 = arith.constant dense<0.000000e+00> : vector<16x32xf32>
    %484 = tpu.matmul %482, %483, %cst_134 {dimension_numbers = #tpu.dot_dimension_numbers<[1], [0], [0], [1], [0, 0, 1, 1], [], []>} : vector<16x64xbf16>, vector<64x32xbf16>, vector<16x32xf32> -> vector<16x32xf32>
    %485 = arith.addf %465, %484 : vector<16x32xf32>
    %486 = vector.extract_strided_slice %423 {offsets = [0, 24], sizes = [16, 8], strides = [1, 1]} : vector<16x32xbf16> to vector<16x8xbf16>
    %487 = vector.extract_strided_slice %424 {offsets = [0, 24], sizes = [64, 8], strides = [1, 1]} : vector<64x32xbf16> to vector<64x8xbf16>
    %cst_135 = arith.constant dense<0.000000e+00> : vector<16x64xf32>
    %488 = tpu.matmul %486, %487, %cst_135 {dimension_numbers = #tpu.dot_dimension_numbers<[1], [1], [0], [0], [0, 0, 1, 0], [], []>} : vector<16x8xbf16>, vector<64x8xbf16>, vector<16x64xf32> -> vector<16x64xf32>
    %cst_136 = arith.constant 0.353553385 : f32
    %489 = vector.broadcast %cst_136 : f32 to vector<16x64xf32>
    %490 = arith.mulf %488, %489 : vector<16x64xf32>
    %491 = arith.addf %490, %45 : vector<16x64xf32>
    %cst_137 = arith.constant dense<0xFF800000> : vector<16xf32>
    %492 = vector.multi_reduction <maximumf>, %491, %cst_137 [1] : vector<16x64xf32> to vector<16xf32>
    %493 = vector.shape_cast %492 : vector<16xf32> to vector<16x1xf32>
    %494 = vector.broadcast %493 : vector<16x1xf32> to vector<16x64xf32>
    %495 = arith.subf %491, %494 : vector<16x64xf32>
    %496 = math.exp %495 : vector<16x64xf32>
    %cst_138 = arith.constant dense<0.000000e+00> : vector<16xf32>
    %497 = vector.multi_reduction <add>, %496, %cst_138 [1] : vector<16x64xf32> to vector<16xf32>
    %498 = vector.shape_cast %497 : vector<16xf32> to vector<16x1xf32>
    %499 = tpu.reciprocal %498 {approx = true} : vector<16x1xf32> -> vector<16x1xf32>
    %500 = vector.broadcast %499 : vector<16x1xf32> to vector<16x64xf32>
    %501 = arith.mulf %496, %500 : vector<16x64xf32>
    %502 = arith.truncf %501 : vector<16x64xf32> to vector<16x64xbf16>
    %503 = vector.extract_strided_slice %425 {offsets = [0, 96], sizes = [64, 32], strides = [1, 1]} : vector<64x128xbf16> to vector<64x32xbf16>
    %cst_139 = arith.constant dense<0.000000e+00> : vector<16x32xf32>
    %504 = tpu.matmul %502, %503, %cst_139 {dimension_numbers = #tpu.dot_dimension_numbers<[1], [0], [0], [1], [0, 0, 1, 1], [], []>} : vector<16x64xbf16>, vector<64x32xbf16>, vector<16x32xf32> -> vector<16x32xf32>
    %505 = arith.addf %485, %504 : vector<16x32xf32>
    %506 = tpu.concatenate %422, %505 in 0 : vector<16x32xf32>, vector<16x32xf32> -> vector<32x32xf32>
    %507 = arith.addf %310, %506 : vector<32x32xf32>
    %cst_140 = arith.constant dense<0.000000e+00> : vector<32xf32>
    %508 = vector.multi_reduction <add>, %507, %cst_140 [1] : vector<32x32xf32> to vector<32xf32>
    %509 = vector.shape_cast %508 : vector<32xf32> to vector<32x1xf32>
    %cst_141 = arith.constant 3.200000e+01 : f32
    %510 = vector.broadcast %cst_141 : f32 to vector<32x1xf32>
    %511 = arith.divf %509, %510 : vector<32x1xf32>
    %512 = vector.broadcast %511 : vector<32x1xf32> to vector<32x32xf32>
    %513 = arith.subf %507, %512 : vector<32x32xf32>
    %514 = arith.mulf %513, %513 : vector<32x32xf32>
    %cst_142 = arith.constant dense<0.000000e+00> : vector<32xf32>
    %515 = vector.multi_reduction <add>, %514, %cst_142 [1] : vector<32x32xf32> to vector<32xf32>
    %516 = vector.shape_cast %515 : vector<32xf32> to vector<32x1xf32>
    %cst_143 = arith.constant 3.200000e+01 : f32
    %517 = vector.broadcast %cst_143 : f32 to vector<32x1xf32>
    %518 = arith.divf %516, %517 : vector<32x1xf32>
    %519 = vector.broadcast %511 : vector<32x1xf32> to vector<32x32xf32>
    %520 = arith.subf %507, %519 : vector<32x32xf32>
    %cst_144 = arith.constant 9.99999974E-6 : f32
    %521 = vector.broadcast %cst_144 : f32 to vector<32x1xf32>
    %522 = arith.addf %518, %521 : vector<32x1xf32>
    %523 = math.rsqrt %522 : vector<32x1xf32>
    %524 = vector.broadcast %523 : vector<32x1xf32> to vector<32x32xf32>
    %525 = arith.mulf %520, %524 : vector<32x32xf32>
    %526 = vector.broadcast %14 : vector<1x32xf32> to vector<32x32xf32>
    %527 = arith.mulf %525, %526 : vector<32x32xf32>
    %528 = vector.broadcast %15 : vector<1x32xf32> to vector<32x32xf32>
    %529 = arith.addf %527, %528 : vector<32x32xf32>
    %530 = arith.truncf %529 : vector<32x32xf32> to vector<32x32xbf16>
    %cst_145 = arith.constant dense<0.000000e+00> : vector<32x64xf32>
    %531 = tpu.matmul %530, %31, %cst_145 {dimension_numbers = #tpu.dot_dimension_numbers<[1], [0], [0], [1], [0, 0, 1, 1], [], []>} : vector<32x32xbf16>, vector<32x64xbf16>, vector<32x64xf32> -> vector<32x64xf32>
    %532 = arith.addf %531, %37 : vector<32x64xf32>
    %533 = arith.negf %532 : vector<32x64xf32>
    %534 = math.exp %533 : vector<32x64xf32>
    %cst_146 = arith.constant 1.000000e+00 : f32
    %535 = vector.broadcast %cst_146 : f32 to vector<32x64xf32>
    %536 = arith.addf %535, %534 : vector<32x64xf32>
    %537 = arith.divf %535, %536 : vector<32x64xf32>
    %538 = arith.mulf %532, %537 : vector<32x64xf32>
    %539 = arith.truncf %538 : vector<32x64xf32> to vector<32x64xbf16>
    %cst_147 = arith.constant dense<0.000000e+00> : vector<32x32xf32>
    %540 = tpu.matmul %539, %33, %cst_147 {dimension_numbers = #tpu.dot_dimension_numbers<[1], [0], [0], [1], [0, 0, 1, 1], [], []>} : vector<32x64xbf16>, vector<64x32xbf16>, vector<32x32xf32> -> vector<32x32xf32>
    %541 = arith.addf %507, %540 : vector<32x32xf32>
    %542 = arith.addf %541, %39 : vector<32x32xf32>
    %c0_148 = arith.constant 0 : index
    %c0_149 = arith.constant 0 : index
    %c0_150 = arith.constant 0 : index
    %543 = vector.load %arg12[%c0_148, %c0_149, %c0_150] : memref<1x32x32xf32, #tpu.memory_space<vmem>>, vector<1x32x32xf32>
    %544 = vector.shape_cast %543 : vector<1x32x32xf32> to vector<32x32xf32>
    %545 = vector.shape_cast %542 : vector<32x32xf32> to vector<1x32x32xf32>
    tpu.vector_store %arg12[%c0_148, %c0_149, %c0_150], %545 {strides = array<i32>} : memref<1x32x32xf32, #tpu.memory_space<vmem>>, vector<1x32x32xf32>,
    return
  }
  func.func @transform_0(%arg0: i32, %arg1: memref<2xi32, #tpu.memory_space<smem>>) -> (i32, i32, i32) {
    %c0_i32 = arith.constant 0 : i32
    %c0_i32_0 = arith.constant 0 : i32
    %c0_i32_1 = arith.constant 0 : i32
    return %arg0, %c0_i32, %c0_i32_0 : i32, i32, i32
  }
  func.func @transform_1(%arg0: i32, %arg1: memref<2xi32, #tpu.memory_space<smem>>) -> (i32, i32, i32) {
    %c0_i32 = arith.constant 0 : i32
    %c0_i32_0 = arith.constant 0 : i32
    %c0_i32_1 = arith.constant 0 : i32
    return %arg0, %c0_i32, %c0_i32_0 : i32, i32, i32
  }
  func.func @transform_2(%arg0: i32, %arg1: memref<2xi32, #tpu.memory_space<smem>>) -> (i32, i32, i32) {
    %c0_i32 = arith.constant 0 : i32
    %c0_i32_0 = arith.constant 0 : i32
    %c0_i32_1 = arith.constant 0 : i32
    return %arg0, %c0_i32, %c0_i32_0 : i32, i32, i32
  }
  func.func @transform_3(%arg0: i32, %arg1: memref<2xi32, #tpu.memory_space<smem>>) -> (i32, i32, i32) {
    %c0_i32 = arith.constant 0 : i32
    %c0_i32_0 = arith.constant 0 : i32
    %c0_i32_1 = arith.constant 0 : i32
    return %arg0, %c0_i32, %c0_i32_0 : i32, i32, i32
  }
  func.func @transform_4(%arg0: i32, %arg1: memref<2xi32, #tpu.memory_space<smem>>) -> (i32, i32, i32) {
    %c0_i32 = arith.constant 0 : i32
    %c0_i32_0 = arith.constant 0 : i32
    %c0_i32_1 = arith.constant 0 : i32
    return %arg0, %c0_i32, %c0_i32_0 : i32, i32, i32
  }
  func.func @transform_5(%arg0: i32, %arg1: memref<2xi32, #tpu.memory_space<smem>>) -> (i32, i32, i32) {
    %c0_i32 = arith.constant 0 : i32
    %c0_i32_0 = arith.constant 0 : i32
    %c0_i32_1 = arith.constant 0 : i32
    return %arg0, %c0_i32, %c0_i32_0 : i32, i32, i32
  }
  func.func @transform_6(%arg0: i32, %arg1: memref<2xi32, #tpu.memory_space<smem>>) -> (i32, i32, i32) {
    %c0_i32 = arith.constant 0 : i32
    %c0_i32_0 = arith.constant 0 : i32
    %c0_i32_1 = arith.constant 0 : i32
    return %arg0, %c0_i32, %c0_i32_0 : i32, i32, i32
  }
  func.func @transform_7(%arg0: i32, %arg1: memref<2xi32, #tpu.memory_space<smem>>) -> (i32, i32, i32) {
    %c0_i32 = arith.constant 0 : i32
    %c0_i32_0 = arith.constant 0 : i32
    %c0_i32_1 = arith.constant 0 : i32
    return %arg0, %c0_i32, %c0_i32_0 : i32, i32, i32
  }
  func.func @transform_8(%arg0: i32, %arg1: memref<2xi32, #tpu.memory_space<smem>>) -> (i32, i32, i32) {
    %c0_i32 = arith.constant 0 : i32
    %c0_i32_0 = arith.constant 0 : i32
    %c0_i32_1 = arith.constant 0 : i32
    return %arg0, %c0_i32, %c0_i32_0 : i32, i32, i32
  }
  func.func @transform_9(%arg0: i32, %arg1: memref<2xi32, #tpu.memory_space<smem>>) -> (i32, i32, i32) {
    %c0_i32 = arith.constant 0 : i32
    %c0_i32_0 = arith.constant 0 : i32
    %c0_i32_1 = arith.constant 0 : i32
    return %arg0, %c0_i32, %c0_i32_0 : i32, i32, i32
  }
  func.func @transform_10(%arg0: i32, %arg1: memref<2xi32, #tpu.memory_space<smem>>) -> (i32, i32, i32) {
    %c0_i32 = arith.constant 0 : i32
    %c0_i32_0 = arith.constant 0 : i32
    %c0_i32_1 = arith.constant 0 : i32
    return %arg0, %c0_i32, %c0_i32_0 : i32, i32, i32
  }
}

</mosaic_0001>

<bundles_post_ra>
// kernel: tpu_custom_call.1
= control target key start
LH: loop header
LB: loop body
LE: loop exit
PB: predicated region body
PF: predicated region fallthrough
CT: control target
= control target key end

     0   :  { %s7318_s0 = inlined_call_operand.vmem [shape: s32[2], index: 0, kind: input, shape index: {}]   ;;  %s7319_s1 = inlined_call_operand.vmem [shape: f32[2,128,48], index: 1, kind: input, shape index: {}]   ;;  %s7320_s2 = inlined_call_operand.vmem [shape: f32[2,32,48], index: 2, kind: input, shape index: {}]   ;;  %s7321_s3 = inlined_call_operand.vmem [shape: bf16[2,48,32], index: 3, kind: input, shape index: {}]   ;;  %s7322_s4 = inlined_call_operand.vmem [shape: bf16[2,48,32], index: 4, kind: input, shape index: {}]   ;;  %s7323_s5 = inlined_call_operand.vmem [shape: bf16[2,32,128], index: 5, kind: input, shape index: {}]   ;;  %s7324_s6 = inlined_call_operand.vmem [shape: bf16[2,32,64], index: 6, kind: input, shape index: {}]   ;;  %s7325_s7 = inlined_call_operand.vmem [shape: bf16[2,64,32], index: 7, kind: input, shape index: {}]   ;;  %s7326_s8 = inlined_call_operand.vmem [shape: f32[2,6,32], index: 8, kind: input, shape index: {}]   ;;  %s7327_s9 = inlined_call_operand.vmem [shape: f32[2,2,32], index: 9, kind: input, shape index: {}]   ;;  %s7328_s10 = inlined_call_operand.vmem [shape: f32[2,1,64], index: 10, kind: input, shape index: {}]   ;;  %s7329_s11 = inlined_call_operand.hbm [shape: f32[2,32,32], index: 11, kind: output, shape index: {}]  }
   0x1   :  { %7375 = sst [smem:[#allocation47_spill]] %s7319_s1  ;;  %s16_s19 = sshll.u32 %s7318_s0, 4  ;;  %s17_s19 = int_to_ptr.vmem [resolvable:$true] %s16_s19 }
   0x2   :  { %s5552_s20 = scalar_lea.vmem %s17_s19, 16  ;;  %p5557_p1 = scmp.lt.s32.totalorder %s17_s19, %s17_s19 }
   0x3   :  { %p5553_p0 = scmp.ne.s32.totalorder %s17_s19, %s5552_s20  ;;  %p5558_p2 = scmp.lt.s32.totalorder %s5552_s20, %s5552_s20 }
   0x5   :  { %p5559_p3 = por %p5558_p2, %p5557_p1 }
   0x7   :  { %p5560_p4 = pnand %p5559_p3, %p5553_p0 }
   0x9   :  { %5563 = shalt.err (!%p5560_p4)  }
   0xa   :  { %s5628_s21 = smov [#allocation3]  }
   0xb   :  { %19 = dma.vmem_to_smem %s17_s19, 16, %s5628_s21, [#allocation2] }
   0xc   :  { %5606 = dma.done.wait [#allocation2], 16 }
   0xd   :  { %5607 = vsyncadd [#allocation2], 4294967280 }
   0xe   :  { %21 = sfence }
   0xf   :  { %22 = vsyncpa [#allocation5], 0 }
  0x10   :  { %24 = vsyncpa [#allocation5 + $0x1], 0  ;;  %s5704_s22 = smov 0   ;;  %s5706_s23 = smov 0  }
  0x11   :  { %s5708_s0 = smov 0   ;;  %s5710_s24 = smov 0  }
  0x12 LB: > { %s5725_s25 = sadd.s32 4294967295, %s5626_s24   ;;  %s4399_s26 = sadd.s32 4294967294, %s5626_s24   ;;  %s5626_s24 = sphi %s5710_s24, %s7462_s24   ;;  %s5622_s0 = sphi %s5708_s0, %s7461_s0   ;;  %s5618_s23 = sphi %s5706_s23, %s7460_s23   ;;  %s5614_s22 = sphi %s5704_s22, %s7459_s22  }
  0x13   : > { %s5729_s27 = sadd.s32 1, %s5626_s24   ;;  %s297_s28 = sadd.s32 1, %s5622_s0 }
  0x14   : > { %s294_s29 = ssub.s32 %s5626_s24, %s5729_s27  ;;  %p307_p5 = scmp.ne.s32.totalorder %s5622_s0, %s5618_s23 }
  0x15   : > { %p295_p6 = scmp.eq.s32.totalorder %s294_s29, 0  ;;  %p308_p7 = scmp.eq.s32.totalorder %s5725_s25, 1 }
  0x16   : > { %p313_p8 = scmp.ne.s32.totalorder %s5618_s23, %s5614_s22  ;;  %p314_p9 = scmp.eq.s32.totalorder %s4399_s26, 1 }
  0x17   : > { %s5740_s30 = scalar_select %p295_p6, %s5622_s0, %s297_s28  }
  0x18   : > { %p5742_p10 = por %p308_p7, %p307_p5  ;;  %p5746_p11 = por %p314_p9, %p313_p8 }
  0x19   : > { %p4402_p12 = scmp.ge.s32.totalorder %s5626_s24, 1  ;;  %p408_p13 = scmp.lt.s32.totalorder %s5626_s24, 3 }
  0x1b   : > { %p409_p0 = pnand %p4402_p12, %p408_p13 }
  0x1d   : > { %412 = sbr.rel (%p409_p0) target bundleno = 11761 (0x2df1), region = 60 }
  0x22   : > { %p487_p1 = scmp.lt.s32.totalorder %s5725_s25, 1  ;;  %vm615_vm0 = vcmask 261120   ;;  %s7378_s1 = sld [smem:[#allocation47_spill]]  ;;  %vm903_vm1 = vcmask 130048   ;;  %vm5631_vm2 = vmmov 0   ;;  %vm1489_vm3 = vcmask 64512  }
  0x23   : > { %s7330_s16 = smov 96   ;;  %vm1550_vm5 = vcmask 523264   ;;  %s5635_s21 = smov 64  }
  0x24   : > { %s5754_s14 = scalar_select %p487_p1, %s5725_s25, 1 }
  0x26   : > { %s4516_s15 = sshll.u32 %s5754_s14, 7  ;;  %s4517_s19 = sshll.u32 %s5754_s14, 5 }
  0x27   : > { %s5794_s26 = scalar_lea.vmem %s7325_s7, %s4517_s19  ;;  %s5248_s17 = smul.u32 24, %s5754_s14 }
  0x28   : > { %s5760_s18 = scalar_lea.vmem %s7378_s1, %s4516_s15  ;;  %s5851_s15 = scalar_lea.vmem %s7320_s2, %s4517_s19 }
  0x29   : > { %v5763_v0 = vld [vmem:[%s5760_s18] sm:$0xff]  ;;  %v5766_v1 = vld [vmem:[%s5760_s18 + $0x10] sm:$0xff]  ;;  %v5771_v3 = vld [vmem:[%s5760_s18 + $0x8] sm:$0xff]  ;;  %s5898_s20 = scalar_lea.vmem %s7322_s4, %s5248_s17  ;;  %s6039_s29 = scalar_lea.vmem %s7321_s3, %s5248_s17 }
  0x2a   : > { %v616_v2 = vsel %vm615_vm0, %v5763_v0, 0.0  ;;  %v5774_v4 = vld [vmem:[%s5760_s18 + $0x18] sm:$0xff]  ;;  %v622_v5 = vsel %vm615_vm0, %v5766_v1, 0.0  ;;  %v619_v6 = vsel %vm615_vm0, %v5771_v3, 0.0  ;;  %v5783_v8 = vld [vmem:[%s5760_s18 + $0x20] sm:$0xff]  ;;  %v5786_v9 = vld [vmem:[%s5760_s18 + $0x28] sm:$0xff]  ;;  %v607_v42 = vpack.c.bf16 %v5771_v3, %v5763_v0 }
  0x2b   : > { %617 = vadd.xlane.f32.xlu0 %v616_v2  ;;  %623 = vadd.xlane.f32.xlu1 %v622_v5  ;;  %v625_v7 = vsel %vm615_vm0, %v5774_v4, 0.0  ;;  %v628_v10 = vsel %vm615_vm0, %v5783_v8, 0.0  ;;  %v5799_v11 = vld [vmem:[%s5760_s18 + $0x30] sm:$0xff]  ;;  %v631_v12 = vsel %vm615_vm0, %v5786_v9, 0.0  ;;  %v5804_v13 = vld [vmem:[%s5760_s18 + $0x38] sm:$0xff]  ;;  %v5811_v16 = vld [vmem:[%s5760_s18 + $0x40] sm:$0xff]  ;;  %v608_v43 = vpack.c.bf16 %v5774_v4, %v5766_v1 }
  0x2c   : > { %v634_v14 = vsel %vm615_vm0, %v5799_v11, 0.0  ;;  %v637_v15 = vsel %vm615_vm0, %v5804_v13, 0.0  ;;  %v5814_v17 = vld [vmem:[%s5760_s18 + $0x48] sm:$0xff]  ;;  %v640_v18 = vsel %vm615_vm0, %v5811_v16, 0.0  ;;  %v5821_v20 = vld [vmem:[%s5760_s18 + $0x50] sm:$0xff]  ;;  %v5824_v21 = vld [vmem:[%s5760_s18 + $0x58] sm:$0xff]  ;;  %v609_v44 = vpack.c.bf16 %v5786_v9, %v5783_v8 }
  0x2d   : > { %v643_v19 = vsel %vm615_vm0, %v5814_v17, 0.0  ;;  %v646_v22 = vsel %vm615_vm0, %v5821_v20, 0.0  ;;  %v649_v23 = vsel %vm615_vm0, %v5824_v21, 0.0  ;;  %v5831_v24 = vld [vmem:[%s5760_s18 + $0x60] sm:$0xff]  ;;  %v5834_v25 = vld [vmem:[%s5760_s18 + $0x68] sm:$0xff]  ;;  %v5841_v28 = vld [vmem:[%s5760_s18 + $0x70] sm:$0xff] }
  0x2e   : > { %v652_v26 = vsel %vm615_vm0, %v5831_v24, 0.0  ;;  %v655_v27 = vsel %vm615_vm0, %v5834_v25, 0.0  ;;  %v5844_v29 = vld [vmem:[%s5760_s18 + $0x78] sm:$0xff]  ;;  %v658_v30 = vsel %vm615_vm0, %v5841_v28, 0.0  ;;  %v5858_v32 = vld [vmem:[%s5851_s15] sm:$0xff]  ;;  %v5861_v33 = vld [vmem:[%s5851_s15 + $0x8] sm:$0xff]  ;;  %v613_v41 = vpack.c.bf16 %v5834_v25, %v5831_v24 }
  0x2f   : > { %620 = vadd.xlane.f32.xlu0 %v619_v6  ;;  %626 = vadd.xlane.f32.xlu1 %v625_v7  ;;  %v661_v31 = vsel %vm615_vm0, %v5844_v29, 0.0  ;;  %v1283_v34 = vsel %vm615_vm0, %v5858_v32, 0.0  ;;  %v1286_v35 = vsel %vm615_vm0, %v5861_v33, 0.0  ;;  %v5868_v36 = vld [vmem:[%s5851_s15 + $0x10] sm:$0xff]  ;;  %v5871_v37 = vld [vmem:[%s5851_s15 + $0x18] sm:$0xff]  ;;  %v614_v40 = vpack.c.bf16 %v5844_v29, %v5841_v28  ;;  %s4518_s18 = sshll.u32 %s5754_s14, 4 }
  0x30   : > { %v1289_v38 = vsel %vm615_vm0, %v5868_v36, 0.0  ;;  %v1292_v39 = vsel %vm615_vm0, %v5871_v37, 0.0  ;;  %v5300_v45 = vld [vmem:[%s5898_s20 + $0x10] sm:$0xff]   ;;  %s6057_s28 = scalar_lea.vmem %s7324_s6, %s4518_s18  ;;  %s7379_s1 = smov 96  }
  0x31   : > { %4742 = vmatprep.subr.bf16.mxu0 %v5300_v45  ;;  %5246 = vmatprep.subr.bf16.mxu1 %v5300_v45  ;;  %s4416_s17 = sshll.u32 %s5754_s14, 3  ;;  %s534_s19 = sld [smem:[#allocation3 + %s5725_s25]] }
  0x32   : > { %4743 = vmatpush3.bf16.msra.mxu0 %v5300_v45  ;;  %5247 = vmatpush3.bf16.msra.mxu1 %v5300_v45 }
  0x33   : > { %629 = vadd.xlane.f32.xlu0 %v628_v10  ;;  %632 = vadd.xlane.f32.xlu1 %v631_v12 }
  0x37   : > { %635 = vadd.xlane.f32.xlu0 %v634_v14  ;;  %638 = vadd.xlane.f32.xlu1 %v637_v15 }
  0x3b   : > { %641 = vadd.xlane.f32.xlu0 %v640_v18  ;;  %644 = vadd.xlane.f32.xlu1 %v643_v19 }
  0x3f   : > { %647 = vadd.xlane.f32.xlu0 %v646_v22  ;;  %650 = vadd.xlane.f32.xlu1 %v649_v23 }
  0x43   : > { %653 = vadd.xlane.f32.xlu0 %v652_v26  ;;  %656 = vadd.xlane.f32.xlu1 %v655_v27 }
  0x47   : > { %659 = vadd.xlane.f32.xlu0 %v658_v30  ;;  %662 = vadd.xlane.f32.xlu1 %v661_v31 }
  0x4b   : > { %1284 = vadd.xlane.f32.xlu0 %v1283_v34  ;;  %1287 = vadd.xlane.f32.xlu1 %v1286_v35 }
  0x4f   : > { %1290 = vadd.xlane.f32.xlu0 %v1289_v38  ;;  %1293 = vadd.xlane.f32.xlu1 %v1292_v39 }
  0x60   : > { %895 = vrot.lane.b32.xlu1 %v614_v40, %s7330_s16 }
  0x64   : > { %881 = vrot.lane.b32.xlu1 %v607_v42, %s7330_s16 }
  0x65   : > { %893 = vrot.lane.b32.xlu0 %v613_v41, %s7330_s16 }
  0x68   : > { %885 = vrot.lane.b32.xlu1 %v609_v44, %s7330_s16 }
  0x69   : > { %883 = vrot.lane.b32.xlu0 %v608_v43, %s7330_s16 }
  0xb4   : > { %v618_v46 = vpop.xlane.xlu0 %617  ;;  %v624_v48 = vpop.xlane.xlu1 %623 }
  0xb5   : > { %v665_v47 = vmul.f32 0.03125, %v618_v46  ;;  %v667_v49 = vmul.f32 0.03125, %v624_v48 }
  0xb7   : > { %v5902_v50 = vsub.f32 %v5763_v0, %v665_v47  ;;  %v5905_v51 = vsub.f32 %v5766_v1, %v667_v49 }
  0xb8   : > { %v621_v52 = vpop.xlane.xlu0 %620  ;;  %v627_v54 = vpop.xlane.xlu1 %626 }
  0xb9   : > { %v666_v53 = vmul.f32 0.03125, %v621_v52  ;;  %v697_v55 = vmul.f32 %v5902_v50, %v5902_v50  ;;  %v668_v56 = vmul.f32 0.03125, %v627_v54  ;;  %v699_v57 = vmul.f32 %v5905_v51, %v5905_v51 }
  0xbb   : > { %v5912_v58 = vsub.f32 %v5771_v3, %v666_v53  ;;  %v713_v59 = vsel %vm615_vm0, %v697_v55, 0.0  ;;  %v5916_v60 = vsub.f32 %v5774_v4, %v668_v56  ;;  %v719_v0 = vsel %vm615_vm0, %v699_v57, 0.0 }
  0xbc   : > { %714 = vadd.xlane.f32.xlu0 %v713_v59  ;;  %v630_v61 = vpop.xlane.xlu0 %629  ;;  %v633_v63 = vpop.xlane.xlu1 %632 }
  0xbd   : > { %v669_v62 = vmul.f32 0.03125, %v630_v61  ;;  %v698_v1 = vmul.f32 %v5912_v58, %v5912_v58  ;;  %v670_v2 = vmul.f32 0.03125, %v633_v63  ;;  %v700_v5 = vmul.f32 %v5916_v60, %v5916_v60 }
  0xbf   : > { %v5924_v3 = vsub.f32 %v5783_v8, %v669_v62  ;;  %v716_v6 = vsel %vm615_vm0, %v698_v1, 0.0  ;;  %v5928_v4 = vsub.f32 %v5786_v9, %v670_v2  ;;  %v722_v15 = vsel %vm615_vm0, %v700_v5, 0.0 }
  0xc0   : > { %720 = vadd.xlane.f32.xlu0 %v719_v0  ;;  %v636_v7 = vpop.xlane.xlu0 %635  ;;  %717 = vadd.xlane.f32.xlu1 %v716_v6  ;;  %v639_v12 = vpop.xlane.xlu1 %638 }
  0xc1   : > { %v671_v10 = vmul.f32 0.03125, %v636_v7  ;;  %v701_v14 = vmul.f32 %v5924_v3, %v5924_v3  ;;  %v672_v18 = vmul.f32 0.03125, %v639_v12  ;;  %v702_v8 = vmul.f32 %v5928_v4, %v5928_v4 }
  0xc3   : > { %v5936_v19 = vsub.f32 %v5799_v11, %v671_v10  ;;  %v725_v9 = vsel %vm615_vm0, %v701_v14, 0.0  ;;  %v5940_v22 = vsub.f32 %v5804_v13, %v672_v18  ;;  %v728_v31 = vsel %vm615_vm0, %v702_v8, 0.0 }
  0xc4   : > { %726 = vadd.xlane.f32.xlu0 %v725_v9  ;;  %v642_v23 = vpop.xlane.xlu0 %641  ;;  %723 = vadd.xlane.f32.xlu1 %v722_v15  ;;  %v645_v27 = vpop.xlane.xlu1 %644 }
  0xc5   : > { %v673_v26 = vmul.f32 0.03125, %v642_v23  ;;  %v703_v30 = vmul.f32 %v5936_v19, %v5936_v19  ;;  %v674_v34 = vmul.f32 0.03125, %v645_v27  ;;  %v704_v35 = vmul.f32 %v5940_v22, %v5940_v22 }
  0xc7   : > { %v5948_v38 = vsub.f32 %v5811_v16, %v673_v26  ;;  %v731_v39 = vsel %vm615_vm0, %v703_v30, 0.0  ;;  %v5952_v40 = vsub.f32 %v5814_v17, %v674_v34  ;;  %v734_v45 = vsel %vm615_vm0, %v704_v35, 0.0 }
  0xc8   : > { %732 = vadd.xlane.f32.xlu0 %v731_v39  ;;  %v648_v41 = vpop.xlane.xlu0 %647  ;;  %729 = vadd.xlane.f32.xlu1 %v728_v31  ;;  %v651_v43 = vpop.xlane.xlu1 %650 }
  0xc9   : > { %v675_v42 = vmul.f32 0.03125, %v648_v41  ;;  %v705_v44 = vmul.f32 %v5948_v38, %v5948_v38  ;;  %v676_v46 = vmul.f32 0.03125, %v651_v43  ;;  %v706_v47 = vmul.f32 %v5952_v40, %v5952_v40 }
  0xcb   : > { %v5960_v48 = vsub.f32 %v5821_v20, %v675_v42  ;;  %v737_v49 = vsel %vm615_vm0, %v705_v44, 0.0  ;;  %v5964_v52 = vsub.f32 %v5824_v21, %v676_v46  ;;  %v740_v57 = vsel %vm615_vm0, %v706_v47, 0.0  ;;  %v5301_v47 = vld [vmem:[%s5898_s20 + $0x8] sm:$0xff]  }
  0xcc   : > { %738 = vadd.xlane.f32.xlu0 %v737_v49  ;;  %v654_v53 = vpop.xlane.xlu0 %653  ;;  %735 = vadd.xlane.f32.xlu1 %v734_v45  ;;  %v657_v55 = vpop.xlane.xlu1 %656 }
  0xcd   : > { %v677_v54 = vmul.f32 0.03125, %v654_v53  ;;  %v707_v56 = vmul.f32 %v5960_v48, %v5960_v48  ;;  %v678_v59 = vmul.f32 0.03125, %v657_v55  ;;  %v708_v61 = vmul.f32 %v5964_v52, %v5964_v52  ;;  %4760 = vmatprep.subr.bf16.mxu1 %v5301_v47 }
  0xcf   : > { %v5972_v62 = vsub.f32 %v5831_v24, %v677_v54  ;;  %v743_v63 = vsel %vm615_vm0, %v707_v56, 0.0  ;;  %v5976_v0 = vsub.f32 %v5834_v25, %v678_v59  ;;  %v746_v7 = vsel %vm615_vm0, %v708_v61, 0.0  ;;  %v5302_v56 = vld [vmem:[%s5898_s20] sm:$0xff]  }
  0xd0   : > { %744 = vadd.xlane.f32.xlu0 %v743_v63  ;;  %v660_v1 = vpop.xlane.xlu0 %659  ;;  %741 = vadd.xlane.f32.xlu1 %v740_v57  ;;  %v663_v5 = vpop.xlane.xlu1 %662  ;;  %v610_v61 = vpack.c.bf16 %v5804_v13, %v5799_v11  ;;  %v606_v63 = vpack.c.bf16 %v5871_v37, %v5868_v36  ;;  %v6042_v11 = vld [vmem:[%s6039_s29 + $0x10] sm:$0xff]  }
  0xd1   : > { %v679_v2 = vmul.f32 0.03125, %v660_v1  ;;  %v709_v6 = vmul.f32 %v5972_v62, %v5972_v62  ;;  %v680_v10 = vmul.f32 0.03125, %v663_v5  ;;  %v710_v24 = vmul.f32 %v5976_v0, %v5976_v0 }
  0xd2   : > { %v612_v1 = vpack.c.bf16 %v5824_v21, %v5821_v20  ;;  %v605_v21 = vpack.c.bf16 %v5861_v33, %v5858_v32 }
  0xd3   : > { %v5984_v12 = vsub.f32 %v5841_v28, %v679_v2  ;;  %v749_v25 = vsel %vm615_vm0, %v709_v6, 0.0  ;;  %v5988_v14 = vsub.f32 %v5844_v29, %v680_v10  ;;  %v752_v9 = vsel %vm615_vm0, %v710_v24, 0.0 }
  0xd4   : > { %750 = vadd.xlane.f32.xlu0 %v749_v25  ;;  %747 = vadd.xlane.f32.xlu1 %v746_v7  ;;  %v1285_v15 = vpop.xlane.xlu0 %1284  ;;  %v1288_v23 = vpop.xlane.xlu1 %1287  ;;  %v611_v6 = vpack.c.bf16 %v5814_v17, %v5811_v16 }
  0xd5   : > { %v711_v18 = vmul.f32 %v5984_v12, %v5984_v12  ;;  %v1295_v8 = vmul.f32 0.03125, %v1285_v15  ;;  %v712_v26 = vmul.f32 %v5988_v14, %v5988_v14  ;;  %v1296_v2 = vmul.f32 0.03125, %v1288_v23 }
  0xd7   : > { %v755_v28 = vsel %vm615_vm0, %v711_v18, 0.0  ;;  %v5997_v27 = vsub.f32 %v5858_v32, %v1295_v8  ;;  %v758_v31 = vsel %vm615_vm0, %v712_v26, 0.0  ;;  %v6032_v5 = vsub.f32 %v5861_v33, %v1296_v2 }
  0xd8   : > { %756 = vadd.xlane.f32.xlu0 %v755_v28  ;;  %753 = vadd.xlane.f32.xlu1 %v752_v9  ;;  %v1291_v29 = vpop.xlane.xlu0 %1290  ;;  %v1294_v34 = vpop.xlane.xlu1 %1293  ;;  %v586_v9 = vlaneseq }
  0xd9   : > { %v1297_v30 = vmul.f32 0.03125, %v1291_v29  ;;  %v1303_v35 = vmul.f32 %v5997_v27, %v5997_v27  ;;  %v1298_v39 = vmul.f32 0.03125, %v1294_v34  ;;  %v1304_v13 = vmul.f32 %v6032_v5, %v6032_v5 }
  0xdb   : > { %v6003_v41 = vsub.f32 %v5868_v36, %v1297_v30  ;;  %v6006_v43 = vsub.f32 %v5871_v37, %v1298_v39  ;;  %v1307_v44 = vsel %vm615_vm0, %v1303_v35, 0.0  ;;  %v1310_v20 = vsel %vm615_vm0, %v1304_v13, 0.0 }
  0xdc   : > { %759 = vadd.xlane.f32.xlu1 %v758_v31  ;;  %v894_v42 = vpop.permute.xlu0 %893  ;;  %v896_v46 = vpop.permute.xlu1 %895  ;;  %v6065_v30 = vshrl.u32 %v586_v9, 7 }
  0xdd   : > { %v1305_v45 = vmul.f32 %v6003_v41, %v6003_v41  ;;  %4756 = vmatprep.mubr.msk.bf16.mxu1 %vm903_vm1, %v894_v42  ;;  %v1306_v54 = vmul.f32 %v6006_v43, %v6006_v43 }
  0xde   : > { %4757 = vmatmul.mubr.msk.bf16.vlgmr.msra.gmra.mxu1 %vm903_vm1, %v896_v46 }
  0xdf   : > { %v1313_v53 = vsel %vm615_vm0, %v1305_v45, 0.0  ;;  %4761 = vmatpush3.bf16.msra.mxu1 %v5301_v47  ;;  %v1316_v57 = vsel %vm615_vm0, %v1306_v54, 0.0  ;;  %v827_v45 = vsub.s32 0, %v6065_v30 }
  0xe0   : > { %1308 = vadd.xlane.f32.xlu1 %v1307_v44  ;;  %v884_v49 = vpop.permute.xlu0 %883  ;;  %v882_v55 = vpop.permute.xlu1 %881  ;;  %4762 = vmatprep.subr.bf16.mxu1 %v5302_v56 }
  0xe1   : > { %4744 = vmatprep.mubr.msk.bf16.mxu0 %vm903_vm1, %v882_v55 }
  0xe2   : > { %4745 = vmatmul.mubr.msk.bf16.vlgmr.msra.gmra.mxu0 %vm903_vm1, %v884_v49 }
  0xe3   : > { %4763 = vmatpush3.bf16.msra.mxu1 %v5302_v56 }
  0xe4   : > { %1314 = vadd.xlane.f32.xlu1 %v1313_v53  ;;  %v886_v59 = vpop.permute.xlu1 %885  ;;  %4800 = vmatprep.subr.bf16.mxu1 %v6042_v11 }
  0xe5   : > { %4748 = vmatprep.mubr.msk.bf16.mxu0 %vm903_vm1, %v886_v59 }
  0xe8   : > { %1317 = vadd.xlane.f32.xlu1 %v1316_v57 }
  0xee   : > { %887 = vrot.lane.b32.xlu0 %v610_v61, %s7330_s16  ;;  %v847_v61 = vsub.s32 1, %v6065_v30 }
  0xf9   : > { %1357 = vrot.lane.b32.xlu1 %v606_v63, %s7330_s16 }
  0xfd   : > { %891 = vrot.lane.b32.xlu1 %v612_v1, %s7330_s16  ;;  %s511_s16 = scalar_lea.vmem %s7323_s5, %s4518_s18  ;;  %s6175_s18 = scalar_lea.vmem %s7326_s8, %s4416_s17 }
  0xfe   : > { %v5304_v36 = vld [vmem:[%s511_s16 + $0x8] sm:$0xff]   ;;  %v5305_v37 = vld [vmem:[%s511_s16] sm:$0xff]   ;;  %s4417_s16 = sshll.u32 %s5754_s14, 1  ;;  %s5634_s17 = smov 112  }
  0xff   : > { %4780 = vmatprep.subr.bf16.mxu0 %v5304_v36  ;;  %s529_s20 = scalar_lea.vmem %s7327_s9, %s4417_s16  ;;  %s5636_s16 = smov 104  }
 0x100   : > { %4781 = vmatpush3.bf16.msra.mxu0 %v5304_v36  ;;  %v556_v49 = vld [vmem:[%s529_s20] sm:$0x3]  ;;  %s5633_s20 = smov 120  }
 0x101   : > { %4782 = vmatprep.subr.bf16.mxu0 %v5305_v37  ;;  %v6073_v59 = vrot.slane %v556_v49, %v827_v45 }
 0x104   : > { %4783 = vmatpush3.bf16.msra.mxu0 %v5305_v37 }
 0x10d   : > { %1311 = vadd.xlane.f32.xlu0 %v1310_v20 }
 0x123   : > { %1355 = vrot.lane.b32.xlu0 %v605_v21, %s7379_s1 }
 0x127   : > { %889 = vrot.lane.b32.xlu0 %v611_v6, %s7379_s1 }
 0x145   : > { %v715_v7 = vpop.xlane.xlu0 %714 }
 0x146   : > { %v761_v32 = vmul.f32 0.03125, %v715_v7 }
 0x148   : > { %v777_v33 = vadd.f32 1e-05, %v761_v32  ;;  %v6080_v32 = vrot.slane %v556_v49, %v847_v61 }
 0x149   : > { %v721_v10 = vpop.xlane.xlu0 %720  ;;  %v718_v24 = vpop.xlane.xlu1 %717 }
 0x14a   : > { %5314 = vrsqrt.f32 %v777_v33  ;;  %v763_v25 = vmul.f32 0.03125, %v721_v10  ;;  %v762_v15 = vmul.f32 0.03125, %v718_v24 }
 0x14c   : > { %v779_v18 = vadd.f32 1e-05, %v763_v25  ;;  %v778_v8 = vadd.f32 1e-05, %v762_v15 }
 0x14d   : > { %v727_v23 = vpop.xlane.xlu0 %726  ;;  %v724_v26 = vpop.xlane.xlu1 %723 }
 0x14e   : > { %5316 = vrsqrt.f32 %v779_v18  ;;  %v765_v16 = vmul.f32 0.03125, %v727_v23  ;;  %v764_v17 = vmul.f32 0.03125, %v724_v26 }
 0x14f   : > { %5318 = vrsqrt.f32 %v778_v8 }
 0x150   : > { %v781_v28 = vadd.f32 1e-05, %v765_v16  ;;  %v780_v29 = vadd.f32 1e-05, %v764_v17 }
 0x151   : > { %v733_v31 = vpop.xlane.xlu0 %732  ;;  %v730_v34 = vpop.xlane.xlu1 %729 }
 0x152   : > { %5320 = vrsqrt.f32 %v781_v28  ;;  %v767_v35 = vmul.f32 0.03125, %v733_v31  ;;  %v766_v39 = vmul.f32 0.03125, %v730_v34 }
 0x153   : > { %5322 = vrsqrt.f32 %v780_v29 }
 0x154   : > { %v783_v42 = vadd.f32 1e-05, %v767_v35  ;;  %v782_v44 = vadd.f32 1e-05, %v766_v39 }
 0x155   : > { %v739_v46 = vpop.xlane.xlu0 %738  ;;  %v736_v47 = vpop.xlane.xlu1 %735 }
 0x156   : > { %5324 = vrsqrt.f32 %v783_v42  ;;  %v769_v53 = vmul.f32 0.03125, %v739_v46  ;;  %v768_v54 = vmul.f32 0.03125, %v736_v47 }
 0x157   : > { %v5315_v55 = vpop.eup %5314  ;;  %5326 = vrsqrt.f32 %v782_v44 }
 0x158   : > { %v785_v56 = vadd.f32 1e-05, %v769_v53  ;;  %v784_v57 = vadd.f32 1e-05, %v768_v54  ;;  %v809_v2 = vmul.f32 %v5315_v55, %v5902_v50 }
 0x159   : > { %v745_v63 = vpop.xlane.xlu0 %744  ;;  %v742_v1 = vpop.xlane.xlu1 %741 }
 0x15a   : > { %5328 = vrsqrt.f32 %v785_v56  ;;  %v771_v13 = vmul.f32 0.03125, %v745_v63  ;;  %v770_v20 = vmul.f32 0.03125, %v742_v1  ;;  %v829_v50 = vmul.f32 %v6073_v59, %v809_v2 }
 0x15b   : > { %v5317_v21 = vpop.eup %5316  ;;  %5330 = vrsqrt.f32 %v784_v57 }
 0x15c   : > { %v5319_v36 = vpop.eup %5318  ;;  %v811_v37 = vmul.f32 %v5317_v21, %v5905_v51  ;;  %v787_v6 = vadd.f32 1e-05, %v771_v13  ;;  %v786_v7 = vadd.f32 1e-05, %v770_v20  ;;  %v6105_v21 = vld [vmem:[%s6039_s29 + $0x8] sm:$0xff]  }
 0x15d   : > { %v751_v33 = vpop.xlane.xlu0 %750  ;;  %v748_v10 = vpop.xlane.xlu1 %747  ;;  %v810_v24 = vmul.f32 %v5319_v36, %v5912_v58  ;;  %v849_v58 = vadd.f32 %v6080_v32, %v829_v50 }
 0x15e   : > { %5332 = vrsqrt.f32 %v787_v6  ;;  %v773_v25 = vmul.f32 0.03125, %v751_v33  ;;  %v772_v15 = vmul.f32 0.03125, %v748_v10  ;;  %v831_v16 = vmul.f32 %v6073_v59, %v811_v37 }
 0x15f   : > { %v5321_v18 = vpop.eup %5320  ;;  %5334 = vrsqrt.f32 %v786_v7  ;;  %v830_v8 = vmul.f32 %v6073_v59, %v810_v24 }
 0x160   : > { %v5323_v51 = vpop.eup %5322  ;;  %v789_v23 = vadd.f32 1e-05, %v773_v25  ;;  %v788_v26 = vadd.f32 1e-05, %v772_v15  ;;  %v813_v34 = vmul.f32 %v5321_v18, %v5924_v3  ;;  %v851_v53 = vadd.f32 %v6080_v32, %v831_v16 }
 0x161   : > { %v812_v17 = vmul.f32 %v5323_v51, %v5916_v60  ;;  %v757_v28 = vpop.xlane.xlu0 %756  ;;  %v754_v29 = vpop.xlane.xlu1 %753  ;;  %v850_v31 = vadd.f32 %v6080_v32, %v830_v8 }
 0x162   : > { %5336 = vrsqrt.f32 %v789_v23  ;;  %v775_v35 = vmul.f32 0.03125, %v757_v28  ;;  %v774_v39 = vmul.f32 0.03125, %v754_v29  ;;  %v833_v57 = vmul.f32 %v6073_v59, %v813_v34 }
 0x163   : > { %v5325_v42 = vpop.eup %5324  ;;  %5338 = vrsqrt.f32 %v788_v26  ;;  %v6090_v44 = vpack.c.bf16 %v850_v31, %v849_v58  ;;  %v832_v46 = vmul.f32 %v6073_v59, %v812_v17 }
 0x164   : > { %v5327_v47 = vpop.eup %5326  ;;  %v791_v49 = vadd.f32 1e-05, %v775_v35  ;;  %v790_v60 = vadd.f32 1e-05, %v774_v39  ;;  %v815_v63 = vmul.f32 %v5325_v42, %v5936_v19  ;;  %v853_v19 = vadd.f32 %v6080_v32, %v833_v57 }
 0x165   : > { %4764 = vmatprep.mubr.msk.bf16.mxu1 %vm615_vm0, %v6090_v44  ;;  %v888_v54 = vpop.permute.xlu0 %887  ;;  %v760_v3 = vpop.xlane.xlu1 %759  ;;  %v852_v55 = vadd.f32 %v6080_v32, %v832_v46  ;;  %v814_v56 = vmul.f32 %v5327_v47, %v5928_v4 }
 0x166   : > { %5340 = vrsqrt.f32 %v791_v49  ;;  %v776_v1 = vmul.f32 0.03125, %v760_v3  ;;  %4749 = vmatmul.mubr.msk.bf16.gmra.mxu0 %vm903_vm1, %v888_v54  ;;  %v835_v33 = vmul.f32 %v6073_v59, %v815_v63 }
 0x167   : > { %v5329_v2 = vpop.eup %5328  ;;  %5342 = vrsqrt.f32 %v790_v60  ;;  %v6101_v13 = vpack.c.bf16 %v852_v55, %v851_v53  ;;  %v834_v20 = vmul.f32 %v6073_v59, %v814_v56 }
 0x168   : > { %v5331_v36 = vpop.eup %5330  ;;  %v792_v37 = vadd.f32 1e-05, %v776_v1  ;;  %v817_v4 = vmul.f32 %v5329_v2, %v5948_v38 }
 0x169   : > { %4765 = vmatmul.mubr.msk.bf16.vlgmr.msra.gmra.mxu1 %vm615_vm0, %v6101_v13  ;;  %v854_v6 = vadd.f32 %v6080_v32, %v834_v20  ;;  %v816_v7 = vmul.f32 %v5331_v36, %v5940_v22  ;;  %v855_v22 = vadd.f32 %v6080_v32, %v835_v33  ;;  %v1309_v57 = vpop.xlane.xlu1 %1308 }
 0x16a   : > { %5344 = vrsqrt.f32 %v792_v37  ;;  %4801 = vmatpush3.bf16.msra.mxu1 %v6042_v11  ;;  %v837_v25 = vmul.f32 %v6073_v59, %v817_v4 }
 0x16b   : > { %v5333_v10 = vpop.eup %5332  ;;  %v6115_v24 = vpack.c.bf16 %v854_v6, %v853_v19  ;;  %v836_v50 = vmul.f32 %v6073_v59, %v816_v7  ;;  %4806 = vmatprep.subr.bf16.mxu1 %v6105_v21 }
 0x16c   : > { %v5335_v38 = vpop.eup %5334  ;;  %v819_v11 = vmul.f32 %v5333_v10, %v5960_v48  ;;  %v857_v16 = vadd.f32 %v6080_v32, %v837_v25  ;;  %v5307_v10 = vld [vmem:[%s6039_s29] sm:$0xff]  }
 0x16d   : > { %4768 = vmatprep.mubr.msk.bf16.mxu1 %vm615_vm0, %v6115_v24  ;;  %v856_v15 = vadd.f32 %v6080_v32, %v836_v50  ;;  %v818_v18 = vmul.f32 %v5335_v38, %v5952_v40  ;;  %v1315_v63 = vpop.xlane.xlu1 %1314 }
 0x16e   : > { %v839_v29 = vmul.f32 %v6073_v59, %v819_v11  ;;  %v1321_v20 = vmul.f32 0.03125, %v1315_v63 }
 0x16f   : > { %v5337_v8 = vpop.eup %5336  ;;  %v6126_v51 = vpack.c.bf16 %v856_v15, %v855_v22  ;;  %v838_v23 = vmul.f32 %v6073_v59, %v818_v18  ;;  %v6181_v15 = vld [vmem:[%s6175_s18] sm:$0x3f] }
 0x170   : > { %v5339_v26 = vpop.eup %5338  ;;  %v821_v40 = vmul.f32 %v5337_v8, %v5972_v62  ;;  %v859_v39 = vadd.f32 %v6080_v32, %v839_v29  ;;  %v1325_v4 = vadd.f32 1e-05, %v1321_v20  ;;  %v6188_v8 = vrot.slane %v6181_v15, %v827_v45 }
 0x171   : > { %4769 = vmatmul.mubr.msk.bf16.gmra.mxu1 %vm615_vm0, %v6126_v51  ;;  %v858_v17 = vadd.f32 %v6080_v32, %v838_v23  ;;  %v820_v28 = vmul.f32 %v5339_v26, %v5964_v52  ;;  %v1318_v1 = vpop.xlane.xlu1 %1317  ;;  %v6201_v45 = vrot.slane %v6181_v15, %v847_v61  ;;  %v7338_v61 = vmov 0.0  }
 0x172   : > { %v841_v46 = vmul.f32 %v6073_v59, %v821_v40  ;;  %v1322_v2 = vmul.f32 0.03125, %v1318_v1  ;;  %4814 = vmatprep.subr.bf16.mxu0 %v7338_v61 }
 0x173   : > { %v5341_v48 = vpop.eup %5340  ;;  %v6136_v58 = vpack.c.bf16 %v858_v17, %v857_v16  ;;  %v840_v31 = vmul.f32 %v6073_v59, %v820_v28 }
 0x174   : > { %v5343_v34 = vpop.eup %5342  ;;  %v823_v35 = vmul.f32 %v5341_v48, %v5984_v12  ;;  %v861_v53 = vadd.f32 %v6080_v32, %v841_v46  ;;  %v1326_v36 = vadd.f32 1e-05, %v1322_v2 }
 0x175   : > { %4772 = vmatprep.mubr.msk.bf16.mxu1 %vm615_vm0, %v6136_v58  ;;  %v860_v42 = vadd.f32 %v6080_v32, %v840_v31  ;;  %v822_v52 = vmul.f32 %v5343_v34, %v5976_v0  ;;  %v1358_v6 = vpop.permute.xlu1 %1357 }
 0x176   : > { %v843_v12 = vmul.f32 %v6073_v59, %v823_v35  ;;  %5346 = vrsqrt.f32 %v1326_v36 }
 0x177   : > { %v5345_v62 = vpop.eup %5344  ;;  %v6146_v47 = vpack.c.bf16 %v860_v42, %v859_v39  ;;  %v842_v49 = vmul.f32 %v6073_v59, %v822_v52 }
 0x178   : > { %v824_v60 = vmul.f32 %v5345_v62, %v5988_v14  ;;  %v863_v55 = vadd.f32 %v6080_v32, %v843_v12 }
 0x179   : > { %4773 = vmatmul.mubr.msk.bf16.gmra.mxu1 %vm615_vm0, %v6146_v47  ;;  %v862_v54 = vadd.f32 %v6080_v32, %v842_v49  ;;  %v892_v50 = vpop.permute.xlu1 %891 }
 0x17a   : > { %v844_v0 = vmul.f32 %v6073_v59, %v824_v60  ;;  %v1319_v59 = vmul.f32 0.03125, %v1309_v57 }
 0x17b   : > { %v6156_v3 = vpack.c.bf16 %v862_v54, %v861_v53 }
 0x17c   : > { %v864_v56 = vadd.f32 %v6080_v32, %v844_v0  ;;  %v1323_v37 = vadd.f32 1e-05, %v1319_v59 }
 0x17d   : > { %4776 = vmatprep.mubr.msk.bf16.mxu1 %vm615_vm0, %v6156_v3 }
 0x17e   : > { %v6162_v14 = vpack.c.bf16 %v864_v56, %v863_v55  ;;  %5348 = vrsqrt.f32 %v1323_v37 }
 0x17f   : > { %5350 = vrsqrt.f32 %v1325_v4 }
 0x181   : > { %4777 = vmatmul.mubr.msk.bf16.gmra.mxu1 %vm615_vm0, %v6162_v14 }
 0x183   : > { %v5347_v25 = vpop.eup %5346 }
 0x184   : > { %v1334_v18 = vmul.f32 %v5347_v25, %v6006_v43 }
 0x18b   : > { %v5349_v22 = vpop.eup %5348 }
 0x18c   : > { %v1331_v11 = vmul.f32 %v5349_v22, %v5997_v27 }
 0x18e   : > { %v1339_v27 = vmul.f32 %v6188_v8, %v1331_v11 }
 0x190   : > { %v1347_v17 = vadd.f32 %v6201_v45, %v1339_v27 }
 0x196   : > { %v1312_v32 = vpop.xlane.xlu0 %1311 }
 0x197   : > { %v1320_v19 = vmul.f32 0.03125, %v1312_v32 }
 0x199   : > { %v1324_v7 = vadd.f32 1e-05, %v1320_v19 }
 0x19a   : > { %v1356_v33 = vpop.permute.xlu0 %1355 }
 0x19b   : > { %5352 = vrsqrt.f32 %v1324_v7  ;;  %4802 = vmatprep.mubr.msk.bf16.mxu1 %vm903_vm1, %v1356_v33 }
 0x19c   : > { %4803 = vmatmul.mubr.msk.bf16.vlgmr.msra.gmra.mxu1 %vm903_vm1, %v1358_v6 }
 0x19d   : > { %4807 = vmatpush3.bf16.msra.mxu1 %v6105_v21  ;;  %v5351_v21 = vpop.eup %5350 }
 0x19e   : > { %v890_v38 = vpop.permute.xlu0 %889  ;;  %4808 = vmatprep.subr.bf16.mxu1 %v5307_v10  ;;  %v1333_v23 = vmul.f32 %v5351_v21, %v6003_v41 }
 0x19f   : > { %4752 = vmatprep.mubr.msk.bf16.mxu0 %vm903_vm1, %v890_v38 }
 0x1a0   : > { %4753 = vmatmul.mubr.msk.bf16.gmra.mxu0 %vm903_vm1, %v892_v50  ;;  %v1341_v41 = vmul.f32 %v6188_v8, %v1333_v23 }
 0x1a1   : > { %4784 = vmatprep.mubr.msk.bf16.mxu0 %vm615_vm0, %v6090_v44  ;;  %4809 = vmatpush3.bf16.msra.mxu1 %v5307_v10  ;;  %v1342_v44 = vmul.f32 %v6188_v8, %v1334_v18 }
 0x1a2   : > { %4826 = vmatprep.subr.bf16.mxu1 %v7338_v61  ;;  %v4746_v40 = vpop.f32.mrf.mxu0 }
 0x1a8   : > { %v5353_v26 = vpop.eup %5352  ;;  %4785 = vmatmul.mubr.msk.bf16.vlgmr.msra.gmra.mxu0 %vm615_vm0, %v6101_v13  ;;  %v1350_v13 = vadd.f32 %v6201_v45, %v1342_v44 }
 0x1a9   : > { %4788 = vmatprep.mubr.msk.bf16.mxu0 %vm615_vm0, %v6115_v24  ;;  %v1332_v43 = vmul.f32 %v5353_v26, %v6032_v5  ;;  %v1349_v24 = vadd.f32 %v6201_v45, %v1341_v41 }
 0x1ab   : > { %v1340_v16 = vmul.f32 %v6188_v8, %v1332_v43  ;;  %v1352_v29 = vpack.c.bf16 %v1350_v13, %v1349_v24 }
 0x1ad   : > { %v1348_v28 = vadd.f32 %v6201_v45, %v1340_v16 }
 0x1af   : > { %v1351_v5 = vpack.c.bf16 %v1348_v28, %v1347_v17 }
 0x1b0   : > { %4789 = vmatmul.mubr.msk.bf16.gmra.mxu0 %vm615_vm0, %v6126_v51  ;;  %v4758_v51 = vpop.f32.mrf.mxu1 }
 0x1b1   : > { %4792 = vmatprep.mubr.msk.bf16.mxu0 %vm615_vm0, %v6136_v58  ;;  %4810 = vmatprep.mubr.msk.bf16.mxu1 %vm615_vm0, %v1351_v5  ;;  %v962_v58 = vpop.f32.mrf.mxu0 }
 0x1b2   : > { %4811 = vmatmul.mubr.msk.bf16.vlgmr.msra.gmra.mxu1 %vm615_vm0, %v1352_v29  ;;  %v1010_v48 = vpop.f32.mrf.mxu1 }
 0x1b3   : > { %4834 = vmatprep.mubr.msk.bf16.mxu1 %vm5631_vm2, %v7338_v61  ;;  %v4747_v34 = vpop.f32.mrf.mxu0 }
 0x1b4   : > { %v4759_v31 = vpop.f32.mrf.mxu1 }
 0x1b5   : > { %v965_v42 = vpop.f32.mrf.mxu0 }
 0x1b6   : > { %v1013_v35 = vpop.f32.mrf.mxu1 }
 0x1b8   : > { %4793 = vmatmul.mubr.msk.bf16.gmra.mxu0 %vm615_vm0, %v6146_v47 }
 0x1b9   : > { %4796 = vmatprep.mubr.msk.bf16.mxu0 %vm615_vm0, %v6156_v3 }
 0x1c0   : > { %4797 = vmatmul.mubr.msk.bf16.gmra.mxu0 %vm615_vm0, %v6162_v14 }
 0x1c1   : > { %4822 = vmatprep.mubr.msk.bf16.mxu0 %vm5631_vm2, %v7338_v61 }
 0x226   : > { %v4750_v46 = vpop.f32.mrf.mxu0 }
 0x228   : > { %v978_v49 = vpop.f32.mrf.mxu0 }
 0x229   : > { %v4766_v39 = vpop.f32.mrf.mxu1 }
 0x22a   : > { %v4751_v53 = vpop.f32.mrf.mxu0  ;;  %v1104_v7 = vadd.f32 %v4766_v39, %v4746_v40 }
 0x22b   : > { %v1095_v52 = vpop.f32.mrf.mxu1 }
 0x22c   : > { %v981_v57 = vpop.f32.mrf.mxu0  ;;  %v1096_v44 = vadd.f32 %v1095_v52, %v962_v58 }
 0x22d   : > { %v4767_v62 = vpop.f32.mrf.mxu1 }
 0x22e   : > { %v1107_v32 = vadd.f32 %v4767_v62, %v4747_v34 }
 0x22f   : > { %v1098_v47 = vpop.f32.mrf.mxu1 }
 0x230   : > { %v6243_v10 = vpack.c.bf16 %v1107_v32, %v1104_v7  ;;  %v1099_v11 = vadd.f32 %v1098_v47, %v965_v42 }
 0x231   : > { %v4770_v60 = vpop.f32.mrf.mxu1 }
 0x232   : > { %v1120_v0 = vadd.f32 %v4770_v60, %v4750_v46  ;;  %v6251_v26 = vsel %vm1489_vm3, %v6243_v10, 0  ;;  %v6255_v43 = vpack.c.bf16 %v1099_v11, %v1096_v44  ;;  %v601_v11 = vand.u32 127, %v586_v9 }
 0x233   : > { %v1111_v12 = vpop.f32.mrf.mxu1  ;;  %v602_v44 = vstv %s534_s19  ;;  %s5637_s19 = smov 32  }
 0x234   : > { %v1112_v59 = vadd.f32 %v1111_v12, %v978_v49  ;;  %v6259_v27 = vsel %vm1489_vm3, %v6255_v43, 0  ;;  %vm603_vm4 = vcmp.lt.s32.totalorder %v601_v11, %v602_v44 }
 0x235   : > { %v4771_v54 = vpop.f32.mrf.mxu1 }
 0x236   : > { %v1123_v3 = vadd.f32 %v4771_v54, %v4751_v53 }
 0x237   : > { %v1114_v55 = vpop.f32.mrf.mxu1 }
 0x238   : > { %v6227_v56 = vpack.c.bf16 %v1123_v3, %v1120_v0  ;;  %v1115_v63 = vadd.f32 %v1114_v55, %v981_v57 }
 0x239   : > { %v4774_v14 = vpop.f32.mrf.mxu1 }
 0x23a   : > { %v6231_v1 = vsel %vm1489_vm3, %v6227_v56, 0  ;;  %v6235_v36 = vpack.c.bf16 %v1115_v63, %v1112_v59 }
 0x23b   : > { %v1127_v2 = vpop.f32.mrf.mxu1  ;;  %4815 = vmatpush3.bf16.xpose.msra.mxu0 %v6231_v1 }
 0x23c   : > { %4816 = vmatprep.subr.bf16.mxu0 %v7338_v61  ;;  %v6239_v19 = vsel %vm1489_vm3, %v6235_v36, 0 }
 0x23d   : > { %v4775_v20 = vpop.f32.mrf.mxu1 }
 0x23f   : > { %v1130_v37 = vpop.f32.mrf.mxu1 }
 0x241   : > { %v4778_v4 = vpop.f32.mrf.mxu1 }
 0x242   : > { %v1152_v50 = vadd.f32 %v4778_v4, %v4758_v51 }
 0x243   : > { %v1143_v6 = vpop.f32.mrf.mxu1  ;;  %4817 = vmatpush3.bf16.xpose.msra.mxu0 %v6239_v19 }
 0x244   : > { %4818 = vmatprep.subr.bf16.mxu0 %v7338_v61  ;;  %v1144_v22 = vadd.f32 %v1143_v6, %v1010_v48 }
 0x245   : > { %v4779_v33 = vpop.f32.mrf.mxu1 }
 0x246   : > { %v1155_v38 = vadd.f32 %v4779_v33, %v4759_v31 }
 0x247   : > { %v1146_v25 = vpop.f32.mrf.mxu1 }
 0x248   : > { %v6245_v21 = vpack.c.bf16 %v1155_v38, %v1152_v50  ;;  %v1147_v18 = vadd.f32 %v1146_v25, %v1013_v35 }
 0x24a   : > { %v6247_v23 = vpack.c.bf16 %v1147_v18, %v1144_v22 }
 0x24b   : > { %4819 = vmatpush3.bf16.xpose.msra.mxu0 %v6251_v26 }
 0x24c   : > { %4820 = vmatprep.subr.bf16.mxu0 %v7338_v61 }
 0x253   : > { %4821 = vmatpush3.bf16.xpose.msra.mxu0 %v6259_v27 }
 0x254   : > { %4850 = vmatprep.subr.bf16.mxu0 %v7338_v61 }
 0x25c   : > { %v6263_v24 = vpop.f32.mrf.mxu1 }
 0x25e   : > { %v6267_v48 = vpop.f32.mrf.mxu1 }
 0x260   : > { %v4754_v41 = vpop.f32.mrf.mxu0  ;;  %v6271_v35 = vpop.f32.mrf.mxu1 }
 0x261   : > { %v1136_v16 = vadd.f32 %v4774_v14, %v4754_v41 }
 0x262   : > { %v994_v13 = vpop.f32.mrf.mxu0  ;;  %v6273_v52 = vpop.f32.mrf.mxu1 }
 0x263   : > { %v1128_v17 = vadd.f32 %v1127_v2, %v994_v13 }
 0x264   : > { %v4755_v28 = vpop.f32.mrf.mxu0 }
 0x265   : > { %v1139_v5 = vadd.f32 %v4775_v20, %v4755_v28 }
 0x266   : > { %v997_v29 = vpop.f32.mrf.mxu0 }
 0x267   : > { %v6265_v51 = vpack.c.bf16 %v1139_v5, %v1136_v16  ;;  %v1131_v40 = vadd.f32 %v1130_v37, %v997_v29  ;;  %v5632_v16 = vmov -1e+30  }
 0x268   : > { %v4786_v58 = vpop.f32.mrf.mxu0  ;;  %v6315_v13 = vsel %vm603_vm4, 0.0, %v5632_v16 }
 0x269   : > { %v6269_v31 = vpack.c.bf16 %v1131_v40, %v1128_v17 }
 0x26a   : > { %v1212_v34 = vpop.f32.mrf.mxu0 }
 0x26c   : > { %v4787_v39 = vpop.f32.mrf.mxu0 }
 0x26d   : > { %v6291_v32 = vpack.c.bf16 %v4787_v39, %v4786_v58 }
 0x26e   : > { %v1215_v42 = vpop.f32.mrf.mxu0 }
 0x26f   : > { %v6303_v38 = vpack.c.bf16 %v1215_v42, %v1212_v34 }
 0x270   : > { %v4790_v46 = vpop.f32.mrf.mxu0 }
 0x272   : > { %v1228_v62 = vpop.f32.mrf.mxu0  ;;  %v4812_v47 = vpop.f32.mrf.mxu1 }
 0x273   : > { %v1481_v0 = vadd.f32 %v4812_v47, %v6263_v24 }
 0x274   : > { %v4791_v49 = vpop.f32.mrf.mxu0  ;;  %v1472_v60 = vpop.f32.mrf.mxu1 }
 0x275   : > { %v6275_v12 = vpack.c.bf16 %v4791_v49, %v4790_v46  ;;  %v1473_v14 = vadd.f32 %v1472_v60, %v6267_v48 }
 0x276   : > { %v1231_v53 = vpop.f32.mrf.mxu0  ;;  %v4813_v54 = vpop.f32.mrf.mxu1 }
 0x277   : > { %v1484_v3 = vadd.f32 %v4813_v54, %v6271_v35  ;;  %4827 = vmatpush3.bf16.msra.mxu1 %v6275_v12  ;;  %v6282_v63 = vpack.c.bf16 %v1231_v53, %v1228_v62 }
 0x278   : > { %v4794_v55 = vpop.f32.mrf.mxu0  ;;  %v1475_v57 = vpop.f32.mrf.mxu1  ;;  %4828 = vmatprep.subr.bf16.mxu1 %v7338_v61 }
 0x279   : > { %v6284_v2 = vpack.c.bf16 %v1484_v3, %v1481_v0  ;;  %v1476_v59 = vadd.f32 %v1475_v57, %v6273_v52 }
 0x27a   : > { %v1244_v20 = vpop.f32.mrf.mxu0 }
 0x27b   : > { %v6287_v37 = vpack.c.bf16 %v1476_v59, %v1473_v14  ;;  %4829 = vmatpush3.bf16.msra.mxu1 %v6282_v63 }
 0x27c   : > { %v4795_v4 = vpop.f32.mrf.mxu0  ;;  %4830 = vmatprep.subr.bf16.mxu1 %v7338_v61 }
 0x27d   : > { %v6293_v6 = vpack.c.bf16 %v4795_v4, %v4794_v55  ;;  %4823 = vmatmul.mubr.msk.bf16.vlgmr.msra.gmra.mxu0 %vm1489_vm3, %v6287_v37 }
 0x27e   : > { %v1247_v7 = vpop.f32.mrf.mxu0  ;;  %4858 = vmatprep.mubr.msk.bf16.mxu0 %vm5631_vm2, %v7338_v61 }
 0x27f   : > { %7380 = vst [vmem:[#allocation8_spill] sm:$0xff] %v6293_v6  ;;  %v6299_v33 = vpack.c.bf16 %v1247_v7, %v1244_v20  ;;  %4831 = vmatpush3.bf16.msra.mxu1 %v6291_v32 }
 0x280   : > { %v4798_v50 = vpop.f32.mrf.mxu0  ;;  %4832 = vmatprep.subr.bf16.mxu1 %v7338_v61 }
 0x281   : > { %7381 = vst [vmem:[#allocation9_spill] sm:$0xff] %v6299_v33 }
 0x282   : > { %v6305_v25 = vpop.f32.mrf.mxu0 }
 0x283   : > { %4833 = vmatpush3.bf16.msra.mxu1 %v6303_v38 }
 0x284   : > { %v4799_v22 = vpop.f32.mrf.mxu0  ;;  %4838 = vmatprep.subr.bf16.mxu1 %v7338_v61 }
 0x285   : > { %v6309_v18 = vpack.c.bf16 %v4799_v22, %v4798_v50 }
 0x286   : > { %v6313_v41 = vpop.f32.mrf.mxu0 }
 0x287   : > { %7382 = vst [vmem:[#allocation10_spill] sm:$0xff] %v6309_v18 }
 0x33d   : > { %v1539_v17 = vpop.f32.mrf.mxu0 }
 0x33e   : > { %v1546_v28 = vmul.f32 0.35355338, %v1539_v17 }
 0x33f   : > { %v4824_v5 = vpop.f32.mrf.mxu0 }
 0x340   : > { %v1548_v29 = vadd.f32 %v1546_v28, %v6315_v13 }
 0x341   : > { %v1542_v40 = vpop.f32.mrf.mxu0 }
 0x342   : > { %v1547_v58 = vmul.f32 0.35355338, %v1542_v40  ;;  %v1551_v34 = vsel %vm1550_vm5, %v1548_v29, -inf }
 0x343   : > { %1552 = vmax.xlane.f32.xlu0 %v1551_v34  ;;  %v4825_v39 = vpop.f32.mrf.mxu0 }
 0x344   : > { %v1549_v9 = vadd.f32 %v1547_v58, %v6315_v13 }
 0x346   : > { %v1554_v42 = vsel %vm1550_vm5, %v1549_v9, -inf }
 0x347   : > { %1555 = vmax.xlane.f32.xlu1 %v1554_v42 }
 0x358   : > { %1631 = vrot.lane.b32.xlu1 %v6235_v36, %s5633_s20 }
 0x35c   : > { %1629 = vrot.lane.b32.xlu1 %v6243_v10, %s5633_s20 }
 0x360   : > { %1627 = vrot.lane.b32.xlu1 %v6255_v43, %s5633_s20 }
 0x3cc   : > { %v1553_v46 = vpop.xlane.xlu0 %1552 }
 0x3cd   : > { %v1557_v62 = vsub.f32 %v1548_v29, %v1553_v46 }
 0x3cf   : > { %v1559_v47 = vmul.f32 1.442695, %v1557_v62 }
 0x3d0   : > { %v1556_v49 = vpop.xlane.xlu1 %1555 }
 0x3d1   : > { %5354 = vpow2.f32 %v1559_v47  ;;  %v1558_v60 = vsub.f32 %v1549_v9, %v1556_v49 }
 0x3d3   : > { %v1561_v53 = vmul.f32 1.442695, %v1558_v60 }
 0x3d4   : > { %v1632_v44 = vpop.permute.xlu1 %1631 }
 0x3d5   : > { %5356 = vpow2.f32 %v1561_v53  ;;  %v6342_v16 = vsel %vm1489_vm3, %v1632_v44, 0 }
 0x3d8   : > { %v1630_v17 = vpop.permute.xlu1 %1629 }
 0x3d9   : > { %v6347_v28 = vsel %vm1489_vm3, %v1630_v17, 0 }
 0x3dc   : > { %v1628_v5 = vpop.permute.xlu1 %1627 }
 0x3dd   : > { %v6352_v29 = vsel %vm1489_vm3, %v1628_v5, 0 }
 0x3de   : > { %v5355_v54 = vpop.eup %5354 }
 0x3df   : > { %v1563_v0 = vsel %vm1550_vm5, %v5355_v54, 0.0 }
 0x3e0   : > { %1564 = vadd.xlane.f32.xlu0 %v1563_v0 }
 0x3e2   : > { %v5357_v3 = vpop.eup %5356 }
 0x3e3   : > { %v1566_v55 = vsel %vm1550_vm5, %v5357_v3, 0.0 }
 0x3e4   : > { %1567 = vadd.xlane.f32.xlu0 %v1566_v55 }
 0x3fa   : > { %1633 = vrot.lane.b32.xlu0 %v6227_v56, %s5633_s20 }
 0x3fe   : > { %1621 = vrot.lane.b32.xlu0 %v6287_v37, %s5633_s20 }
 0x469   : > { %v1565_v57 = vpop.xlane.xlu0 %1564 }
 0x46a   : > { %5358 = vrcp.f32 %v1565_v57 }
 0x46d   : > { %v1568_v14 = vpop.xlane.xlu0 %1567 }
 0x46e   : > { %5360 = vrcp.f32 %v1568_v14 }
 0x471   : > { %v1634_v50 = vpop.permute.xlu0 %1633 }
 0x472   : > { %v6334_v11 = vsel %vm1489_vm3, %v1634_v50, 0 }
 0x475   : > { %v1622_v40 = vpop.permute.xlu0 %1621 }
 0x477   : > { %v5359_v59 = vpop.eup %5358 }
 0x478   : > { %v1571_v4 = vmul.f32 %v5359_v59, %v5355_v54 }
 0x47b   : > { %v5361_v20 = vpop.eup %5360 }
 0x47c   : > { %v1572_v7 = vmul.f32 %v5361_v20, %v5357_v3 }
 0x47e   : > { %v1573_v22 = vpack.c.bf16 %v1572_v7, %v1571_v4 }
 0x480   : > { %4835 = vmatmul.mubr.msk.bf16.vlgmr.msra.gmra.mxu1 %vm1550_vm5, %v1573_v22 }
 0x481   : > { %4839 = vmatpush3.bf16.xpose.msra.mxu1 %v6334_v11  ;;  %4846 = vmatprep.mubr.msk.bf16.mxu1 %vm5631_vm2, %v7338_v61 }
 0x482   : > { %4840 = vmatprep.subr.bf16.mxu1 %v7338_v61 }
 0x489   : > { %4841 = vmatpush3.bf16.xpose.msra.mxu1 %v6342_v16 }
 0x48a   : > { %4842 = vmatprep.subr.bf16.mxu1 %v7338_v61 }
 0x491   : > { %4843 = vmatpush3.bf16.xpose.msra.mxu1 %v6347_v28 }
 0x492   : > { %4844 = vmatprep.subr.bf16.mxu1 %v7338_v61 }
 0x499   : > { %4845 = vmatpush3.bf16.xpose.msra.mxu1 %v6352_v29 }
 0x49a   : > { %4874 = vmatprep.subr.bf16.mxu1 %v7338_v61 }
 0x4a0   : > { %4847 = vmatmul.mubr.msk.bf16.vlgmr.msra.gmra.mxu1 %vm1489_vm3, %v1622_v40 }
 0x4a1   : > { %4882 = vmatprep.mubr.msk.bf16.mxu1 %vm5631_vm2, %v7338_v61 }
 0x540   : > { %v6359_v58 = vpop.f32.mrf.mxu1 }
 0x542   : > { %v4836_v34 = vpop.f32.mrf.mxu1 }
 0x544   : > { %v6361_v39 = vpop.f32.mrf.mxu1 }
 0x546   : > { %v4837_v9 = vpop.f32.mrf.mxu1 }
 0x560   : > { %v1684_v42 = vpop.f32.mrf.mxu1 }
 0x561   : > { %v1691_v46 = vmul.f32 0.35355338, %v1684_v42 }
 0x562   : > { %v4848_v62 = vpop.f32.mrf.mxu1 }
 0x563   : > { %v1693_v47 = vadd.f32 %v1691_v46, %v6315_v13 }
 0x564   : > { %v1687_v49 = vpop.f32.mrf.mxu1 }
 0x565   : > { %v1692_v60 = vmul.f32 0.35355338, %v1687_v49  ;;  %v1695_v53 = vsel %vm1550_vm5, %v1693_v47, -inf }
 0x566   : > { %1696 = vmax.xlane.f32.xlu1 %v1695_v53  ;;  %v4849_v54 = vpop.f32.mrf.mxu1 }
 0x567   : > { %v1694_v0 = vadd.f32 %v1692_v60, %v6315_v13 }
 0x569   : > { %v1698_v3 = vsel %vm1550_vm5, %v1694_v0, -inf }
 0x56a   : > { %1699 = vmax.xlane.f32.xlu0 %v1698_v3 }
 0x577   : > { %1728 = vrot.lane.b32.xlu1 %v6275_v12, %s7379_s1 }
 0x57b   : > { %1724 = vrot.lane.b32.xlu1 %v6291_v32, %s7379_s1 }
 0x57f   : > { %1722 = vrot.lane.b32.xlu1 %v6303_v38, %s7379_s1 }
 0x583   : > { %1788 = vrot.lane.b32.xlu1 %v6227_v56, %s5634_s17 }
 0x587   : > { %1784 = vrot.lane.b32.xlu1 %v6243_v10, %s5634_s17 }
 0x58b   : > { %1780 = vrot.lane.b32.xlu1 %v6287_v37, %s5634_s17 }
 0x5ef   : > { %v1697_v55 = vpop.xlane.xlu1 %1696 }
 0x5f0   : > { %v1701_v57 = vsub.f32 %v1693_v47, %v1697_v55 }
 0x5f2   : > { %v1703_v14 = vmul.f32 1.442695, %v1701_v57 }
 0x5f3   : > { %v6379_v59 = vpop.permute.xlu1 %1728  ;;  %v1700_v20 = vpop.xlane.xlu0 %1699 }
 0x5f4   : > { %5362 = vpow2.f32 %v1703_v14  ;;  %v1702_v4 = vsub.f32 %v1694_v0, %v1700_v20  ;;  %4851 = vmatpush3.bf16.msra.mxu0 %v6379_v59 }
 0x5f5   : > { %4852 = vmatprep.subr.bf16.mxu0 %v7338_v61 }
 0x5f6   : > { %v1705_v7 = vmul.f32 1.442695, %v1702_v4 }
 0x5f7   : > { %v6391_v34 = vpop.permute.xlu1 %1724 }
 0x5f8   : > { %5364 = vpow2.f32 %v1705_v7  ;;  %v588_v7 = vsub.s32 4, %v6065_v30 }
 0x5fb   : > { %v6398_v42 = vpop.permute.xlu1 %1722 }
 0x5ff   : > { %v1789_v60 = vpop.permute.xlu1 %1788 }
 0x600   : > { %v6404_v54 = vsel %vm1489_vm3, %v1789_v60, 0 }
 0x601   : > { %v5363_v50 = vpop.eup %5362 }
 0x602   : > { %v1707_v22 = vsel %vm1550_vm5, %v5363_v50, 0.0 }
 0x603   : > { %1708 = vadd.xlane.f32.xlu0 %v1707_v22  ;;  %v1785_v55 = vpop.permute.xlu1 %1784 }
 0x604   : > { %v6417_v57 = vsel %vm1489_vm3, %v1785_v55, 0 }
 0x605   : > { %v5365_v44 = vpop.eup %5364 }
 0x606   : > { %v1710_v17 = vsel %vm1550_vm5, %v5365_v44, 0.0 }
 0x607   : > { %1711 = vadd.xlane.f32.xlu0 %v1710_v17  ;;  %v1781_v4 = vpop.permute.xlu1 %1780 }
 0x61d   : > { %1726 = vrot.lane.b32.xlu0 %v6282_v63, %s7379_s1 }
 0x621   : > { %1786 = vrot.lane.b32.xlu0 %v6235_v36, %s5634_s17 }
 0x625   : > { %1782 = vrot.lane.b32.xlu0 %v6255_v43, %s5634_s17 }
 0x68c   : > { %v1709_v5 = vpop.xlane.xlu0 %1708 }
 0x68d   : > { %5366 = vrcp.f32 %v1709_v5 }
 0x690   : > { %v1712_v40 = vpop.xlane.xlu0 %1711 }
 0x691   : > { %5368 = vrcp.f32 %v1712_v40 }
 0x694   : > { %v6393_v9 = vpop.permute.xlu0 %1726 }
 0x695   : > { %4853 = vmatpush3.bf16.msra.mxu0 %v6393_v9 }
 0x696   : > { %4854 = vmatprep.subr.bf16.mxu0 %v7338_v61 }
 0x698   : > { %v1787_v0 = vpop.permute.xlu0 %1786 }
 0x699   : > { %4855 = vmatpush3.bf16.msra.mxu0 %v6391_v34  ;;  %v6412_v3 = vsel %vm1489_vm3, %v1787_v0, 0 }
 0x69a   : > { %4856 = vmatprep.subr.bf16.mxu0 %v7338_v61  ;;  %v5367_v46 = vpop.eup %5366 }
 0x69b   : > { %v1715_v47 = vmul.f32 %v5367_v46, %v5363_v50  ;;  %v6431_v50 = vrot.slane %v6181_v15, %v588_v7 }
 0x69c   : > { %v1783_v14 = vpop.permute.xlu0 %1782 }
 0x69d   : > { %4857 = vmatpush3.bf16.msra.mxu0 %v6398_v42  ;;  %v6422_v20 = vsel %vm1489_vm3, %v1783_v14, 0  ;;  %v1618_v22 = vadd.f32 %v6359_v58, %v6431_v50  ;;  %v1619_v40 = vadd.f32 %v6361_v39, %v6431_v50 }
 0x69e   : > { %v5369_v62 = vpop.eup %5368  ;;  %4862 = vmatprep.subr.bf16.mxu0 %v7338_v61 }
 0x69f   : > { %v1716_v49 = vmul.f32 %v5369_v62, %v5365_v44 }
 0x6a1   : > { %v1717_v53 = vpack.c.bf16 %v1716_v49, %v1715_v47 }
 0x6a3   : > { %4859 = vmatmul.mubr.msk.bf16.vlgmr.msra.gmra.mxu0 %vm1550_vm5, %v1717_v53 }
 0x6a4   : > { %4863 = vmatpush3.bf16.xpose.msra.mxu0 %v6404_v54  ;;  %4870 = vmatprep.mubr.msk.bf16.mxu0 %vm5631_vm2, %v7338_v61 }
 0x6a5   : > { %4864 = vmatprep.subr.bf16.mxu0 %v7338_v61 }
 0x6ac   : > { %4865 = vmatpush3.bf16.xpose.msra.mxu0 %v6412_v3 }
 0x6ad   : > { %4866 = vmatprep.subr.bf16.mxu0 %v7338_v61 }
 0x6b4   : > { %4867 = vmatpush3.bf16.xpose.msra.mxu0 %v6417_v57 }
 0x6b5   : > { %4868 = vmatprep.subr.bf16.mxu0 %v7338_v61 }
 0x6bc   : > { %4869 = vmatpush3.bf16.xpose.msra.mxu0 %v6422_v20 }
 0x6bd   : > { %4898 = vmatprep.subr.bf16.mxu0 %v7338_v61 }
 0x6c3   : > { %4871 = vmatmul.mubr.msk.bf16.vlgmr.msra.gmra.mxu0 %vm1489_vm3, %v1781_v4 }
 0x6c4   : > { %4906 = vmatprep.mubr.msk.bf16.mxu0 %vm5631_vm2, %v7338_v61 }
 0x763   : > { %v1771_v44 = vpop.f32.mrf.mxu0 }
 0x764   : > { %v6435_v17 = vadd.f32 %v1771_v44, %v1618_v22 }
 0x765   : > { %v4860_v5 = vpop.f32.mrf.mxu0 }
 0x767   : > { %v1774_v46 = vpop.f32.mrf.mxu0 }
 0x768   : > { %v6439_v62 = vadd.f32 %v1774_v46, %v1619_v40 }
 0x769   : > { %v4861_v47 = vpop.f32.mrf.mxu0 }
 0x783   : > { %v1839_v49 = vpop.f32.mrf.mxu0 }
 0x784   : > { %v1846_v60 = vmul.f32 0.35355338, %v1839_v49 }
 0x785   : > { %v4872_v53 = vpop.f32.mrf.mxu0 }
 0x786   : > { %v1848_v15 = vadd.f32 %v1846_v60, %v6315_v13 }
 0x787   : > { %v1842_v0 = vpop.f32.mrf.mxu0 }
 0x788   : > { %v1847_v55 = vmul.f32 0.35355338, %v1842_v0  ;;  %v1850_v58 = vsel %vm1550_vm5, %v1848_v15, -inf }
 0x789   : > { %1851 = vmax.xlane.f32.xlu0 %v1850_v58  ;;  %v4873_v14 = vpop.f32.mrf.mxu0 }
 0x78a   : > { %v1849_v4 = vadd.f32 %v1847_v55, %v6315_v13 }
 0x78c   : > { %v1853_v7 = vsel %vm1550_vm5, %v1849_v4, -inf }
 0x78d   : > { %1854 = vmax.xlane.f32.xlu1 %v1853_v7 }
 0x79e   : > { %1877 = vrot.lane.b32.xlu1 %v6282_v63, %s5635_s21 }
 0x79f   : > { %1879 = vrot.lane.b32.xlu0 %v6275_v12, %s5635_s21 }
 0x7a2   : > { %1875 = vrot.lane.b32.xlu1 %v6291_v32, %s5635_s21 }
 0x7a6   : > { %1873 = vrot.lane.b32.xlu1 %v6303_v38, %s5635_s21 }
 0x7aa   : > { %1937 = vrot.lane.b32.xlu1 %v6235_v36, %s5636_s16 }
 0x7ae   : > { %1933 = vrot.lane.b32.xlu1 %v6255_v43, %s5636_s16 }
 0x812   : > { %v1852_v39 = vpop.xlane.xlu0 %1851 }
 0x813   : > { %v1856_v22 = vsub.f32 %v1848_v15, %v1852_v39 }
 0x815   : > { %v1858_v44 = vmul.f32 1.442695, %v1856_v22 }
 0x816   : > { %v6457_v5 = vpop.permute.xlu0 %1879  ;;  %v1855_v40 = vpop.xlane.xlu1 %1854 }
 0x817   : > { %5370 = vpow2.f32 %v1858_v44  ;;  %v1857_v46 = vsub.f32 %v1849_v4, %v1855_v40  ;;  %4875 = vmatpush3.bf16.msra.mxu1 %v6457_v5 }
 0x818   : > { %4876 = vmatprep.subr.bf16.mxu1 %v7338_v61 }
 0x819   : > { %v1860_v47 = vmul.f32 1.442695, %v1857_v46 }
 0x81a   : > { %v6461_v49 = vpop.permute.xlu1 %1877 }
 0x81b   : > { %5372 = vpow2.f32 %v1860_v47  ;;  %4877 = vmatpush3.bf16.msra.mxu1 %v6461_v49 }
 0x81c   : > { %4878 = vmatprep.subr.bf16.mxu1 %v7338_v61 }
 0x81e   : > { %v6465_v36 = vpop.permute.xlu1 %1875 }
 0x81f   : > { %4879 = vmatpush3.bf16.msra.mxu1 %v6465_v36 }
 0x820   : > { %4880 = vmatprep.subr.bf16.mxu1 %v7338_v61 }
 0x822   : > { %v6469_v43 = vpop.permute.xlu1 %1873 }
 0x823   : > { %4881 = vmatpush3.bf16.msra.mxu1 %v6469_v43 }
 0x824   : > { %v5371_v60 = vpop.eup %5370  ;;  %4886 = vmatprep.subr.bf16.mxu1 %v7338_v61 }
 0x825   : > { %v1862_v53 = vsel %vm1550_vm5, %v5371_v60, 0.0 }
 0x826   : > { %1863 = vadd.xlane.f32.xlu0 %v1862_v53 }
 0x828   : > { %v5373_v15 = vpop.eup %5372 }
 0x829   : > { %v1865_v0 = vsel %vm1550_vm5, %v5373_v15, 0.0 }
 0x82a   : > { %1866 = vadd.xlane.f32.xlu0 %v1865_v0 }
 0x840   : > { %1939 = vrot.lane.b32.xlu0 %v6227_v56, %s5636_s16  ;;  %v1938_v56 = vpop.permute.xlu1 %1937 }
 0x844   : > { %1935 = vrot.lane.b32.xlu0 %v6243_v10, %s5636_s16  ;;  %v6490_v10 = vsel %vm1489_vm3, %v1938_v56, 0  ;;  %v1934_v47 = vpop.permute.xlu1 %1933 }
 0x845   : > { %7384 = vst [vmem:[#allocation12_spill] sm:$0xff] %v6490_v10 }
 0x848   : > { %1931 = vrot.lane.b32.xlu0 %v6287_v37, %s5636_s16 }
 0x8af   : > { %v1864_v55 = vpop.xlane.xlu0 %1863 }
 0x8b0   : > { %5374 = vrcp.f32 %v1864_v55 }
 0x8b3   : > { %v1867_v58 = vpop.xlane.xlu0 %1866 }
 0x8b4   : > { %5376 = vrcp.f32 %v1867_v58 }
 0x8b7   : > { %v1940_v22 = vpop.permute.xlu0 %1939 }
 0x8b8   : > { %v6482_v40 = vsel %vm1489_vm3, %v1940_v22, 0 }
 0x8b9   : > { %7383 = vst [vmem:[#allocation11_spill] sm:$0xff] %v6482_v40 }
 0x8bb   : > { %v1936_v37 = vpop.permute.xlu0 %1935 }
 0x8bc   : > { %v6495_v46 = vsel %vm1489_vm3, %v1936_v37, 0 }
 0x8bd   : > { %v5375_v14 = vpop.eup %5374  ;;  %7385 = vst [vmem:[#allocation13_spill] sm:$0xff] %v6495_v46 }
 0x8be   : > { %v1870_v7 = vmul.f32 %v5375_v14, %v5371_v60  ;;  %v6500_v60 = vsel %vm1489_vm3, %v1934_v47, 0 }
 0x8bf   : > { %7386 = vst [vmem:[#allocation14_spill] sm:$0xff] %v6500_v60  ;;  %v1932_v53 = vpop.permute.xlu0 %1931 }
 0x8c1   : > { %v5377_v4 = vpop.eup %5376 }
 0x8c2   : > { %v1871_v39 = vmul.f32 %v5377_v4, %v5373_v15  ;;  %v6511_v15 = vpack.c.bf16 %v6313_v41, %v6305_v25 }
 0x8c4   : > { %v1872_v44 = vpack.c.bf16 %v1871_v39, %v1870_v7  ;;  %7387 = vst [vmem:[#allocation15_spill] sm:$0xff] %v6511_v15 }
 0x8c6   : > { %4883 = vmatmul.mubr.msk.bf16.vlgmr.msra.gmra.mxu1 %vm1550_vm5, %v1872_v44 }
 0x8c7   : > { %4887 = vmatpush3.bf16.xpose.msra.mxu1 %v6482_v40  ;;  %4894 = vmatprep.mubr.msk.bf16.mxu1 %vm5631_vm2, %v7338_v61 }
 0x8c8   : > { %4888 = vmatprep.subr.bf16.mxu1 %v7338_v61 }
 0x8cf   : > { %4889 = vmatpush3.bf16.xpose.msra.mxu1 %v6490_v10 }
 0x8d0   : > { %4890 = vmatprep.subr.bf16.mxu1 %v7338_v61 }
 0x8d7   : > { %4891 = vmatpush3.bf16.xpose.msra.mxu1 %v6495_v46 }
 0x8d8   : > { %4892 = vmatprep.subr.bf16.mxu1 %v7338_v61 }
 0x8df   : > { %4893 = vmatpush3.bf16.xpose.msra.mxu1 %v6500_v60 }
 0x8e0   : > { %4922 = vmatprep.subr.bf16.mxu1 %v7338_v61 }
 0x8e6   : > { %4895 = vmatmul.mubr.msk.bf16.vlgmr.msra.gmra.mxu1 %vm1489_vm3, %v1932_v53 }
 0x8e7   : > { %4923 = vmatpush3.bf16.msra.mxu1 %v6309_v18  ;;  %4930 = vmatprep.mubr.msk.bf16.mxu1 %vm5631_vm2, %v7338_v61 }
 0x8e8   : > { %4924 = vmatprep.subr.bf16.mxu1 %v7338_v61 }
 0x8eb   : > { %4925 = vmatpush3.bf16.msra.mxu1 %v6511_v15 }
 0x8ec   : > { %4926 = vmatprep.subr.bf16.mxu1 %v7338_v61 }
 0x8ef   : > { %4927 = vmatpush3.bf16.msra.mxu1 %v6293_v6 }
 0x8f0   : > { %4928 = vmatprep.subr.bf16.mxu1 %v7338_v61 }
 0x8f3   : > { %4929 = vmatpush3.bf16.msra.mxu1 %v6299_v33 }
 0x8f4   : > { %4934 = vmatprep.subr.bf16.mxu1 %v7338_v61 }
 0x986   : > { %v1922_v0 = vpop.f32.mrf.mxu1 }
 0x987   : > { %v6520_v55 = vadd.f32 %v1922_v0, %v6435_v17 }
 0x988   : > { %v4884_v58 = vpop.f32.mrf.mxu1 }
 0x98a   : > { %v1925_v14 = vpop.f32.mrf.mxu1 }
 0x98b   : > { %v6523_v25 = vadd.f32 %v1925_v14, %v6439_v62 }
 0x98c   : > { %v4885_v41 = vpop.f32.mrf.mxu1 }
 0x9a6   : > { %v1990_v4 = vpop.f32.mrf.mxu1 }
 0x9a7   : > { %v1997_v7 = vmul.f32 0.35355338, %v1990_v4 }
 0x9a8   : > { %v4896_v39 = vpop.f32.mrf.mxu1 }
 0x9a9   : > { %v1999_v22 = vadd.f32 %v1997_v7, %v6315_v13 }
 0x9aa   : > { %v1993_v44 = vpop.f32.mrf.mxu1 }
 0x9ab   : > { %v1998_v56 = vmul.f32 0.35355338, %v1993_v44  ;;  %v2001_v37 = vsel %vm1550_vm5, %v1999_v22, -inf }
 0x9ac   : > { %2002 = vmax.xlane.f32.xlu1 %v2001_v37  ;;  %v4897_v47 = vpop.f32.mrf.mxu1 }
 0x9ad   : > { %v2000_v17 = vadd.f32 %v1998_v56, %v6315_v13 }
 0x9af   : > { %v2004_v53 = vsel %vm1550_vm5, %v2000_v17, -inf }
 0x9b0   : > { %2005 = vmax.xlane.f32.xlu0 %v2004_v53 }
 0x9bd   : > { %2030 = vrot.lane.b32.xlu1 %v6275_v12, %s5637_s19 }
 0x9c1   : > { %2026 = vrot.lane.b32.xlu1 %v6291_v32, %s5637_s19 }
 0x9c5   : > { %2024 = vrot.lane.b32.xlu1 %v6303_v38, %s5637_s19 }
 0xa35   : > { %v2003_v62 = vpop.xlane.xlu1 %2002 }
 0xa36   : > { %v2007_v0 = vsub.f32 %v1999_v22, %v2003_v62 }
 0xa38   : > { %v2009_v58 = vmul.f32 1.442695, %v2007_v0 }
 0xa39   : > { %v6535_v14 = vpop.permute.xlu1 %2030  ;;  %v2006_v41 = vpop.xlane.xlu0 %2005 }
 0xa3a   : > { %5378 = vpow2.f32 %v2009_v58  ;;  %v2008_v4 = vsub.f32 %v2000_v17, %v2006_v41  ;;  %4899 = vmatpush3.bf16.msra.mxu0 %v6535_v14 }
 0xa3b   : > { %4900 = vmatprep.subr.bf16.mxu0 %v7338_v61 }
 0xa3c   : > { %v2011_v7 = vmul.f32 1.442695, %v2008_v4 }
 0xa3d   : > { %v6546_v53 = vpop.permute.xlu1 %2026 }
 0xa3e   : > { %5380 = vpow2.f32 %v2011_v7 }
 0xa41   : > { %v6551_v0 = vpop.permute.xlu1 %2024 }
 0xa42   : > { %7388 = vst [vmem:[#allocation16_spill] sm:$0xff] %v6551_v0 }
 0xa47   : > { %v5379_v39 = vpop.eup %5378 }
 0xa48   : > { %v2013_v44 = vsel %vm1550_vm5, %v5379_v39, 0.0 }
 0xa49   : > { %2014 = vadd.xlane.f32.xlu0 %v2013_v44  ;;  %v6558_v44 = vsel %vm1489_vm3, %v6245_v21, 0 }
 0xa4a   : > { %7389 = vst [vmem:[#allocation17_spill] sm:$0xff] %v6558_v44 }
 0xa4b   : > { %v5381_v56 = vpop.eup %5380 }
 0xa4c   : > { %v2016_v37 = vsel %vm1550_vm5, %v5381_v56, 0.0 }
 0xa4d   : > { %2017 = vadd.xlane.f32.xlu0 %v2016_v37  ;;  %v6566_v37 = vsel %vm1489_vm3, %v6247_v23, 0 }
 0xa4e   : > { %7390 = vst [vmem:[#allocation18_spill] sm:$0xff] %v6566_v37 }
 0xa63   : > { %2028 = vrot.lane.b32.xlu0 %v6282_v63, %s5637_s19 }
 0xad2   : > { %v2015_v22 = vpop.xlane.xlu0 %2014 }
 0xad3   : > { %5382 = vrcp.f32 %v2015_v22 }
 0xad6   : > { %v2018_v47 = vpop.xlane.xlu0 %2017 }
 0xad7   : > { %5384 = vrcp.f32 %v2018_v47 }
 0xada   : > { %v6543_v17 = vpop.permute.xlu0 %2028 }
 0xadb   : > { %4901 = vmatpush3.bf16.msra.mxu0 %v6543_v17 }
 0xadc   : > { %4902 = vmatprep.subr.bf16.mxu0 %v7338_v61 }
 0xadf   : > { %4903 = vmatpush3.bf16.msra.mxu0 %v6546_v53 }
 0xae0   : > { %4904 = vmatprep.subr.bf16.mxu0 %v7338_v61  ;;  %v5383_v62 = vpop.eup %5382 }
 0xae1   : > { %v2021_v41 = vmul.f32 %v5383_v62, %v5379_v39  ;;  %v6572_v39 = vsel %vm1489_vm3, %v6265_v51, 0 }
 0xae2   : > { %7391 = vst [vmem:[#allocation19_spill] sm:$0xff] %v6572_v39 }
 0xae3   : > { %4905 = vmatpush3.bf16.msra.mxu0 %v6551_v0 }
 0xae4   : > { %v5385_v58 = vpop.eup %5384  ;;  %4910 = vmatprep.subr.bf16.mxu0 %v7338_v61 }
 0xae5   : > { %v2022_v4 = vmul.f32 %v5385_v58, %v5381_v56  ;;  %v6578_v56 = vsel %vm1489_vm3, %v6269_v31, 0 }
 0xae6   : > { %7392 = vst [vmem:[#allocation20_spill] sm:$0xff] %v6578_v56 }
 0xae7   : > { %v2023_v7 = vpack.c.bf16 %v2022_v4, %v2021_v41 }
 0xae9   : > { %4907 = vmatmul.mubr.msk.bf16.vlgmr.msra.gmra.mxu0 %vm1550_vm5, %v2023_v7 }
 0xaea   : > { %4911 = vmatpush3.bf16.xpose.msra.mxu0 %v6558_v44  ;;  %4918 = vmatprep.mubr.msk.bf16.mxu0 %vm5631_vm2, %v7338_v61 }
 0xaeb   : > { %4912 = vmatprep.subr.bf16.mxu0 %v7338_v61 }
 0xaf2   : > { %4913 = vmatpush3.bf16.xpose.msra.mxu0 %v6566_v37 }
 0xaf3   : > { %4914 = vmatprep.subr.bf16.mxu0 %v7338_v61 }
 0xafa   : > { %4915 = vmatpush3.bf16.xpose.msra.mxu0 %v6572_v39 }
 0xafb   : > { %4916 = vmatprep.subr.bf16.mxu0 %v7338_v61 }
 0xb02   : > { %4917 = vmatpush3.bf16.xpose.msra.mxu0 %v6578_v56 }
 0xb03   : > { %4946 = vmatprep.subr.bf16.mxu0 %v7338_v61 }
 0xb09   : > { %4919 = vmatmul.mubr.msk.bf16.vlgmr.msra.gmra.mxu0 %vm1489_vm3, %v6284_v2 }
 0xb0a   : > { %4954 = vmatprep.mubr.msk.bf16.mxu0 %vm5631_vm2, %v7338_v61 }
 0xba9   : > { %v2073_v22 = vpop.f32.mrf.mxu0 }
 0xbaa   : > { %v6587_v47 = vadd.f32 %v2073_v22, %v6520_v55 }
 0xbab   : > { %v4908_v62 = vpop.f32.mrf.mxu0 }
 0xbad   : > { %v2076_v58 = vpop.f32.mrf.mxu0 }
 0xbae   : > { %v6590_v41 = vadd.f32 %v2076_v58, %v6523_v25 }
 0xbaf   : > { %v4909_v4 = vpop.f32.mrf.mxu0 }
 0xbc9   : > { %v2131_v7 = vpop.f32.mrf.mxu0 }
 0xbca   : > { %v2138_v56 = vmul.f32 0.35355338, %v2131_v7 }
 0xbcb   : > { %v4920_v39 = vpop.f32.mrf.mxu0 }
 0xbcc   : > { %v2140_v37 = vadd.f32 %v2138_v56, %v6315_v13 }
 0xbcd   : > { %v2134_v44 = vpop.f32.mrf.mxu0 }
 0xbce   : > { %v2139_v60 = vmul.f32 0.35355338, %v2134_v44  ;;  %v2142_v46 = vsel %vm1550_vm5, %v2140_v37, -inf }
 0xbcf   : > { %2143 = vmax.xlane.f32.xlu1 %v2142_v46  ;;  %v4921_v61 = vpop.f32.mrf.mxu0 }
 0xbd0   : > { %v2141_v55 = vadd.f32 %v2139_v60, %v6315_v13 }
 0xbd2   : > { %v2145_v22 = vsel %vm1550_vm5, %v2141_v55, -inf }
 0xbd3   : > { %2146 = vmax.xlane.f32.xlu0 %v2145_v22 }
 0xbe0   : > { %2224 = vrot.lane.b32.xlu1 %v6245_v21, %s5633_s20 }
 0xbe4   : > { %2220 = vrot.lane.b32.xlu1 %v6265_v51, %s5633_s20 }
 0xbe8   : > { %2218 = vrot.lane.b32.xlu1 %v6269_v31, %s5633_s20 }
 0xbec   : > { %2212 = vrot.lane.b32.xlu1 %v6284_v2, %s5633_s20 }
 0xc58   : > { %v2144_v25 = vpop.xlane.xlu1 %2143 }
 0xc59   : > { %v2148_v46 = vsub.f32 %v2140_v37, %v2144_v25 }
 0xc5b   : > { %v2150_v61 = vmul.f32 1.442695, %v2148_v46 }
 0xc5c   : > { %v2147_v44 = vpop.xlane.xlu0 %2146 }
 0xc5d   : > { %5386 = vpow2.f32 %v2150_v61  ;;  %v2149_v60 = vsub.f32 %v2141_v55, %v2147_v44  ;;  %v2225_v61 = vpop.permute.xlu1 %2224 }
 0xc5f   : > { %v2152_v39 = vmul.f32 1.442695, %v2149_v60  ;;  %v6609_v60 = vsel %vm1489_vm3, %v2225_v61, 0 }
 0xc60   : > { %7393 = vst [vmem:[#allocation21_spill] sm:$0xff] %v6609_v60 }
 0xc61   : > { %5388 = vpow2.f32 %v2152_v39  ;;  %v7394_v39 = vmov 0.0  }
 0xc6a   : > { %v5387_v56 = vpop.eup %5386 }
 0xc6b   : > { %v2154_v62 = vsel %vm1550_vm5, %v5387_v56, 0.0 }
 0xc6c   : > { %2155 = vadd.xlane.f32.xlu0 %v2154_v62 }
 0xc6e   : > { %v5389_v58 = vpop.eup %5388 }
 0xc6f   : > { %v2157_v4 = vsel %vm1550_vm5, %v5389_v58, 0.0 }
 0xc70   : > { %2158 = vadd.xlane.f32.xlu0 %v2157_v4 }
 0xc86   : > { %2222 = vrot.lane.b32.xlu0 %v6247_v23, %s5633_s20 }
 0xcf5   : > { %v2156_v7 = vpop.xlane.xlu0 %2155 }
 0xcf6   : > { %5390 = vrcp.f32 %v2156_v7 }
 0xcf9   : > { %v2159_v37 = vpop.xlane.xlu0 %2158 }
 0xcfa   : > { %5392 = vrcp.f32 %v2159_v37 }
 0xcfd   : > { %v2223_v62 = vpop.permute.xlu0 %2222 }
 0xcfe   : > { %v6617_v4 = vsel %vm1489_vm3, %v2223_v62, 0 }
 0xcff   : > { %7395 = vst [vmem:[#allocation22_spill] sm:$0xff] %v6617_v4 }
 0xd03   : > { %v5391_v22 = vpop.eup %5390 }
 0xd04   : > { %v2162_v55 = vmul.f32 %v5391_v22, %v5387_v56  ;;  %v2221_v56 = vpop.permute.xlu1 %2220 }
 0xd07   : > { %v5393_v25 = vpop.eup %5392 }
 0xd08   : > { %v2163_v46 = vmul.f32 %v5393_v25, %v5389_v58  ;;  %v6622_v58 = vsel %vm1489_vm3, %v2221_v56, 0  ;;  %v2219_v7 = vpop.permute.xlu1 %2218 }
 0xd09   : > { %7396 = vst [vmem:[#allocation23_spill] sm:$0xff] %v6622_v58  ;;  %v6627_v37 = vsel %vm1489_vm3, %v2219_v7, 0 }
 0xd0a   : > { %v2164_v44 = vpack.c.bf16 %v2163_v46, %v2162_v55  ;;  %7397 = vst [vmem:[#allocation24_spill] sm:$0xff] %v6627_v37 }
 0xd0c   : > { %4931 = vmatmul.mubr.msk.bf16.vlgmr.msra.gmra.mxu1 %vm1550_vm5, %v2164_v44  ;;  %v2213_v22 = vpop.permute.xlu1 %2212 }
 0xd0d   : > { %4935 = vmatpush3.bf16.xpose.msra.mxu1 %v6609_v60  ;;  %4942 = vmatprep.mubr.msk.bf16.mxu1 %vm5631_vm2, %v7394_v39 }
 0xd0e   : > { %4936 = vmatprep.subr.bf16.mxu1 %v7394_v39 }
 0xd15   : > { %4937 = vmatpush3.bf16.xpose.msra.mxu1 %v6617_v4 }
 0xd16   : > { %4938 = vmatprep.subr.bf16.mxu1 %v7394_v39 }
 0xd1d   : > { %4939 = vmatpush3.bf16.xpose.msra.mxu1 %v6622_v58 }
 0xd1e   : > { %4940 = vmatprep.subr.bf16.mxu1 %v7394_v39 }
 0xd25   : > { %4941 = vmatpush3.bf16.xpose.msra.mxu1 %v6627_v37 }
 0xd26   : > { %4970 = vmatprep.subr.bf16.mxu1 %v7394_v39 }
 0xd2c   : > { %4943 = vmatmul.mubr.msk.bf16.vlgmr.msra.gmra.mxu1 %vm1489_vm3, %v2213_v22 }
 0xd2d   : > { %4978 = vmatprep.mubr.msk.bf16.mxu1 %vm5631_vm2, %v7394_v39 }
 0xdcc   : > { %v6634_v25 = vpop.f32.mrf.mxu1 }
 0xdce   : > { %v4932_v55 = vpop.f32.mrf.mxu1 }
 0xdd0   : > { %v6636_v46 = vpop.f32.mrf.mxu1 }
 0xdd2   : > { %v4933_v61 = vpop.f32.mrf.mxu1 }
 0xdec   : > { %v2275_v44 = vpop.f32.mrf.mxu1 }
 0xded   : > { %v2282_v62 = vmul.f32 0.35355338, %v2275_v44 }
 0xdee   : > { %v4944_v56 = vpop.f32.mrf.mxu1 }
 0xdef   : > { %v2284_v7 = vadd.f32 %v2282_v62, %v6315_v13 }
 0xdf0   : > { %v2278_v37 = vpop.f32.mrf.mxu1 }
 0xdf1   : > { %v2283_v58 = vmul.f32 0.35355338, %v2278_v37  ;;  %v2286_v4 = vsel %vm1550_vm5, %v2284_v7, -inf }
 0xdf2   : > { %2287 = vmax.xlane.f32.xlu0 %v2286_v4  ;;  %v4945_v22 = vpop.f32.mrf.mxu1 }
 0xdf3   : > { %v2285_v60 = vadd.f32 %v2283_v58, %v6315_v13 }
 0xdf5   : > { %v2289_v10 = vsel %vm1550_vm5, %v2285_v60, -inf }
 0xdf6   : > { %2290 = vmax.xlane.f32.xlu1 %v2289_v10 }
 0xe07   : > { %2317 = vrot.lane.b32.xlu1 %v6511_v15, %s7379_s1 }
 0xe08   : > { %2319 = vrot.lane.b32.xlu0 %v6309_v18, %s7379_s1 }
 0xe0b   : > { %2315 = vrot.lane.b32.xlu1 %v6293_v6, %s7379_s1 }
 0xe0f   : > { %2313 = vrot.lane.b32.xlu1 %v6299_v33, %s7379_s1  ;;  %s5638_s1 = smov [#allocation4]  }
 0xe13   : > { %2377 = vrot.lane.b32.xlu1 %v6247_v23, %s5634_s17 }
 0xe17   : > { %2373 = vrot.lane.b32.xlu1 %v6269_v31, %s5634_s17 }
 0xe7b   : > { %v2288_v4 = vpop.xlane.xlu0 %2287 }
 0xe7c   : > { %v2292_v10 = vsub.f32 %v2284_v7, %v2288_v4 }
 0xe7e   : > { %v2294_v58 = vmul.f32 1.442695, %v2292_v10 }
 0xe7f   : > { %v6654_v37 = vpop.permute.xlu0 %2319  ;;  %v2291_v55 = vpop.xlane.xlu1 %2290 }
 0xe80   : > { %7398 = vst [vmem:[#allocation25_spill] sm:$0xff] %v6654_v37  ;;  %5394 = vpow2.f32 %v2294_v58  ;;  %v2293_v61 = vsub.f32 %v2285_v60, %v2291_v55  ;;  %4947 = vmatpush3.bf16.msra.mxu0 %v6654_v37 }
 0xe81   : > { %4948 = vmatprep.subr.bf16.mxu0 %v7394_v39 }
 0xe82   : > { %v2296_v44 = vmul.f32 1.442695, %v2293_v61 }
 0xe83   : > { %v6658_v62 = vpop.permute.xlu1 %2317 }
 0xe84   : > { %7399 = vst [vmem:[#allocation26_spill] sm:$0xff] %v6658_v62  ;;  %5396 = vpow2.f32 %v2296_v44  ;;  %4949 = vmatpush3.bf16.msra.mxu0 %v6658_v62 }
 0xe85   : > { %4950 = vmatprep.subr.bf16.mxu0 %v7394_v39 }
 0xe87   : > { %v6662_v56 = vpop.permute.xlu1 %2315 }
 0xe88   : > { %7400 = vst [vmem:[#allocation27_spill] sm:$0xff] %v6662_v56  ;;  %4951 = vmatpush3.bf16.msra.mxu0 %v6662_v56 }
 0xe89   : > { %4952 = vmatprep.subr.bf16.mxu0 %v7394_v39 }
 0xe8b   : > { %v6666_v7 = vpop.permute.xlu1 %2313 }
 0xe8c   : > { %7401 = vst [vmem:[#allocation28_spill] sm:$0xff] %v6666_v7  ;;  %4953 = vmatpush3.bf16.msra.mxu0 %v6666_v7 }
 0xe8d   : > { %v5395_v60 = vpop.eup %5394  ;;  %4958 = vmatprep.subr.bf16.mxu0 %v7394_v39 }
 0xe8e   : > { %v2298_v22 = vsel %vm1550_vm5, %v5395_v60, 0.0 }
 0xe8f   : > { %2299 = vadd.xlane.f32.xlu0 %v2298_v22 }
 0xe91   : > { %v5397_v4 = vpop.eup %5396 }
 0xe92   : > { %v2301_v10 = vsel %vm1550_vm5, %v5397_v4, 0.0 }
 0xe93   : > { %2302 = vadd.xlane.f32.xlu0 %v2301_v10 }
 0xea9   : > { %2379 = vrot.lane.b32.xlu0 %v6245_v21, %s5634_s17 }
 0xead   : > { %2375 = vrot.lane.b32.xlu0 %v6265_v51, %s5634_s17 }
 0xeb1   : > { %2371 = vrot.lane.b32.xlu0 %v6284_v2, %s5634_s17 }
 0xf18   : > { %v2300_v58 = vpop.xlane.xlu0 %2299 }
 0xf19   : > { %5398 = vrcp.f32 %v2300_v58  ;;  %v2378_v58 = vpop.permute.xlu1 %2377 }
 0xf1c   : > { %v2303_v55 = vpop.xlane.xlu0 %2302 }
 0xf1d   : > { %5400 = vrcp.f32 %v2303_v55  ;;  %v6687_v55 = vsel %vm1489_vm3, %v2378_v58, 0 }
 0xf1e   : > { %7403 = vst [vmem:[#allocation30_spill] sm:$0xff] %v6687_v55 }
 0xf20   : > { %v2380_v56 = vpop.permute.xlu0 %2379 }
 0xf21   : > { %v6679_v10 = vsel %vm1489_vm3, %v2380_v56, 0 }
 0xf22   : > { %7402 = vst [vmem:[#allocation29_spill] sm:$0xff] %v6679_v10 }
 0xf26   : > { %v5399_v61 = vpop.eup %5398 }
 0xf27   : > { %v2306_v22 = vmul.f32 %v5399_v61, %v5395_v60  ;;  %v2209_v61 = vadd.f32 %v6634_v25, %v6431_v50 }
 0xf2a   : > { %v5401_v44 = vpop.eup %5400 }
 0xf2b   : > { %v2307_v7 = vmul.f32 %v5401_v44, %v5397_v4 }
 0xf2d   : > { %v2308_v62 = vpack.c.bf16 %v2307_v7, %v2306_v22  ;;  %v2376_v7 = vpop.permute.xlu0 %2375 }
 0xf2e   : > { %v6692_v56 = vsel %vm1489_vm3, %v2376_v7, 0  ;;  %v2210_v7 = vadd.f32 %v6636_v46, %v6431_v50 }
 0xf2f   : > { %4955 = vmatmul.mubr.msk.bf16.vlgmr.msra.gmra.mxu0 %vm1550_vm5, %v2308_v62  ;;  %7404 = vst [vmem:[#allocation31_spill] sm:$0xff] %v6692_v56  ;;  %v2374_v62 = vpop.permute.xlu1 %2373 }
 0xf30   : > { %4959 = vmatpush3.bf16.xpose.msra.mxu0 %v6679_v10  ;;  %4966 = vmatprep.mubr.msk.bf16.mxu0 %vm5631_vm2, %v7394_v39  ;;  %v6697_v60 = vsel %vm1489_vm3, %v2374_v62, 0 }
 0xf31   : > { %4960 = vmatprep.subr.bf16.mxu0 %v7394_v39  ;;  %7405 = vst [vmem:[#allocation32_spill] sm:$0xff] %v6697_v60  ;;  %v2372_v4 = vpop.permute.xlu0 %2371 }
 0xf38   : > { %4961 = vmatpush3.bf16.xpose.msra.mxu0 %v6687_v55 }
 0xf39   : > { %4962 = vmatprep.subr.bf16.mxu0 %v7394_v39 }
 0xf40   : > { %4963 = vmatpush3.bf16.xpose.msra.mxu0 %v6692_v56 }
 0xf41   : > { %4964 = vmatprep.subr.bf16.mxu0 %v7394_v39 }
 0xf48   : > { %4965 = vmatpush3.bf16.xpose.msra.mxu0 %v6697_v60 }
 0xf49   : > { %4994 = vmatprep.subr.bf16.mxu0 %v7394_v39 }
 0xf4f   : > { %4967 = vmatmul.mubr.msk.bf16.vlgmr.msra.gmra.mxu0 %vm1489_vm3, %v2372_v4 }
 0xf50   : > { %5002 = vmatprep.mubr.msk.bf16.mxu0 %vm5631_vm2, %v7394_v39 }
 0xfef   : > { %v2362_v44 = vpop.f32.mrf.mxu0 }
 0xff0   : > { %v6706_v22 = vadd.f32 %v2362_v44, %v2209_v61 }
 0xff1   : > { %v4956_v58 = vpop.f32.mrf.mxu0 }
 0xff3   : > { %v2365_v62 = vpop.f32.mrf.mxu0 }
 0xff4   : > { %v6710_v60 = vadd.f32 %v2365_v62, %v2210_v7 }
 0xff5   : > { %v4957_v56 = vpop.f32.mrf.mxu0 }
0x100f   : > { %v2430_v55 = vpop.f32.mrf.mxu0 }
0x1010   : > { %v2437_v10 = vmul.f32 0.35355338, %v2430_v55 }
0x1011   : > { %v4968_v4 = vpop.f32.mrf.mxu0 }
0x1012   : > { %v2439_v37 = vadd.f32 %v2437_v10, %v6315_v13 }
0x1013   : > { %v2433_v40 = vpop.f32.mrf.mxu0 }
0x1014   : > { %v2438_v0 = vmul.f32 0.35355338, %v2433_v40  ;;  %v2441_v25 = vsel %vm1550_vm5, %v2439_v37, -inf }
0x1015   : > { %2442 = vmax.xlane.f32.xlu1 %v2441_v25  ;;  %v4969_v61 = vpop.f32.mrf.mxu0 }
0x1016   : > { %v2440_v44 = vadd.f32 %v2438_v0, %v6315_v13 }
0x1018   : > { %v2444_v58 = vsel %vm1550_vm5, %v2440_v44, -inf }
0x1019   : > { %2445 = vmax.xlane.f32.xlu0 %v2444_v58 }
0x1026   : > { %2470 = vrot.lane.b32.xlu1 %v6309_v18, %s5635_s21 }
0x102a   : > { %2466 = vrot.lane.b32.xlu1 %v6293_v6, %s5635_s21 }
0x102e   : > { %2464 = vrot.lane.b32.xlu1 %v6299_v33, %s5635_s21 }
0x1032   : > { %2530 = vrot.lane.b32.xlu1 %v6245_v21, %s5636_s16 }
0x1036   : > { %2526 = vrot.lane.b32.xlu1 %v6265_v51, %s5636_s16 }
0x103a   : > { %2522 = vrot.lane.b32.xlu1 %v6284_v2, %s5636_s16 }
0x109e   : > { %v2443_v40 = vpop.xlane.xlu1 %2442 }
0x109f   : > { %v2447_v0 = vsub.f32 %v2439_v37, %v2443_v40 }
0x10a1   : > { %v2449_v46 = vmul.f32 1.442695, %v2447_v0 }
0x10a2   : > { %v6728_v10 = vpop.permute.xlu1 %2470  ;;  %v2446_v55 = vpop.xlane.xlu0 %2445 }
0x10a3   : > { %7406 = vst [vmem:[#allocation33_spill] sm:$0xff] %v6728_v10  ;;  %5402 = vpow2.f32 %v2449_v46  ;;  %v2448_v56 = vsub.f32 %v2440_v44, %v2446_v55  ;;  %4971 = vmatpush3.bf16.msra.mxu1 %v6728_v10 }
0x10a4   : > { %4972 = vmatprep.subr.bf16.mxu1 %v7394_v39 }
0x10a5   : > { %v2451_v7 = vmul.f32 1.442695, %v2448_v56 }
0x10a6   : > { %v6740_v25 = vpop.permute.xlu1 %2466 }
0x10a7   : > { %5404 = vpow2.f32 %v2451_v7  ;;  %7407 = vst [vmem:[#allocation34_spill] sm:$0xff] %v6740_v25 }
0x10aa   : > { %v6747_v44 = vpop.permute.xlu1 %2464 }
0x10ab   : > { %7409 = vst [vmem:[#allocation36_spill] sm:$0xff] %v6747_v44 }
0x10ae   : > { %v2531_v0 = vpop.permute.xlu1 %2530 }
0x10af   : > { %v6753_v55 = vsel %vm1489_vm3, %v2531_v0, 0 }
0x10b0   : > { %v5403_v21 = vpop.eup %5402  ;;  %7410 = vst [vmem:[#allocation37_spill] sm:$0xff] %v6753_v55 }
0x10b1   : > { %v2453_v51 = vsel %vm1550_vm5, %v5403_v21, 0.0 }
0x10b2   : > { %2454 = vadd.xlane.f32.xlu0 %v2453_v51 }
0x10b4   : > { %v5405_v62 = vpop.eup %5404 }
0x10b5   : > { %v2456_v2 = vsel %vm1550_vm5, %v5405_v62, 0.0 }
0x10b6   : > { %2457 = vadd.xlane.f32.xlu0 %v2456_v2 }
0x10cc   : > { %2468 = vrot.lane.b32.xlu0 %v6511_v15, %s5635_s21 }
0x10d0   : > { %2528 = vrot.lane.b32.xlu0 %v6247_v23, %s5636_s16 }
0x10d4   : > { %2524 = vrot.lane.b32.xlu0 %v6269_v31, %s5636_s16 }
0x113b   : > { %v2455_v37 = vpop.xlane.xlu0 %2454 }
0x113c   : > { %5406 = vrcp.f32 %v2455_v37  ;;  %v5538_v37 = vld [vmem:[%s6039_s29 + $0x8] sm:$0xff]  }
0x113f   : > { %v2458_v4 = vpop.xlane.xlu0 %2457 }
0x1140   : > { %5408 = vrcp.f32 %v2458_v4 }
0x1143   : > { %v6742_v61 = vpop.permute.xlu0 %2468 }
0x1144   : > { %7408 = vst [vmem:[#allocation35_spill] sm:$0xff] %v6742_v61  ;;  %4973 = vmatpush3.bf16.msra.mxu1 %v6742_v61 }
0x1145   : > { %4974 = vmatprep.subr.bf16.mxu1 %v7394_v39 }
0x1147   : > { %v2529_v56 = vpop.permute.xlu0 %2528 }
0x1148   : > { %4975 = vmatpush3.bf16.msra.mxu1 %v6740_v25  ;;  %v6761_v7 = vsel %vm1489_vm3, %v2529_v56, 0 }
0x1149   : > { %4976 = vmatprep.subr.bf16.mxu1 %v7394_v39  ;;  %v5407_v23 = vpop.eup %5406  ;;  %7411 = vst [vmem:[#allocation38_spill] sm:$0xff] %v6761_v7 }
0x114a   : > { %v2461_v58 = vmul.f32 %v5407_v23, %v5403_v21  ;;  %v2527_v21 = vpop.permute.xlu1 %2526  ;;  %v5539_v23 = vld [vmem:[%s6039_s29] sm:$0xff]   ;;  %s6883_s29 = scalar_lea.vmem %s7328_s10, %s5754_s14  ;;  %s484_s14 = sand.u32 1, %s5618_s23  }
0x114b   : > { %v6766_v51 = vsel %vm1489_vm3, %v2527_v21, 0 }
0x114c   : > { %4977 = vmatpush3.bf16.msra.mxu1 %v6747_v44  ;;  %7412 = vst [vmem:[#allocation39_spill] sm:$0xff] %v6766_v51  ;;  %v5542_v44 = vld [vmem:[%s5851_s15 + $0x10] sm:$0xff] }
0x114d   : > { %v5409_v31 = vpop.eup %5408  ;;  %4982 = vmatprep.subr.bf16.mxu1 %v7394_v39 }
0x114e   : > { %v2462_v40 = vmul.f32 %v5409_v31, %v5405_v62  ;;  %v2525_v62 = vpop.permute.xlu0 %2524  ;;  %v2523_v4 = vpop.permute.xlu1 %2522 }
0x114f   : > { %v6771_v2 = vsel %vm1489_vm3, %v2525_v62, 0 }
0x1150   : > { %v2463_v46 = vpack.c.bf16 %v2462_v40, %v2461_v58  ;;  %7413 = vst [vmem:[#allocation40_spill] sm:$0xff] %v6771_v2 }
0x1152   : > { %4979 = vmatmul.mubr.msk.bf16.vlgmr.msra.gmra.mxu1 %vm1550_vm5, %v2463_v46 }
0x1153   : > { %4983 = vmatpush3.bf16.xpose.msra.mxu1 %v6753_v55  ;;  %4990 = vmatprep.mubr.msk.bf16.mxu1 %vm5631_vm2, %v7394_v39 }
0x1154   : > { %4984 = vmatprep.subr.bf16.mxu1 %v7394_v39 }
0x115b   : > { %4985 = vmatpush3.bf16.xpose.msra.mxu1 %v6761_v7 }
0x115c   : > { %4986 = vmatprep.subr.bf16.mxu1 %v7394_v39 }
0x1163   : > { %4987 = vmatpush3.bf16.xpose.msra.mxu1 %v6766_v51 }
0x1164   : > { %4988 = vmatprep.subr.bf16.mxu1 %v7394_v39 }
0x116b   : > { %4989 = vmatpush3.bf16.xpose.msra.mxu1 %v6771_v2 }
0x116c   : > { %5026 = vmatprep.subr.bf16.mxu1 %v5538_v37 }
0x1172   : > { %4991 = vmatmul.mubr.msk.bf16.vlgmr.msra.gmra.mxu1 %vm1489_vm3, %v2523_v4 }
0x1173   : > { %5027 = vmatpush3.bf16.msra.mxu1 %v5538_v37 }
0x1174   : > { %5028 = vmatprep.subr.bf16.mxu1 %v5539_v23 }
0x1177   : > { %5029 = vmatpush3.bf16.msra.mxu1 %v5539_v23 }
0x1178   : > { %5034 = vmatprep.subr.bf16.mxu1 %v7394_v39 }
0x1212   : > { %v2513_v31 = vpop.f32.mrf.mxu1 }
0x1213   : > { %v6779_v58 = vadd.f32 %v2513_v31, %v6706_v22 }
0x1214   : > { %v4980_v40 = vpop.f32.mrf.mxu1 }
0x1216   : > { %v2516_v0 = vpop.f32.mrf.mxu1 }
0x1217   : > { %v6782_v46 = vadd.f32 %v2516_v0, %v6710_v60  ;;  %v5540_v60 = vld [vmem:[%s5851_s15 + $0x8] sm:$0xff] }
0x1218   : > { %v4981_v56 = vpop.f32.mrf.mxu1 }
0x1232   : > { %v2581_v21 = vpop.f32.mrf.mxu1 }
0x1233   : > { %v2588_v62 = vmul.f32 0.35355338, %v2581_v21 }
0x1234   : > { %v4992_v4 = vpop.f32.mrf.mxu1 }
0x1235   : > { %v2590_v37 = vadd.f32 %v2588_v62, %v6315_v13 }
0x1236   : > { %v2584_v2 = vpop.f32.mrf.mxu1 }
0x1237   : > { %v2589_v23 = vmul.f32 0.35355338, %v2584_v2  ;;  %v2592_v51 = vsel %vm1550_vm5, %v2590_v37, -inf  ;;  %v6796_v2 = vadd.f32 %v5540_v60, %v6590_v41 }
0x1238   : > { %2593 = vmax.xlane.f32.xlu0 %v2592_v51  ;;  %v4993_v7 = vpop.f32.mrf.mxu1 }
0x1239   : > { %v2591_v22 = vadd.f32 %v2589_v23, %v6315_v13  ;;  %v2680_v7 = vsel %vm615_vm0, %v6796_v2, 0.0 }
0x123b   : > { %v2595_v31 = vsel %vm1550_vm5, %v2591_v22, -inf }
0x123c   : > { %2596 = vmax.xlane.f32.xlu1 %v2595_v31 }
0x124d   : > { %2619 = vrot.lane.b32.xlu1 %v6511_v15, %s5637_s19 }
0x1251   : > { %2617 = vrot.lane.b32.xlu1 %v6293_v6, %s5637_s19 }
0x1255   : > { %2615 = vrot.lane.b32.xlu1 %v6299_v33, %s5637_s19 }
0x1279   : > { %2681 = vadd.xlane.f32.xlu1 %v2680_v7 }
0x12c1   : > { %v2594_v51 = vpop.xlane.xlu0 %2593 }
0x12c2   : > { %v2598_v40 = vsub.f32 %v2590_v37, %v2594_v51 }
0x12c4   : > { %v2600_v0 = vmul.f32 1.442695, %v2598_v40 }
0x12c5   : > { %v2597_v56 = vpop.xlane.xlu1 %2596 }
0x12c6   : > { %5410 = vpow2.f32 %v2600_v0  ;;  %v2599_v21 = vsub.f32 %v2591_v22, %v2597_v56  ;;  %v5541_v56 = vld [vmem:[%s5851_s15] sm:$0xff] }
0x12c8   : > { %v2602_v62 = vmul.f32 1.442695, %v2599_v21  ;;  %v6817_v21 = vadd.f32 %v5541_v56, %v6587_v47 }
0x12c9   : > { %v6804_v60 = vpop.permute.xlu1 %2619 }
0x12ca   : > { %5412 = vpow2.f32 %v2602_v62  ;;  %7414 = vst [vmem:[#allocation41_spill] sm:$0xff] %v6804_v60 }
0x12cd   : > { %v6806_v37 = vpop.permute.xlu1 %2617 }
0x12ce   : > { %7415 = vst [vmem:[#allocation42_spill] sm:$0xff] %v6806_v37 }
0x12d1   : > { %v6808_v7 = vpop.permute.xlu1 %2615 }
0x12d2   : > { %7416 = vst [vmem:[#allocation43_spill] sm:$0xff] %v6808_v7 }
0x12d3   : > { %v5411_v4 = vpop.eup %5410 }
0x12d4   : > { %v2604_v23 = vsel %vm1550_vm5, %v5411_v4, 0.0 }
0x12d5   : > { %2605 = vadd.xlane.f32.xlu0 %v2604_v23  ;;  %v2677_v23 = vsel %vm615_vm0, %v6817_v21, 0.0 }
0x12d7   : > { %v5413_v31 = vpop.eup %5412 }
0x12d8   : > { %v2607_v41 = vsel %vm1550_vm5, %v5413_v31, 0.0 }
0x12d9   : > { %2608 = vadd.xlane.f32.xlu0 %v2607_v41 }
0x12ef   : > { %2621 = vrot.lane.b32.xlu0 %v6309_v18, %s5637_s19 }
0x1302   : > { %v2682_v22 = vpop.xlane.xlu1 %2681 }
0x1303   : > { %v2690_v51 = vmul.f32 0.03125, %v2682_v22 }
0x1305   : > { %v6811_v40 = vsub.f32 %v6796_v2, %v2690_v51 }
0x1307   : > { %v2698_v0 = vmul.f32 %v6811_v40, %v6811_v40 }
0x1309   : > { %v2704_v62 = vsel %vm615_vm0, %v2698_v0, 0.0 }
0x130a   : > { %2705 = vadd.xlane.f32.xlu1 %v2704_v62 }
0x130e   : > { %2678 = vadd.xlane.f32.xlu0 %v2677_v23 }
0x135e   : > { %v2606_v41 = vpop.xlane.xlu0 %2605 }
0x135f   : > { %5414 = vrcp.f32 %v2606_v41 }
0x1362   : > { %v2609_v22 = vpop.xlane.xlu0 %2608 }
0x1363   : > { %5416 = vrcp.f32 %v2609_v22 }
0x1366   : > { %v6822_v51 = vpop.permute.xlu0 %2621 }
0x1367   : > { %7417 = vst [vmem:[#allocation44_spill] sm:$0xff] %v6822_v51  ;;  %4995 = vmatpush3.bf16.msra.mxu0 %v6822_v51 }
0x1368   : > { %4996 = vmatprep.subr.bf16.mxu0 %v7394_v39 }
0x136b   : > { %4997 = vmatpush3.bf16.msra.mxu0 %v6804_v60 }
0x136c   : > { %4998 = vmatprep.subr.bf16.mxu0 %v7394_v39  ;;  %v5415_v47 = vpop.eup %5414 }
0x136d   : > { %v2612_v56 = vmul.f32 %v5415_v47, %v5411_v4 }
0x136f   : > { %4999 = vmatpush3.bf16.msra.mxu0 %v6806_v37 }
0x1370   : > { %v5417_v0 = vpop.eup %5416  ;;  %5000 = vmatprep.subr.bf16.mxu0 %v7394_v39 }
0x1371   : > { %v2613_v62 = vmul.f32 %v5417_v0, %v5413_v31  ;;  %v5543_v0 = vld [vmem:[%s5851_s15 + $0x18] sm:$0xff]  ;;  %s5568_s15 = sshll.u32 %s5638_s1, 4  ;;  %s5569_s15 = int_to_ptr.vmem [resolvable:$false] %s5568_s15 }
0x1373   : > { %5001 = vmatpush3.bf16.msra.mxu0 %v6808_v7  ;;  %v2614_v23 = vpack.c.bf16 %v2613_v62, %v2612_v56 }
0x1376   : > { %5003 = vmatmul.mubr.msk.bf16.vlgmr.msra.gmra.mxu0 %vm1550_vm5, %v2614_v23 }
0x1397   : > { %v2679_v41 = vpop.xlane.xlu0 %2678 }
0x1398   : > { %v2689_v55 = vmul.f32 0.03125, %v2679_v41 }
0x139a   : > { %v2693_v61 = vsub.f32 %v6817_v21, %v2689_v55 }
0x1436   : > { %v2664_v22 = vpop.f32.mrf.mxu0 }
0x1437   : > { %v2671_v60 = vadd.f32 %v2664_v22, %v6779_v58 }
0x1438   : > { %v5004_v51 = vpop.f32.mrf.mxu0 }
0x1439   : > { %v6834_v25 = vadd.f32 %v5542_v44, %v2671_v60  ;;  %v2697_v51 = vmul.f32 %v2693_v61, %v2693_v61  ;;  %v2706_v60 = vpop.xlane.xlu1 %2705 }
0x143a   : > { %v2667_v37 = vpop.f32.mrf.mxu0  ;;  %v2714_v55 = vmul.f32 0.03125, %v2706_v60 }
0x143b   : > { %v2672_v4 = vadd.f32 %v2667_v37, %v6782_v46  ;;  %v2683_v31 = vsel %vm615_vm0, %v6834_v25, 0.0  ;;  %v2701_v44 = vsel %vm615_vm0, %v2697_v51, 0.0 }
0x143c   : > { %2684 = vadd.xlane.f32.xlu0 %v2683_v31  ;;  %v5005_v47 = vpop.f32.mrf.mxu0  ;;  %v2718_v37 = vadd.f32 1e-05, %v2714_v55  ;;  %v2731_v55 = vsub.s32 2, %v6065_v30 }
0x143d   : > { %v6841_v56 = vadd.f32 %v5543_v0, %v2672_v4 }
0x143e   : > { %5418 = vrsqrt.f32 %v2718_v37  ;;  %v6853_v37 = vld [vmem:[%s6175_s18] sm:$0x3f] }
0x143f   : > { %v2686_v58 = vsel %vm615_vm0, %v6841_v56, 0.0 }
0x1440   : > { %2687 = vadd.xlane.f32.xlu0 %v2686_v58 }
0x1444   : > { %2702 = vadd.xlane.f32.xlu0 %v2701_v44 }
0x14c5   : > { %v2685_v62 = vpop.xlane.xlu0 %2684 }
0x14c6   : > { %v2691_v46 = vmul.f32 0.03125, %v2685_v62  ;;  %v5419_v62 = vpop.eup %5418 }
0x14c8   : > { %v2695_v23 = vsub.f32 %v6834_v25, %v2691_v46  ;;  %v2726_v46 = vmul.f32 %v5419_v62, %v6811_v40  ;;  %v5309_v62 = vld [vmem:[%s6057_s28] sm:$0xff]  }
0x14c9   : > { %v2688_v41 = vpop.xlane.xlu0 %2687 }
0x14ca   : > { %v2692_v22 = vmul.f32 0.03125, %v2688_v41  ;;  %v2699_v4 = vmul.f32 %v2695_v23, %v2695_v23  ;;  %v6856_v41 = vrot.slane %v6853_v37, %v2731_v55  ;;  %v5308_v55 = vld [vmem:[%s6057_s28 + $0x8] sm:$0xff]  }
0x14cb   : > { %5006 = vmatprep.subr.bf16.mxu0 %v5308_v55 }
0x14cc   : > { %v2696_v31 = vsub.f32 %v6841_v56, %v2692_v22  ;;  %v2707_v47 = vsel %vm615_vm0, %v2699_v4, 0.0  ;;  %7418 = vst [vmem:[#allocation45_spill] sm:$0xff] %v6856_v41  ;;  %v2739_v22 = vsub.s32 3, %v6065_v30  ;;  %5007 = vmatpush3.bf16.msra.mxu0 %v5308_v55 }
0x14cd   : > { %2708 = vadd.xlane.f32.xlu0 %v2707_v47  ;;  %v2703_v0 = vpop.xlane.xlu0 %2702  ;;  %5008 = vmatprep.subr.bf16.mxu0 %v5309_v62 }
0x14ce   : > { %v2713_v58 = vmul.f32 0.03125, %v2703_v0  ;;  %v2700_v51 = vmul.f32 %v2696_v31, %v2696_v31  ;;  %v2734_v0 = vmul.f32 %v6856_v41, %v2726_v46 }
0x14d0   : > { %v2717_v44 = vadd.f32 1e-05, %v2713_v58  ;;  %v2710_v60 = vsel %vm615_vm0, %v2700_v51, 0.0  ;;  %v6861_v58 = vrot.slane %v6853_v37, %v2739_v22  ;;  %5009 = vmatpush3.bf16.msra.mxu0 %v5309_v62 }
0x14d1   : > { %2711 = vadd.xlane.f32.xlu1 %v2710_v60 }
0x14d2   : > { %5420 = vrsqrt.f32 %v2717_v44  ;;  %7419 = vst [vmem:[#allocation46_spill] sm:$0xff] %v6861_v58  ;;  %v2742_v40 = vadd.f32 %v6861_v58, %v2734_v0 }
0x14df   : > { %v5421_v4 = vpop.eup %5420 }
0x14e0   : > { %v2725_v47 = vmul.f32 %v5421_v4, %v2693_v61 }
0x14e2   : > { %v2733_v51 = vmul.f32 %v6856_v41, %v2725_v47 }
0x14e4   : > { %v2741_v44 = vadd.f32 %v6861_v58, %v2733_v51 }
0x14e6   : > { %v2745_v60 = vpack.c.bf16 %v2742_v40, %v2741_v44 }
0x14e8   : > { %5010 = vmatprep.mubr.msk.bf16.mxu0 %vm615_vm0, %v2745_v60 }
0x1556   : > { %v2709_v61 = vpop.xlane.xlu0 %2708 }
0x1557   : > { %v2715_v46 = vmul.f32 0.03125, %v2709_v61 }
0x1559   : > { %v2719_v4 = vadd.f32 1e-05, %v2715_v46 }
0x155a   : > { %v2712_v22 = vpop.xlane.xlu1 %2711 }
0x155b   : > { %5422 = vrsqrt.f32 %v2719_v4  ;;  %v2716_v47 = vmul.f32 0.03125, %v2712_v22  ;;  %v5310_v22 = vld [vmem:[%s5794_s26 + $0x18] sm:$0xff]  }
0x155c   : > { %5014 = vmatprep.subr.bf16.mxu0 %v5310_v22 }
0x155d   : > { %v2720_v51 = vadd.f32 1e-05, %v2716_v47  ;;  %v5311_v47 = vld [vmem:[%s5794_s26 + $0x10] sm:$0xff]  }
0x155f   : > { %5424 = vrsqrt.f32 %v2720_v51  ;;  %v4418_v51 = vld [vmem:[%s6883_s29] ss:$0 sm:$0xff] }
0x1568   : > { %v5423_v0 = vpop.eup %5422 }
0x1569   : > { %v2727_v44 = vmul.f32 %v5423_v0, %v2695_v23  ;;  %v5312_v23 = vld [vmem:[%s5794_s26 + $0x8] sm:$0xff]  }
0x156b   : > { %v2735_v55 = vmul.f32 %v6856_v41, %v2727_v44 }
0x156c   : > { %v5425_v40 = vpop.eup %5424 }
0x156d   : > { %v2728_v60 = vmul.f32 %v5425_v40, %v2696_v31  ;;  %v2743_v61 = vadd.f32 %v6861_v58, %v2735_v55  ;;  %v5313_v31 = vld [vmem:[%s5794_s26] sm:$0xff]  }
0x156f   : > { %v2736_v62 = vmul.f32 %v6856_v41, %v2728_v60 }
0x1571   : > { %v2744_v46 = vadd.f32 %v6861_v58, %v2736_v62 }
0x1573   : > { %v2746_v4 = vpack.c.bf16 %v2744_v46, %v2743_v61 }
0x1575   : > { %5011 = vmatmul.mubr.msk.bf16.vlgmr.msra.gmra.mxu0 %vm615_vm0, %v2746_v4 }
0x1576   : > { %5015 = vmatpush3.bf16.msra.mxu0 %v5310_v22 }
0x1577   : > { %5016 = vmatprep.subr.bf16.mxu0 %v5311_v47 }
0x157a   : > { %5017 = vmatpush3.bf16.msra.mxu0 %v5311_v47 }
0x157b   : > { %5018 = vmatprep.subr.bf16.mxu0 %v5312_v23 }
0x157e   : > { %5019 = vmatpush3.bf16.msra.mxu0 %v5312_v23 }
0x157f   : > { %5020 = vmatprep.subr.bf16.mxu0 %v5313_v31 }
0x1582   : > { %5021 = vmatpush3.bf16.msra.mxu0 %v5313_v31 }
0x1583   : > { %5046 = vmatprep.subr.bf16.mxu0 %v7394_v39 }
0x1635   : > { %v5012_v0 = vpop.f32.mrf.mxu0 }
0x1636   : > { %v2808_v44 = vadd.f32 %v5012_v0, %v4418_v51 }
0x1637   : > { %v2799_v40 = vpop.f32.mrf.mxu0 }
0x1638   : > { %v4477_v60 = vmul.f32 -1.442695, %v2808_v44  ;;  %v2800_v55 = vadd.f32 %v4418_v51, %v2799_v40 }
0x1639   : > { %v5013_v62 = vpop.f32.mrf.mxu0 }
0x163a   : > { %v4475_v61 = vmul.f32 -1.442695, %v2800_v55  ;;  %v2811_v46 = vadd.f32 %v5013_v62, %v4418_v51  ;;  %5426 = vpow2.f32 %v4477_v60 }
0x163b   : > { %v2802_v4 = vpop.f32.mrf.mxu0 }
0x163c   : > { %5428 = vpow2.f32 %v4475_v61  ;;  %v4478_v22 = vmul.f32 -1.442695, %v2811_v46  ;;  %v2803_v47 = vadd.f32 %v4418_v51, %v2802_v4 }
0x163e   : > { %5430 = vpow2.f32 %v4478_v22  ;;  %v4476_v23 = vmul.f32 -1.442695, %v2803_v47 }
0x1640   : > { %5432 = vpow2.f32 %v4476_v23 }
0x1647   : > { %v5427_v31 = vpop.eup %5426 }
0x1648   : > { %v2828_v10 = vadd.f32 1.0, %v5427_v31 }
0x1649   : > { %v5429_v58 = vpop.eup %5428 }
0x164a   : > { %v2826_v41 = vadd.f32 1.0, %v5429_v58 }
0x164b   : > { %v5431_v7 = vpop.eup %5430 }
0x164c   : > { %v2829_v0 = vadd.f32 1.0, %v5431_v7  ;;  %5434 = vrcp.f32 %v2826_v41 }
0x164d   : > { %v5433_v33 = vpop.eup %5432 }
0x164e   : > { %5436 = vrcp.f32 %v2829_v0  ;;  %v2827_v40 = vadd.f32 1.0, %v5433_v33 }
0x164f   : > { %5438 = vrcp.f32 %v2828_v10 }
0x1650   : > { %5440 = vrcp.f32 %v2827_v40 }
0x1659   : > { %v5435_v60 = vpop.eup %5434 }
0x165a   : > { %v2838_v4 = vmul.f32 %v5435_v60, %v2800_v55 }
0x165b   : > { %v5437_v62 = vpop.eup %5436 }
0x165c   : > { %v5439_v61 = vpop.eup %5438  ;;  %v2841_v51 = vmul.f32 %v5437_v62, %v2811_v46 }
0x165d   : > { %v5441_v6 = vpop.eup %5440  ;;  %v2840_v23 = vmul.f32 %v5439_v61, %v2808_v44 }
0x165e   : > { %v2839_v22 = vmul.f32 %v5441_v6, %v2803_v47  ;;  %v598_v6 = vsub.s32 5, %v6065_v30 }
0x165f   : > { %v2843_v18 = vpack.c.bf16 %v2841_v51, %v2840_v23 }
0x1660   : > { %v2842_v15 = vpack.c.bf16 %v2839_v22, %v2838_v4 }
0x1662   : > { %5022 = vmatprep.mubr.msk.bf16.mxu0 %vm1550_vm5, %v2842_v15 }
0x1663   : > { %5023 = vmatmul.mubr.msk.bf16.vlgmr.msra.gmra.mxu0 %vm1550_vm5, %v2843_v18  ;;  %v6900_v18 = vrot.slane %v6853_v37, %v598_v6 }
0x1664   : > { %5047 = vmatpush3.bf16.msra.mxu0 %v6275_v12  ;;  %5054 = vmatprep.mubr.msk.bf16.mxu0 %vm5631_vm2, %v7394_v39 }
0x1665   : > { %5048 = vmatprep.subr.bf16.mxu0 %v7394_v39 }
0x1668   : > { %5049 = vmatpush3.bf16.msra.mxu0 %v6282_v63 }
0x1669   : > { %5050 = vmatprep.subr.bf16.mxu0 %v7394_v39 }
0x166c   : > { %5051 = vmatpush3.bf16.msra.mxu0 %v6291_v32 }
0x166d   : > { %5052 = vmatprep.subr.bf16.mxu0 %v7394_v39 }
0x1670   : > { %5053 = vmatpush3.bf16.msra.mxu0 %v6303_v38 }
0x1671   : > { %5058 = vmatprep.subr.bf16.mxu0 %v7394_v39 }
0x1723   : > { %v5024_v12 = vpop.f32.mrf.mxu0 }
0x1724   : > { %v2925_v15 = vadd.f32 %v5024_v12, %v6834_v25 }
0x1725   : > { %v2908_v33 = vpop.f32.mrf.mxu0 }
0x1726   : > { %v2923_v63 = vadd.f32 %v2908_v33, %v6817_v21  ;;  %v6908_v38 = vadd.f32 %v2925_v15, %v6900_v18 }
0x1727   : > { %v5025_v10 = vpop.f32.mrf.mxu0 }
0x1728   : > { %v6905_v32 = vadd.f32 %v2923_v63, %v6900_v18  ;;  %v2926_v41 = vadd.f32 %v5025_v10, %v6841_v56  ;;  %v2937_v58 = vsel %vm615_vm0, %v6908_v38, 0.0 }
0x1729   : > { %v2911_v7 = vpop.f32.mrf.mxu0 }
0x172a   : > { %v2924_v30 = vadd.f32 %v2911_v7, %v6796_v2  ;;  %v2931_v37 = vsel %vm615_vm0, %v6905_v32, 0.0  ;;  %v6918_v21 = vadd.f32 %v2926_v41, %v6900_v18 }
0x172b   : > { %2932 = vadd.xlane.f32.xlu0 %v2931_v37 }
0x172c   : > { %v6915_v25 = vadd.f32 %v2924_v30, %v6900_v18  ;;  %v2940_v2 = vsel %vm615_vm0, %v6918_v21, 0.0 }
0x172e   : > { %v2934_v44 = vsel %vm615_vm0, %v6915_v25, 0.0 }
0x172f   : > { %2938 = vadd.xlane.f32.xlu0 %v2937_v58  ;;  %2935 = vadd.xlane.f32.xlu1 %v2934_v44 }
0x1733   : > { %2941 = vadd.xlane.f32.xlu1 %v2940_v2 }
0x17b4   : > { %v2933_v56 = vpop.xlane.xlu0 %2932 }
0x17b5   : > { %v2943_v55 = vmul.f32 0.03125, %v2933_v56 }
0x17b7   : > { %v2947_v46 = vsub.f32 %v6905_v32, %v2943_v55 }
0x17b8   : > { %v2939_v47 = vpop.xlane.xlu0 %2938  ;;  %v2936_v31 = vpop.xlane.xlu1 %2935 }
0x17b9   : > { %v2945_v0 = vmul.f32 0.03125, %v2939_v47  ;;  %v2944_v40 = vmul.f32 0.03125, %v2936_v31  ;;  %v2951_v60 = vmul.f32 %v2947_v46, %v2947_v46 }
0x17bb   : > { %v2949_v62 = vsub.f32 %v6908_v38, %v2945_v0  ;;  %v2948_v61 = vsub.f32 %v6915_v25, %v2944_v40  ;;  %v2955_v51 = vsel %vm615_vm0, %v2951_v60, 0.0 }
0x17bc   : > { %2956 = vadd.xlane.f32.xlu0 %v2955_v51  ;;  %v2942_v4 = vpop.xlane.xlu1 %2941 }
0x17bd   : > { %v2946_v22 = vmul.f32 0.03125, %v2942_v4  ;;  %v2953_v23 = vmul.f32 %v2949_v62, %v2949_v62  ;;  %v2952_v6 = vmul.f32 %v2948_v61, %v2948_v61 }
0x17bf   : > { %v2950_v12 = vsub.f32 %v6918_v21, %v2946_v22  ;;  %v2961_v33 = vsel %vm615_vm0, %v2953_v23, 0.0  ;;  %v2958_v15 = vsel %vm615_vm0, %v2952_v6, 0.0 }
0x17c0   : > { %2962 = vadd.xlane.f32.xlu0 %v2961_v33  ;;  %2959 = vadd.xlane.f32.xlu1 %v2958_v15 }
0x17c1   : > { %v2954_v63 = vmul.f32 %v2950_v12, %v2950_v12 }
0x17c3   : > { %v2964_v10 = vsel %vm615_vm0, %v2954_v63, 0.0 }
0x17c4   : > { %2965 = vadd.xlane.f32.xlu1 %v2964_v10 }
0x1845   : > { %v2957_v7 = vpop.xlane.xlu0 %2956 }
0x1846   : > { %v2967_v41 = vmul.f32 0.03125, %v2957_v7 }
0x1848   : > { %v2971_v30 = vadd.f32 1e-05, %v2967_v41 }
0x1849   : > { %v2963_v37 = vpop.xlane.xlu0 %2962  ;;  %v2960_v58 = vpop.xlane.xlu1 %2959 }
0x184a   : > { %5442 = vrsqrt.f32 %v2971_v30  ;;  %v2969_v44 = vmul.f32 0.03125, %v2963_v37  ;;  %v2968_v2 = vmul.f32 0.03125, %v2960_v58 }
0x184c   : > { %v2973_v56 = vadd.f32 1e-05, %v2969_v44  ;;  %v2972_v55 = vadd.f32 1e-05, %v2968_v2 }
0x184d   : > { %v2966_v47 = vpop.xlane.xlu1 %2965 }
0x184e   : > { %5444 = vrsqrt.f32 %v2973_v56  ;;  %v2970_v31 = vmul.f32 0.03125, %v2966_v47 }
0x184f   : > { %5446 = vrsqrt.f32 %v2972_v55 }
0x1850   : > { %v2974_v0 = vadd.f32 1e-05, %v2970_v31 }
0x1852   : > { %5448 = vrsqrt.f32 %v2974_v0 }
0x1857   : > { %v5443_v40 = vpop.eup %5442 }
0x1858   : > { %v2979_v60 = vmul.f32 %v5443_v40, %v2947_v46 }
0x185a   : > { %v2983_v6 = vmul.f32 %v2979_v60, %v6188_v8 }
0x185b   : > { %v5445_v51 = vpop.eup %5444 }
0x185c   : > { %v5447_v4 = vpop.eup %5446  ;;  %v2981_v22 = vmul.f32 %v5445_v51, %v2949_v62  ;;  %v2987_v7 = vadd.f32 %v2983_v6, %v6201_v45 }
0x185d   : > { %v2980_v23 = vmul.f32 %v5447_v4, %v2948_v61 }
0x185e   : > { %v2985_v10 = vmul.f32 %v2981_v22, %v6188_v8 }
0x185f   : > { %v5449_v33 = vpop.eup %5448  ;;  %v2984_v15 = vmul.f32 %v2980_v23, %v6188_v8 }
0x1860   : > { %v2982_v63 = vmul.f32 %v5449_v33, %v2950_v12  ;;  %v2989_v46 = vadd.f32 %v2985_v10, %v6201_v45 }
0x1861   : > { %v2988_v41 = vadd.f32 %v2984_v15, %v6201_v45 }
0x1862   : > { %v2986_v30 = vmul.f32 %v2982_v63, %v6188_v8 }
0x1863   : > { %v2991_v37 = vpack.c.bf16 %v2988_v41, %v2987_v7 }
0x1864   : > { %v2990_v62 = vadd.f32 %v2986_v30, %v6201_v45 }
0x1865   : > { %5030 = vmatprep.mubr.msk.bf16.mxu1 %vm615_vm0, %v2991_v37 }
0x1866   : > { %v2992_v61 = vpack.c.bf16 %v2990_v62, %v2989_v46 }
0x1868   : > { %5031 = vmatmul.mubr.msk.bf16.vlgmr.msra.gmra.mxu1 %vm615_vm0, %v2992_v61 }
0x1869   : > { %5035 = vmatpush3.bf16.xpose.msra.mxu1 %v6231_v1  ;;  %5042 = vmatprep.mubr.msk.bf16.mxu1 %vm5631_vm2, %v7394_v39 }
0x186a   : > { %5036 = vmatprep.subr.bf16.mxu1 %v7394_v39 }
0x1871   : > { %5037 = vmatpush3.bf16.xpose.msra.mxu1 %v6239_v19 }
0x1872   : > { %5038 = vmatprep.subr.bf16.mxu1 %v7394_v39 }
0x1879   : > { %5039 = vmatpush3.bf16.xpose.msra.mxu1 %v6251_v26 }
0x187a   : > { %5040 = vmatprep.subr.bf16.mxu1 %v7394_v39 }
0x1881   : > { %5041 = vmatpush3.bf16.xpose.msra.mxu1 %v6259_v27 }
0x1882   : > { %5070 = vmatprep.subr.bf16.mxu1 %v7394_v39 }
0x1928   : > { %v5032_v8 = vpop.f32.mrf.mxu1 }
0x1929   : > { %v3042_v12 = vadd.f32 %v5032_v8, %v6263_v24 }
0x192a   : > { %v3033_v45 = vpop.f32.mrf.mxu1 }
0x192b   : > { %v3034_v19 = vadd.f32 %v3033_v45, %v6267_v48 }
0x192c   : > { %v5033_v1 = vpop.f32.mrf.mxu1 }
0x192d   : > { %v3045_v58 = vadd.f32 %v5033_v1, %v6271_v35 }
0x192e   : > { %v3036_v44 = vpop.f32.mrf.mxu1 }
0x192f   : > { %v6957_v2 = vpack.c.bf16 %v3045_v58, %v3042_v12  ;;  %v3037_v26 = vadd.f32 %v3036_v44, %v6273_v52 }
0x1931   : > { %v6960_v56 = vpack.c.bf16 %v3037_v26, %v3034_v19 }
0x1933   : > { %5043 = vmatmul.mubr.msk.bf16.vlgmr.msra.gmra.mxu1 %vm1489_vm3, %v6960_v56 }
0x1934   : > { %5071 = vmatpush3.bf16.msra.mxu1 %v6379_v59  ;;  %5078 = vmatprep.mubr.msk.bf16.mxu1 %vm5631_vm2, %v7394_v39 }
0x1935   : > { %5072 = vmatprep.subr.bf16.mxu1 %v7394_v39 }
0x1938   : > { %5073 = vmatpush3.bf16.msra.mxu1 %v6393_v9 }
0x1939   : > { %5074 = vmatprep.subr.bf16.mxu1 %v7394_v39 }
0x193c   : > { %5075 = vmatpush3.bf16.msra.mxu1 %v6391_v34 }
0x193d   : > { %5076 = vmatprep.subr.bf16.mxu1 %v7394_v39 }
0x1940   : > { %5077 = vmatpush3.bf16.msra.mxu1 %v6398_v42 }
0x1941   : > { %5082 = vmatprep.subr.bf16.mxu1 %v7394_v39 }
0x19f3   : > { %v3087_v27 = vpop.f32.mrf.mxu1 }
0x19f4   : > { %v3094_v24 = vmul.f32 0.35355338, %v3087_v27 }
0x19f5   : > { %v5044_v48 = vpop.f32.mrf.mxu1 }
0x19f6   : > { %v3096_v35 = vadd.f32 %v3094_v24, %v6315_v13 }
0x19f7   : > { %v3090_v52 = vpop.f32.mrf.mxu1 }
0x19f8   : > { %v3095_v59 = vmul.f32 0.35355338, %v3090_v52  ;;  %v3098_v55 = vsel %vm1550_vm5, %v3096_v35, -inf }
0x19f9   : > { %3099 = vmax.xlane.f32.xlu0 %v3098_v55  ;;  %v5045_v9 = vpop.f32.mrf.mxu1 }
0x19fa   : > { %v3097_v47 = vadd.f32 %v3095_v59, %v6315_v13 }
0x19fc   : > { %v3101_v34 = vsel %vm1550_vm5, %v3097_v47, -inf }
0x19fd   : > { %3102 = vmax.xlane.f32.xlu1 %v3101_v34 }
0x1a82   : > { %v3100_v31 = vpop.xlane.xlu0 %3099 }
0x1a83   : > { %v3104_v42 = vsub.f32 %v3096_v35, %v3100_v31 }
0x1a85   : > { %v3106_v0 = vmul.f32 1.442695, %v3104_v42 }
0x1a86   : > { %v3103_v40 = vpop.xlane.xlu1 %3102 }
0x1a87   : > { %5450 = vpow2.f32 %v3106_v0  ;;  %v3105_v60 = vsub.f32 %v3097_v47, %v3103_v40 }
0x1a89   : > { %v3108_v51 = vmul.f32 1.442695, %v3105_v60 }
0x1a8b   : > { %5452 = vpow2.f32 %v3108_v51 }
0x1a94   : > { %v5451_v4 = vpop.eup %5450 }
0x1a95   : > { %v3110_v22 = vsel %vm1550_vm5, %v5451_v4, 0.0 }
0x1a96   : > { %3111 = vadd.xlane.f32.xlu0 %v3110_v22 }
0x1a98   : > { %v5453_v23 = vpop.eup %5452 }
0x1a99   : > { %v3113_v6 = vsel %vm1550_vm5, %v5453_v23, 0.0 }
0x1a9a   : > { %3114 = vadd.xlane.f32.xlu1 %v3113_v6 }
0x1aac   : > { %3168 = vrot.lane.b32.xlu0 %v6960_v56, %s5633_s20 }
0x1b1f   : > { %v3112_v33 = vpop.xlane.xlu0 %3111 }
0x1b20   : > { %5454 = vrcp.f32 %v3112_v33 }
0x1b23   : > { %v3115_v15 = vpop.xlane.xlu1 %3114  ;;  %v3169_v37 = vpop.permute.xlu0 %3168 }
0x1b24   : > { %5456 = vrcp.f32 %v3115_v15 }
0x1b2d   : > { %v5455_v63 = vpop.eup %5454 }
0x1b2e   : > { %v3118_v7 = vmul.f32 %v5455_v63, %v5451_v4 }
0x1b31   : > { %v5457_v10 = vpop.eup %5456 }
0x1b32   : > { %v3119_v41 = vmul.f32 %v5457_v10, %v5453_v23 }
0x1b34   : > { %v3120_v30 = vpack.c.bf16 %v3119_v41, %v3118_v7 }
0x1b36   : > { %5055 = vmatmul.mubr.msk.bf16.vlgmr.msra.gmra.mxu0 %vm1550_vm5, %v3120_v30 }
0x1b37   : > { %5059 = vmatpush3.bf16.xpose.msra.mxu0 %v6334_v11  ;;  %5066 = vmatprep.mubr.msk.bf16.mxu0 %vm5631_vm2, %v7394_v39 }
0x1b38   : > { %5060 = vmatprep.subr.bf16.mxu0 %v7394_v39 }
0x1b3f   : > { %5061 = vmatpush3.bf16.xpose.msra.mxu0 %v6342_v16 }
0x1b40   : > { %5062 = vmatprep.subr.bf16.mxu0 %v7394_v39 }
0x1b47   : > { %5063 = vmatpush3.bf16.xpose.msra.mxu0 %v6347_v28 }
0x1b48   : > { %5064 = vmatprep.subr.bf16.mxu0 %v7394_v39 }
0x1b4f   : > { %5065 = vmatpush3.bf16.xpose.msra.mxu0 %v6352_v29 }
0x1b50   : > { %5094 = vmatprep.subr.bf16.mxu0 %v7394_v39 }
0x1b56   : > { %5067 = vmatmul.mubr.msk.bf16.vlgmr.msra.gmra.mxu0 %vm1489_vm3, %v3169_v37 }
0x1b57   : > { %5095 = vmatpush3.bf16.msra.mxu0 %v6457_v5  ;;  %5102 = vmatprep.mubr.msk.bf16.mxu0 %vm5631_vm2, %v7394_v39 }
0x1b58   : > { %5096 = vmatprep.subr.bf16.mxu0 %v7394_v39 }
0x1b5b   : > { %5097 = vmatpush3.bf16.msra.mxu0 %v6461_v49 }
0x1b5c   : > { %5098 = vmatprep.subr.bf16.mxu0 %v7394_v39 }
0x1b5f   : > { %5099 = vmatpush3.bf16.msra.mxu0 %v6465_v36 }
0x1b60   : > { %5100 = vmatprep.subr.bf16.mxu0 %v7394_v39 }
0x1b63   : > { %5101 = vmatpush3.bf16.msra.mxu0 %v6469_v43 }
0x1b64   : > { %5106 = vmatprep.subr.bf16.mxu0 %v7394_v39 }
0x1bf6   : > { %v3158_v11 = vpop.f32.mrf.mxu0 }
0x1bf8   : > { %v5056_v16 = vpop.f32.mrf.mxu0 }
0x1bfa   : > { %v7004_v28 = vpop.f32.mrf.mxu0 }
0x1bfb   : > { %v3166_v40 = vadd.f32 %v7004_v28, %v6431_v50 }
0x1bfc   : > { %v5057_v29 = vpop.f32.mrf.mxu0 }
0x1c16   : > { %v3207_v5 = vpop.f32.mrf.mxu0 }
0x1c17   : > { %v3214_v46 = vmul.f32 0.35355338, %v3207_v5 }
0x1c18   : > { %v5068_v62 = vpop.f32.mrf.mxu0 }
0x1c19   : > { %v3216_v49 = vadd.f32 %v3214_v46, %v6315_v13 }
0x1c1a   : > { %v3210_v61 = vpop.f32.mrf.mxu0 }
0x1c1b   : > { %v3215_v8 = vmul.f32 0.35355338, %v3210_v61  ;;  %v3218_v36 = vsel %vm1550_vm5, %v3216_v49, -inf }
0x1c1c   : > { %3219 = vmax.xlane.f32.xlu1 %v3218_v36  ;;  %v5069_v45 = vpop.f32.mrf.mxu0 }
0x1c1d   : > { %v3217_v43 = vadd.f32 %v3215_v8, %v6315_v13 }
0x1c1f   : > { %v3221_v1 = vsel %vm1550_vm5, %v3217_v43, -inf }
0x1c20   : > { %3222 = vmax.xlane.f32.xlu1 %v3221_v1 }
0x1ca5   : > { %v3220_v12 = vpop.xlane.xlu1 %3219 }
0x1ca6   : > { %v3224_v58 = vsub.f32 %v3216_v49, %v3220_v12  ;;  %v7421_v12 = vld [vmem:[#allocation11_spill] sm:$0xff] }
0x1ca8   : > { %v3226_v44 = vmul.f32 1.442695, %v3224_v58  ;;  %v7422_v58 = vld [vmem:[#allocation12_spill] sm:$0xff] }
0x1ca9   : > { %v3223_v19 = vpop.xlane.xlu1 %3222 }
0x1caa   : > { %5458 = vpow2.f32 %v3226_v44  ;;  %v3225_v26 = vsub.f32 %v3217_v43, %v3223_v19  ;;  %v7424_v44 = vld [vmem:[#allocation14_spill] sm:$0xff] }
0x1cac   : > { %v3228_v27 = vmul.f32 1.442695, %v3225_v26  ;;  %v7425_v26 = vld [vmem:[#allocation10_spill] sm:$0xff] }
0x1cae   : > { %5460 = vpow2.f32 %v3228_v27  ;;  %v7426_v27 = vld [vmem:[#allocation15_spill] sm:$0xff] }
0x1cb7   : > { %v5459_v24 = vpop.eup %5458 }
0x1cb8   : > { %v3230_v48 = vsel %vm1550_vm5, %v5459_v24, 0.0 }
0x1cb9   : > { %3231 = vadd.xlane.f32.xlu1 %v3230_v48  ;;  %v7428_v48 = vld [vmem:[#allocation9_spill] sm:$0xff] }
0x1cbb   : > { %v5461_v35 = vpop.eup %5460 }
0x1cbc   : > { %v3233_v52 = vsel %vm1550_vm5, %v5461_v35, 0.0 }
0x1cbd   : > { %3234 = vadd.xlane.f32.xlu1 %v3233_v52 }
0x1cce   : > { %3287 = vrot.lane.b32.xlu1 %v6960_v56, %s5634_s17 }
0x1d42   : > { %v3232_v59 = vpop.xlane.xlu1 %3231 }
0x1d43   : > { %5462 = vrcp.f32 %v3232_v59 }
0x1d46   : > { %v3235_v55 = vpop.xlane.xlu1 %3234 }
0x1d47   : > { %5464 = vrcp.f32 %v3235_v55 }
0x1d4a   : > { %v3288_v0 = vpop.permute.xlu1 %3287 }
0x1d50   : > { %v5463_v9 = vpop.eup %5462 }
0x1d51   : > { %v3238_v34 = vmul.f32 %v5463_v9, %v5459_v24  ;;  %v7427_v24 = vld [vmem:[#allocation8_spill] sm:$0xff] }
0x1d54   : > { %v5465_v47 = vpop.eup %5464 }
0x1d55   : > { %v3239_v31 = vmul.f32 %v5465_v47, %v5461_v35 }
0x1d57   : > { %v3240_v42 = vpack.c.bf16 %v3239_v31, %v3238_v34 }
0x1d59   : > { %5079 = vmatmul.mubr.msk.bf16.vlgmr.msra.gmra.mxu1 %vm1550_vm5, %v3240_v42 }
0x1d5a   : > { %5083 = vmatpush3.bf16.xpose.msra.mxu1 %v6404_v54  ;;  %5090 = vmatprep.mubr.msk.bf16.mxu1 %vm5631_vm2, %v7394_v39  ;;  %v7420_v54 = vld [vmem:[#allocation16_spill] sm:$0xff] }
0x1d5b   : > { %5084 = vmatprep.subr.bf16.mxu1 %v7394_v39 }
0x1d62   : > { %5085 = vmatpush3.bf16.xpose.msra.mxu1 %v6412_v3  ;;  %v3165_v3 = vadd.f32 %v3158_v11, %v6431_v50 }
0x1d63   : > { %5086 = vmatprep.subr.bf16.mxu1 %v7394_v39 }
0x1d6a   : > { %5087 = vmatpush3.bf16.xpose.msra.mxu1 %v6417_v57 }
0x1d6b   : > { %5088 = vmatprep.subr.bf16.mxu1 %v7394_v39 }
0x1d72   : > { %5089 = vmatpush3.bf16.xpose.msra.mxu1 %v6422_v20 }
0x1d73   : > { %5118 = vmatprep.subr.bf16.mxu1 %v7394_v39 }
0x1d79   : > { %5091 = vmatmul.mubr.msk.bf16.vlgmr.msra.gmra.mxu1 %vm1489_vm3, %v3288_v0 }
0x1d7a   : > { %5119 = vmatpush3.bf16.msra.mxu1 %v6535_v14  ;;  %5126 = vmatprep.mubr.msk.bf16.mxu1 %vm5631_vm2, %v7394_v39 }
0x1d7b   : > { %5120 = vmatprep.subr.bf16.mxu1 %v7394_v39 }
0x1d7e   : > { %5121 = vmatpush3.bf16.msra.mxu1 %v6543_v17 }
0x1d7f   : > { %5122 = vmatprep.subr.bf16.mxu1 %v7394_v39 }
0x1d82   : > { %5123 = vmatpush3.bf16.msra.mxu1 %v6546_v53 }
0x1d83   : > { %5124 = vmatprep.subr.bf16.mxu1 %v7394_v39 }
0x1d86   : > { %5125 = vmatpush3.bf16.msra.mxu1 %v7420_v54 }
0x1d87   : > { %5130 = vmatprep.subr.bf16.mxu1 %v7394_v39 }
0x1e19   : > { %v3278_v57 = vpop.f32.mrf.mxu1 }
0x1e1a   : > { %v7037_v20 = vadd.f32 %v3278_v57, %v3165_v3 }
0x1e1b   : > { %v5080_v14 = vpop.f32.mrf.mxu1 }
0x1e1d   : > { %v3281_v17 = vpop.f32.mrf.mxu1 }
0x1e1e   : > { %v7041_v60 = vadd.f32 %v3281_v17, %v3166_v40 }
0x1e1f   : > { %v5081_v51 = vpop.f32.mrf.mxu1 }
0x1e39   : > { %v3326_v53 = vpop.f32.mrf.mxu1 }
0x1e3a   : > { %v3333_v4 = vmul.f32 0.35355338, %v3326_v53 }
0x1e3b   : > { %v5092_v22 = vpop.f32.mrf.mxu1 }
0x1e3c   : > { %v3335_v23 = vadd.f32 %v3333_v4, %v6315_v13 }
0x1e3d   : > { %v3329_v6 = vpop.f32.mrf.mxu1 }
0x1e3e   : > { %v3334_v33 = vmul.f32 0.35355338, %v3329_v6  ;;  %v3337_v15 = vsel %vm1550_vm5, %v3335_v23, -inf }
0x1e3f   : > { %3338 = vmax.xlane.f32.xlu0 %v3337_v15  ;;  %v5093_v63 = vpop.f32.mrf.mxu1 }
0x1e40   : > { %v3336_v10 = vadd.f32 %v3334_v33, %v6315_v13 }
0x1e42   : > { %v3340_v7 = vsel %vm1550_vm5, %v3336_v10, -inf }
0x1e43   : > { %3341 = vmax.xlane.f32.xlu1 %v3340_v7 }
0x1ec8   : > { %v3339_v41 = vpop.xlane.xlu0 %3338 }
0x1ec9   : > { %v3343_v30 = vsub.f32 %v3335_v23, %v3339_v41 }
0x1ecb   : > { %v3345_v37 = vmul.f32 1.442695, %v3343_v30 }
0x1ecc   : > { %v3342_v11 = vpop.xlane.xlu1 %3341 }
0x1ecd   : > { %5466 = vpow2.f32 %v3345_v37  ;;  %v3344_v16 = vsub.f32 %v3336_v10, %v3342_v11 }
0x1ecf   : > { %v3347_v28 = vmul.f32 1.442695, %v3344_v16  ;;  %v7429_v16 = vld [vmem:[#allocation17_spill] sm:$0xff] }
0x1ed1   : > { %5468 = vpow2.f32 %v3347_v28  ;;  %v7430_v28 = vld [vmem:[#allocation18_spill] sm:$0xff] }
0x1eda   : > { %v5467_v29 = vpop.eup %5466 }
0x1edb   : > { %v3349_v5 = vsel %vm1550_vm5, %v5467_v29, 0.0 }
0x1edc   : > { %3350 = vadd.xlane.f32.xlu0 %v3349_v5  ;;  %v7432_v5 = vld [vmem:[#allocation20_spill] sm:$0xff] }
0x1ede   : > { %v5469_v46 = vpop.eup %5468 }
0x1edf   : > { %v3352_v62 = vsel %vm1550_vm5, %v5469_v46, 0.0 }
0x1ee0   : > { %3353 = vadd.xlane.f32.xlu0 %v3352_v62  ;;  %v7434_v62 = vld [vmem:[#allocation26_spill] sm:$0xff] }
0x1ef6   : > { %3406 = vrot.lane.b32.xlu0 %v6960_v56, %s5636_s16  ;;  %v7423_v56 = vld [vmem:[#allocation13_spill] sm:$0xff] }
0x1f65   : > { %v3351_v49 = vpop.xlane.xlu0 %3350 }
0x1f66   : > { %5470 = vrcp.f32 %v3351_v49  ;;  %v7435_v49 = vld [vmem:[#allocation27_spill] sm:$0xff] }
0x1f69   : > { %v3354_v61 = vpop.xlane.xlu0 %3353 }
0x1f6a   : > { %5472 = vrcp.f32 %v3354_v61  ;;  %v7436_v61 = vld [vmem:[#allocation28_spill] sm:$0xff] }
0x1f6d   : > { %v3407_v19 = vpop.permute.xlu0 %3406 }
0x1f73   : > { %v5471_v8 = vpop.eup %5470 }
0x1f74   : > { %v3357_v45 = vmul.f32 %v5471_v8, %v5467_v29  ;;  %v7431_v29 = vld [vmem:[#allocation19_spill] sm:$0xff] }
0x1f77   : > { %v5473_v36 = vpop.eup %5472 }
0x1f78   : > { %v3358_v43 = vmul.f32 %v5473_v36, %v5469_v46  ;;  %v7433_v46 = vld [vmem:[#allocation25_spill] sm:$0xff] }
0x1f7a   : > { %v3359_v1 = vpack.c.bf16 %v3358_v43, %v3357_v45 }
0x1f7c   : > { %5103 = vmatmul.mubr.msk.bf16.vlgmr.msra.gmra.mxu0 %vm1550_vm5, %v3359_v1 }
0x1f7d   : > { %5107 = vmatpush3.bf16.xpose.msra.mxu0 %v7421_v12  ;;  %5114 = vmatprep.mubr.msk.bf16.mxu0 %vm5631_vm2, %v7394_v39 }
0x1f7e   : > { %5108 = vmatprep.subr.bf16.mxu0 %v7394_v39 }
0x1f85   : > { %5109 = vmatpush3.bf16.xpose.msra.mxu0 %v7422_v58 }
0x1f86   : > { %5110 = vmatprep.subr.bf16.mxu0 %v7394_v39 }
0x1f8d   : > { %5111 = vmatpush3.bf16.xpose.msra.mxu0 %v7423_v56 }
0x1f8e   : > { %5112 = vmatprep.subr.bf16.mxu0 %v7394_v39 }
0x1f95   : > { %5113 = vmatpush3.bf16.xpose.msra.mxu0 %v7424_v44 }
0x1f96   : > { %5142 = vmatprep.subr.bf16.mxu0 %v7394_v39 }
0x1f9c   : > { %5115 = vmatmul.mubr.msk.bf16.vlgmr.msra.gmra.mxu0 %vm1489_vm3, %v3407_v19 }
0x1f9d   : > { %5143 = vmatpush3.bf16.msra.mxu0 %v7425_v26  ;;  %5150 = vmatprep.mubr.msk.bf16.mxu0 %vm5631_vm2, %v7394_v39 }
0x1f9e   : > { %5144 = vmatprep.subr.bf16.mxu0 %v7394_v39 }
0x1fa1   : > { %5145 = vmatpush3.bf16.msra.mxu0 %v7426_v27 }
0x1fa2   : > { %5146 = vmatprep.subr.bf16.mxu0 %v7394_v39 }
0x1fa5   : > { %5147 = vmatpush3.bf16.msra.mxu0 %v7427_v24 }
0x1fa6   : > { %5148 = vmatprep.subr.bf16.mxu0 %v7394_v39 }
0x1fa9   : > { %5149 = vmatpush3.bf16.msra.mxu0 %v7428_v48 }
0x1faa   : > { %5154 = vmatprep.subr.bf16.mxu0 %v7394_v39 }
0x203c   : > { %v3397_v35 = vpop.f32.mrf.mxu0 }
0x203d   : > { %v3404_v52 = vadd.f32 %v3397_v35, %v7037_v20 }
0x203e   : > { %v5104_v59 = vpop.f32.mrf.mxu0 }
0x2040   : > { %v3400_v55 = vpop.f32.mrf.mxu0 }
0x2041   : > { %v3405_v9 = vadd.f32 %v3400_v55, %v7041_v60 }
0x2042   : > { %v5105_v47 = vpop.f32.mrf.mxu0 }
0x205c   : > { %v3445_v34 = vpop.f32.mrf.mxu0 }
0x205d   : > { %v3452_v31 = vmul.f32 0.35355338, %v3445_v34 }
0x205e   : > { %v5116_v42 = vpop.f32.mrf.mxu0 }
0x205f   : > { %v3454_v0 = vadd.f32 %v3452_v31, %v6315_v13 }
0x2060   : > { %v3448_v54 = vpop.f32.mrf.mxu0 }
0x2061   : > { %v3453_v3 = vmul.f32 0.35355338, %v3448_v54  ;;  %v3456_v57 = vsel %vm1550_vm5, %v3454_v0, -inf }
0x2062   : > { %3457 = vmax.xlane.f32.xlu1 %v3456_v57  ;;  %v5117_v14 = vpop.f32.mrf.mxu0 }
0x2063   : > { %v3455_v40 = vadd.f32 %v3453_v3, %v6315_v13 }
0x2065   : > { %v3459_v20 = vsel %vm1550_vm5, %v3455_v40, -inf }
0x2066   : > { %3460 = vmax.xlane.f32.xlu1 %v3459_v20 }
0x20eb   : > { %v3458_v17 = vpop.xlane.xlu1 %3457 }
0x20ec   : > { %v3462_v51 = vsub.f32 %v3454_v0, %v3458_v17 }
0x20ee   : > { %v3464_v60 = vmul.f32 1.442695, %v3462_v51 }
0x20ef   : > { %v3461_v53 = vpop.xlane.xlu1 %3460 }
0x20f0   : > { %5474 = vpow2.f32 %v3464_v60  ;;  %v3463_v4 = vsub.f32 %v3455_v40, %v3461_v53  ;;  %v7437_v53 = vld [vmem:[#allocation21_spill] sm:$0xff] }
0x20f2   : > { %v3466_v22 = vmul.f32 1.442695, %v3463_v4  ;;  %v7438_v4 = vld [vmem:[#allocation22_spill] sm:$0xff] }
0x20f4   : > { %5476 = vpow2.f32 %v3466_v22  ;;  %v7439_v22 = vld [vmem:[#allocation23_spill] sm:$0xff] }
0x20fd   : > { %v5475_v23 = vpop.eup %5474 }
0x20fe   : > { %v3468_v6 = vsel %vm1550_vm5, %v5475_v23, 0.0 }
0x20ff   : > { %3469 = vadd.xlane.f32.xlu1 %v3468_v6 }
0x2101   : > { %v5477_v33 = vpop.eup %5476 }
0x2102   : > { %v3471_v15 = vsel %vm1550_vm5, %v5477_v33, 0.0 }
0x2103   : > { %3472 = vadd.xlane.f32.xlu1 %v3471_v15  ;;  %v7442_v15 = vld [vmem:[#allocation35_spill] sm:$0xff] }
0x2188   : > { %v3470_v63 = vpop.xlane.xlu1 %3469 }
0x2189   : > { %5478 = vrcp.f32 %v3470_v63  ;;  %v7443_v63 = vld [vmem:[#allocation34_spill] sm:$0xff] }
0x218c   : > { %v3473_v10 = vpop.xlane.xlu1 %3472 }
0x218d   : > { %5480 = vrcp.f32 %v3473_v10  ;;  %v7444_v10 = vld [vmem:[#allocation36_spill] sm:$0xff] }
0x2196   : > { %v5479_v7 = vpop.eup %5478 }
0x2197   : > { %v3476_v30 = vmul.f32 %v5479_v7, %v5475_v23  ;;  %v7440_v23 = vld [vmem:[#allocation24_spill] sm:$0xff] }
0x219a   : > { %v5481_v41 = vpop.eup %5480 }
0x219b   : > { %v3477_v37 = vmul.f32 %v5481_v41, %v5477_v33  ;;  %v7441_v33 = vld [vmem:[#allocation33_spill] sm:$0xff] }
0x219d   : > { %v3478_v11 = vpack.c.bf16 %v3477_v37, %v3476_v30 }
0x219f   : > { %5127 = vmatmul.mubr.msk.bf16.vlgmr.msra.gmra.mxu1 %vm1550_vm5, %v3478_v11 }
0x21a0   : > { %5131 = vmatpush3.bf16.xpose.msra.mxu1 %v7429_v16  ;;  %5138 = vmatprep.mubr.msk.bf16.mxu1 %vm5631_vm2, %v7394_v39 }
0x21a1   : > { %5132 = vmatprep.subr.bf16.mxu1 %v7394_v39 }
0x21a8   : > { %5133 = vmatpush3.bf16.xpose.msra.mxu1 %v7430_v28 }
0x21a9   : > { %5134 = vmatprep.subr.bf16.mxu1 %v7394_v39 }
0x21b0   : > { %5135 = vmatpush3.bf16.xpose.msra.mxu1 %v7431_v29 }
0x21b1   : > { %5136 = vmatprep.subr.bf16.mxu1 %v7394_v39 }
0x21b8   : > { %5137 = vmatpush3.bf16.xpose.msra.mxu1 %v7432_v5 }
0x21b9   : > { %5166 = vmatprep.subr.bf16.mxu1 %v7394_v39 }
0x21bf   : > { %5139 = vmatmul.mubr.msk.bf16.vlgmr.msra.gmra.mxu1 %vm1489_vm3, %v6957_v2 }
0x21c0   : > { %5167 = vmatpush3.bf16.msra.mxu1 %v7433_v46  ;;  %5174 = vmatprep.mubr.msk.bf16.mxu1 %vm5631_vm2, %v7394_v39 }
0x21c1   : > { %5168 = vmatprep.subr.bf16.mxu1 %v7394_v39 }
0x21c4   : > { %5169 = vmatpush3.bf16.msra.mxu1 %v7434_v62 }
0x21c5   : > { %5170 = vmatprep.subr.bf16.mxu1 %v7394_v39 }
0x21c8   : > { %5171 = vmatpush3.bf16.msra.mxu1 %v7435_v49 }
0x21c9   : > { %5172 = vmatprep.subr.bf16.mxu1 %v7394_v39 }
0x21cc   : > { %5173 = vmatpush3.bf16.msra.mxu1 %v7436_v61 }
0x21cd   : > { %5178 = vmatprep.subr.bf16.mxu1 %v7394_v39 }
0x225f   : > { %v3516_v8 = vpop.f32.mrf.mxu1 }
0x2260   : > { %v7104_v36 = vadd.f32 %v3516_v8, %v3404_v52 }
0x2261   : > { %v5128_v45 = vpop.f32.mrf.mxu1 }
0x2263   : > { %v3519_v43 = vpop.f32.mrf.mxu1 }
0x2264   : > { %v7106_v1 = vadd.f32 %v3519_v43, %v3405_v9 }
0x2265   : > { %v5129_v12 = vpop.f32.mrf.mxu1 }
0x227f   : > { %v3562_v58 = vpop.f32.mrf.mxu1 }
0x2280   : > { %v3569_v56 = vmul.f32 0.35355338, %v3562_v58 }
0x2281   : > { %v5140_v44 = vpop.f32.mrf.mxu1 }
0x2282   : > { %v3571_v19 = vadd.f32 %v3569_v56, %v6315_v13 }
0x2283   : > { %v3565_v26 = vpop.f32.mrf.mxu1 }
0x2284   : > { %v3570_v27 = vmul.f32 0.35355338, %v3565_v26  ;;  %v3573_v24 = vsel %vm1550_vm5, %v3571_v19, -inf }
0x2285   : > { %3574 = vmax.xlane.f32.xlu0 %v3573_v24  ;;  %v5141_v48 = vpop.f32.mrf.mxu1 }
0x2286   : > { %v3572_v35 = vadd.f32 %v3570_v27, %v6315_v13 }
0x2288   : > { %v3576_v52 = vsel %vm1550_vm5, %v3572_v35, -inf }
0x2289   : > { %3577 = vmax.xlane.f32.xlu1 %v3576_v52 }
0x230e   : > { %v3575_v59 = vpop.xlane.xlu0 %3574 }
0x230f   : > { %v3579_v55 = vsub.f32 %v3571_v19, %v3575_v59 }
0x2311   : > { %v3581_v9 = vmul.f32 1.442695, %v3579_v55 }
0x2312   : > { %v3578_v47 = vpop.xlane.xlu1 %3577 }
0x2313   : > { %5482 = vpow2.f32 %v3581_v9  ;;  %v3580_v34 = vsub.f32 %v3572_v35, %v3578_v47 }
0x2315   : > { %v3583_v31 = vmul.f32 1.442695, %v3580_v34  ;;  %v7445_v34 = vld [vmem:[#allocation29_spill] sm:$0xff] }
0x2317   : > { %5484 = vpow2.f32 %v3583_v31  ;;  %v7446_v31 = vld [vmem:[#allocation30_spill] sm:$0xff] }
0x2320   : > { %v5483_v42 = vpop.eup %5482 }
0x2321   : > { %v3585_v0 = vsel %vm1550_vm5, %v5483_v42, 0.0 }
0x2322   : > { %3586 = vadd.xlane.f32.xlu1 %v3585_v0  ;;  %v7448_v0 = vld [vmem:[#allocation32_spill] sm:$0xff] }
0x2324   : > { %v5485_v54 = vpop.eup %5484 }
0x2325   : > { %v3588_v3 = vsel %vm1550_vm5, %v5485_v54, 0.0 }
0x2326   : > { %3589 = vadd.xlane.f32.xlu1 %v3588_v3  ;;  %v7449_v3 = vld [vmem:[#allocation44_spill] sm:$0xff] }
0x2337   : > { %3643 = vrot.lane.b32.xlu1 %v6957_v2, %s5633_s20  ;;  %s4521_s20 = sshll.u32 %s5725_s25, 9  ;;  %s7278_s25 = scalar_lea.sflag [#allocation5], %s484_s14 }
0x23ab   : > { %v3587_v57 = vpop.xlane.xlu1 %3586 }
0x23ac   : > { %5486 = vrcp.f32 %v3587_v57  ;;  %v7450_v57 = vld [vmem:[#allocation41_spill] sm:$0xff] }
0x23af   : > { %v3590_v14 = vpop.xlane.xlu1 %3589 }
0x23b0   : > { %5488 = vrcp.f32 %v3590_v14  ;;  %v7451_v14 = vld [vmem:[#allocation42_spill] sm:$0xff] }
0x23b3   : > { %v3644_v6 = vpop.permute.xlu1 %3643 }
0x23b9   : > { %v5487_v40 = vpop.eup %5486 }
0x23ba   : > { %v3593_v17 = vmul.f32 %v5487_v40, %v5483_v42  ;;  %v7447_v42 = vld [vmem:[#allocation31_spill] sm:$0xff] }
0x23bb   : > { %v7452_v40 = vld [vmem:[#allocation43_spill] sm:$0xff] }
0x23bd   : > { %v5489_v20 = vpop.eup %5488 }
0x23be   : > { %v3594_v51 = vmul.f32 %v5489_v20, %v5485_v54  ;;  %v7170_v20 = vld [vmem:[%s6057_s28 + $0x8] sm:$0xff]  }
0x23c0   : > { %v3595_v60 = vpack.c.bf16 %v3594_v51, %v3593_v17 }
0x23c2   : > { %5151 = vmatmul.mubr.msk.bf16.vlgmr.msra.gmra.mxu0 %vm1550_vm5, %v3595_v60 }
0x23c3   : > { %5155 = vmatpush3.bf16.xpose.msra.mxu0 %v7437_v53  ;;  %5162 = vmatprep.mubr.msk.bf16.mxu0 %vm5631_vm2, %v7394_v39 }
0x23c4   : > { %5156 = vmatprep.subr.bf16.mxu0 %v7394_v39 }
0x23cb   : > { %5157 = vmatpush3.bf16.xpose.msra.mxu0 %v7438_v4 }
0x23cc   : > { %5158 = vmatprep.subr.bf16.mxu0 %v7394_v39 }
0x23d3   : > { %5159 = vmatpush3.bf16.xpose.msra.mxu0 %v7439_v22 }
0x23d4   : > { %5160 = vmatprep.subr.bf16.mxu0 %v7394_v39 }
0x23db   : > { %5161 = vmatpush3.bf16.xpose.msra.mxu0 %v7440_v23 }
0x23dc   : > { %5190 = vmatprep.subr.bf16.mxu0 %v7394_v39 }
0x23e2   : > { %5163 = vmatmul.mubr.msk.bf16.vlgmr.msra.gmra.mxu0 %vm1489_vm3, %v3644_v6 }
0x23e3   : > { %5191 = vmatpush3.bf16.msra.mxu0 %v7441_v33  ;;  %5198 = vmatprep.mubr.msk.bf16.mxu0 %vm5631_vm2, %v7394_v39 }
0x23e4   : > { %5192 = vmatprep.subr.bf16.mxu0 %v7394_v39 }
0x23e7   : > { %5193 = vmatpush3.bf16.msra.mxu0 %v7442_v15 }
0x23e8   : > { %5194 = vmatprep.subr.bf16.mxu0 %v7394_v39 }
0x23eb   : > { %5195 = vmatpush3.bf16.msra.mxu0 %v7443_v63 }
0x23ec   : > { %5196 = vmatprep.subr.bf16.mxu0 %v7394_v39 }
0x23ef   : > { %5197 = vmatpush3.bf16.msra.mxu0 %v7444_v10 }
0x23f0   : > { %5202 = vmatprep.subr.bf16.mxu0 %v7394_v39 }
0x2482   : > { %v3633_v7 = vpop.f32.mrf.mxu0 }
0x2483   : > { %v3640_v17 = vadd.f32 %v3633_v7, %v6431_v50 }
0x2484   : > { %v5152_v41 = vpop.f32.mrf.mxu0 }
0x2486   : > { %v7138_v30 = vpop.f32.mrf.mxu0 }
0x2487   : > { %v3641_v4 = vadd.f32 %v7138_v30, %v6431_v50 }
0x2488   : > { %v5153_v37 = vpop.f32.mrf.mxu0 }
0x24a2   : > { %v3682_v11 = vpop.f32.mrf.mxu0 }
0x24a3   : > { %v3689_v16 = vmul.f32 0.35355338, %v3682_v11 }
0x24a4   : > { %v5164_v28 = vpop.f32.mrf.mxu0 }
0x24a5   : > { %v3691_v29 = vadd.f32 %v3689_v16, %v6315_v13 }
0x24a6   : > { %v3685_v5 = vpop.f32.mrf.mxu0 }
0x24a7   : > { %v3690_v46 = vmul.f32 0.35355338, %v3685_v5  ;;  %v3693_v62 = vsel %vm1550_vm5, %v3691_v29, -inf }
0x24a8   : > { %3694 = vmax.xlane.f32.xlu0 %v3693_v62  ;;  %v5165_v49 = vpop.f32.mrf.mxu0 }
0x24a9   : > { %v3692_v61 = vadd.f32 %v3690_v46, %v6315_v13 }
0x24ab   : > { %v3696_v8 = vsel %vm1550_vm5, %v3692_v61, -inf }
0x24ac   : > { %3697 = vmax.xlane.f32.xlu1 %v3696_v8 }
0x2531   : > { %v3695_v45 = vpop.xlane.xlu0 %3694 }
0x2532   : > { %v3699_v43 = vsub.f32 %v3691_v29, %v3695_v45 }
0x2534   : > { %v3701_v12 = vmul.f32 1.442695, %v3699_v43 }
0x2535   : > { %v3698_v58 = vpop.xlane.xlu1 %3697 }
0x2536   : > { %5490 = vpow2.f32 %v3701_v12  ;;  %v3700_v56 = vsub.f32 %v3692_v61, %v3698_v58 }
0x2538   : > { %v3703_v44 = vmul.f32 1.442695, %v3700_v56 }
0x253a   : > { %5492 = vpow2.f32 %v3703_v44 }
0x2543   : > { %v5491_v19 = vpop.eup %5490 }
0x2544   : > { %v3705_v26 = vsel %vm1550_vm5, %v5491_v19, 0.0 }
0x2545   : > { %3706 = vadd.xlane.f32.xlu0 %v3705_v26 }
0x2547   : > { %v5493_v27 = vpop.eup %5492 }
0x2548   : > { %v3708_v24 = vsel %vm1550_vm5, %v5493_v27, 0.0 }
0x2549   : > { %3709 = vadd.xlane.f32.xlu0 %v3708_v24  ;;  %v7455_v24 = vld [vmem:[#allocation39_spill] sm:$0xff] }
0x255f   : > { %3762 = vrot.lane.b32.xlu0 %v6957_v2, %s5634_s17 }
0x25ce   : > { %v3707_v48 = vpop.xlane.xlu0 %3706 }
0x25cf   : > { %5494 = vrcp.f32 %v3707_v48  ;;  %v7456_v48 = vld [vmem:[#allocation40_spill] sm:$0xff] }
0x25d2   : > { %v3710_v35 = vpop.xlane.xlu0 %3709 }
0x25d3   : > { %5496 = vrcp.f32 %v3710_v35  ;;  %v5546_v35 = vld [vmem:[%s5794_s26 + $0x18] sm:$0xff]  }
0x25d6   : > { %v3763_v54 = vpop.permute.xlu0 %3762 }
0x25dc   : > { %v5495_v52 = vpop.eup %5494 }
0x25dd   : > { %v3713_v55 = vmul.f32 %v5495_v52, %v5491_v19 }
0x25e0   : > { %v5497_v59 = vpop.eup %5496 }
0x25e1   : > { %v3714_v9 = vmul.f32 %v5497_v59, %v5493_v27  ;;  %v7453_v27 = vld [vmem:[#allocation37_spill] sm:$0xff]  ;;  %v5547_v59 = vld [vmem:[%s5794_s26 + $0x10] sm:$0xff]  }
0x25e3   : > { %v3715_v47 = vpack.c.bf16 %v3714_v9, %v3713_v55  ;;  %v5548_v55 = vld [vmem:[%s5794_s26 + $0x8] sm:$0xff]   ;;  %v5549_v9 = vld [vmem:[%s5794_s26] sm:$0xff]   ;;  %s4403_s26 = sshll.u32 %s484_s14, 5 }
0x25e5   : > { %5175 = vmatmul.mubr.msk.bf16.vlgmr.msra.gmra.mxu1 %vm1550_vm5, %v3715_v47 }
0x25e6   : > { %5179 = vmatpush3.bf16.xpose.msra.mxu1 %v7445_v34  ;;  %5186 = vmatprep.mubr.msk.bf16.mxu1 %vm5631_vm2, %v7394_v39 }
0x25e7   : > { %5180 = vmatprep.subr.bf16.mxu1 %v7394_v39 }
0x25ee   : > { %5181 = vmatpush3.bf16.xpose.msra.mxu1 %v7446_v31 }
0x25ef   : > { %5182 = vmatprep.subr.bf16.mxu1 %v7394_v39 }
0x25f6   : > { %5183 = vmatpush3.bf16.xpose.msra.mxu1 %v7447_v42 }
0x25f7   : > { %5184 = vmatprep.subr.bf16.mxu1 %v7394_v39 }
0x25fe   : > { %5185 = vmatpush3.bf16.xpose.msra.mxu1 %v7448_v0 }
0x25ff   : > { %5214 = vmatprep.subr.bf16.mxu1 %v7394_v39 }
0x2605   : > { %5187 = vmatmul.mubr.msk.bf16.vlgmr.msra.gmra.mxu1 %vm1489_vm3, %v3763_v54 }
0x2606   : > { %5215 = vmatpush3.bf16.msra.mxu1 %v7449_v3  ;;  %5222 = vmatprep.mubr.msk.bf16.mxu1 %vm5631_vm2, %v7394_v39 }
0x2607   : > { %5216 = vmatprep.subr.bf16.mxu1 %v7394_v39 }
0x260a   : > { %5217 = vmatpush3.bf16.msra.mxu1 %v7450_v57 }
0x260b   : > { %5218 = vmatprep.subr.bf16.mxu1 %v7394_v39 }
0x260e   : > { %5219 = vmatpush3.bf16.msra.mxu1 %v7451_v14 }
0x260f   : > { %5220 = vmatprep.subr.bf16.mxu1 %v7394_v39 }
0x2612   : > { %5221 = vmatpush3.bf16.msra.mxu1 %v7452_v40 }
0x2613   : > { %5226 = vmatprep.subr.bf16.mxu1 %v7170_v20 }
0x26a5   : > { %v3753_v51 = vpop.f32.mrf.mxu1 }
0x26a6   : > { %v7174_v60 = vadd.f32 %v3753_v51, %v3640_v17 }
0x26a7   : > { %v5176_v53 = vpop.f32.mrf.mxu1 }
0x26a9   : > { %v3756_v22 = vpop.f32.mrf.mxu1 }
0x26aa   : > { %v7178_v23 = vadd.f32 %v3756_v22, %v3641_v4 }
0x26ab   : > { %v5177_v6 = vpop.f32.mrf.mxu1 }
0x26c5   : > { %v3801_v33 = vpop.f32.mrf.mxu1 }
0x26c6   : > { %v3808_v15 = vmul.f32 0.35355338, %v3801_v33 }
0x26c7   : > { %v5188_v63 = vpop.f32.mrf.mxu1 }
0x26c8   : > { %v3810_v10 = vadd.f32 %v3808_v15, %v6315_v13 }
0x26c9   : > { %v3804_v41 = vpop.f32.mrf.mxu1 }
0x26ca   : > { %v3809_v37 = vmul.f32 0.35355338, %v3804_v41  ;;  %v3812_v7 = vsel %vm1550_vm5, %v3810_v10, -inf }
0x26cb   : > { %3813 = vmax.xlane.f32.xlu0 %v3812_v7  ;;  %v5189_v11 = vpop.f32.mrf.mxu1  ;;  %v7212_v7 = vadd.f32 %v7104_v36, %v6905_v32 }
0x26cc   : > { %v3811_v16 = vadd.f32 %v3809_v37, %v6315_v13  ;;  %v7217_v11 = vadd.f32 %v7106_v1, %v6915_v25  ;;  %v5550_v25 = vld [vmem:[%s6057_s28] sm:$0xff]   ;;  %s486_s28 = scalar_lea.vmem [#allocation4], %s4403_s26 }
0x26cd   : > { %s4232_s18 = sshll.u32 %s486_s28, 4  ;;  %s7273_s18 = int_to_ptr.vmem [resolvable:$true] %s4232_s18 }
0x26ce   : > { %v3815_v28 = vsel %vm1550_vm5, %v3811_v16, -inf  ;;  %s5564_s19 = scalar_lea.vmem %s7273_s18, 512  ;;  %p5571_p5 = scmp.lt.s32.totalorder %s7273_s18, %s5569_s15 }
0x26cf   : > { %3816 = vmax.xlane.f32.xlu1 %v3815_v28  ;;  %v4007_v28 = vsel %vm615_vm0, %v7217_v11, 0.0  ;;  %p5565_p2 = scmp.ne.s32.totalorder %s7273_s18, %s5564_s19 }
0x26d1   : > { %p5566_p3 = pnand %p5565_p2, %p5742_p10 }
0x26d3   : > { %p5567_p4 = pneg %p5566_p3 }
0x2754   : > { %v3814_v50 = vpop.xlane.xlu0 %3813 }
0x2755   : > { %v3818_v30 = vsub.f32 %v3810_v10, %v3814_v50 }
0x2757   : > { %v3820_v29 = vmul.f32 1.442695, %v3818_v30 }
0x2758   : > { %v3817_v5 = vpop.xlane.xlu1 %3816 }
0x2759   : > { %5498 = vpow2.f32 %v3820_v29  ;;  %v3819_v46 = vsub.f32 %v3811_v16, %v3817_v5  ;;  %v4004_v16 = vsel %vm615_vm0, %v7212_v7, 0.0 }
0x275b   : > { %v3822_v62 = vmul.f32 1.442695, %v3819_v46 }
0x275d   : > { %5500 = vpow2.f32 %v3822_v62 }
0x2766   : > { %v5499_v49 = vpop.eup %5498 }
0x2767   : > { %v3824_v61 = vsel %vm1550_vm5, %v5499_v49, 0.0 }
0x2768   : > { %3825 = vadd.xlane.f32.xlu1 %v3824_v61 }
0x276a   : > { %v5501_v8 = vpop.eup %5500 }
0x276b   : > { %v3827_v45 = vsel %vm1550_vm5, %v5501_v8, 0.0 }
0x276c   : > { %3828 = vadd.xlane.f32.xlu1 %v3827_v45 }
0x277d   : > { %3881 = vrot.lane.b32.xlu1 %v6957_v2, %s5636_s16  ;;  %v7454_v2 = vld [vmem:[#allocation38_spill] sm:$0xff]  ;;  %s7271_s16 = scalar_lea.hbm %s7329_s11, %s4521_s20 }
0x27f1   : > { %v3826_v43 = vpop.xlane.xlu1 %3825 }
0x27f2   : > { %5502 = vrcp.f32 %v3826_v43 }
0x27f5   : > { %v3829_v12 = vpop.xlane.xlu1 %3828 }
0x27f6   : > { %5504 = vrcp.f32 %v3829_v12 }
0x27f9   : > { %v3882_v52 = vpop.permute.xlu1 %3881 }
0x27ff   : > { %v5503_v58 = vpop.eup %5502 }
0x2800   : > { %v3832_v44 = vmul.f32 %v5503_v58, %v5499_v49 }
0x2803   : > { %v5505_v56 = vpop.eup %5504 }
0x2804   : > { %v3833_v19 = vmul.f32 %v5505_v56, %v5501_v8 }
0x2806   : > { %v3834_v26 = vpack.c.bf16 %v3833_v19, %v3832_v44 }
0x2808   : > { %5199 = vmatmul.mubr.msk.bf16.vlgmr.msra.gmra.mxu0 %vm1550_vm5, %v3834_v26 }
0x2809   : > { %5203 = vmatpush3.bf16.xpose.msra.mxu0 %v7453_v27  ;;  %5210 = vmatprep.mubr.msk.bf16.mxu0 %vm5631_vm2, %v7394_v39 }
0x280a   : > { %5204 = vmatprep.subr.bf16.mxu0 %v7394_v39 }
0x2811   : > { %5205 = vmatpush3.bf16.xpose.msra.mxu0 %v7454_v2 }
0x2812   : > { %5206 = vmatprep.subr.bf16.mxu0 %v7394_v39 }
0x2819   : > { %5207 = vmatpush3.bf16.xpose.msra.mxu0 %v7455_v24 }
0x281a   : > { %5208 = vmatprep.subr.bf16.mxu0 %v7394_v39 }
0x2821   : > { %5209 = vmatpush3.bf16.xpose.msra.mxu0 %v7456_v48 }
0x2822   : > { %5234 = vmatprep.subr.bf16.mxu0 %v5546_v35 }
0x2828   : > { %5211 = vmatmul.mubr.msk.bf16.vlgmr.msra.gmra.mxu0 %vm1489_vm3, %v3882_v52 }
0x2829   : > { %5235 = vmatpush3.bf16.msra.mxu0 %v5546_v35 }
0x282a   : > { %5236 = vmatprep.subr.bf16.mxu0 %v5547_v59 }
0x282d   : > { %5237 = vmatpush3.bf16.msra.mxu0 %v5547_v59 }
0x282e   : > { %5238 = vmatprep.subr.bf16.mxu0 %v5548_v55 }
0x2831   : > { %5239 = vmatpush3.bf16.msra.mxu0 %v5548_v55 }
0x2832   : > { %5240 = vmatprep.subr.bf16.mxu0 %v5549_v9 }
0x2835   : > { %5241 = vmatpush3.bf16.msra.mxu0 %v5549_v9 }
0x28c8   : > { %v3872_v47 = vpop.f32.mrf.mxu0 }
0x28c9   : > { %v3879_v39 = vadd.f32 %v3872_v47, %v7174_v60 }
0x28ca   : > { %v5200_v34 = vpop.f32.mrf.mxu0 }
0x28cc   : > { %v3875_v31 = vpop.f32.mrf.mxu0 }
0x28cd   : > { %v3880_v42 = vadd.f32 %v3875_v31, %v7178_v23 }
0x28ce   : > { %v5201_v0 = vpop.f32.mrf.mxu0 }
0x28e8   : > { %v3920_v54 = vpop.f32.mrf.mxu0 }
0x28e9   : > { %v3927_v3 = vmul.f32 0.35355338, %v3920_v54 }
0x28ea   : > { %v5212_v57 = vpop.f32.mrf.mxu0 }
0x28eb   : > { %v3929_v14 = vadd.f32 %v3927_v3, %v6315_v13 }
0x28ec   : > { %v3923_v40 = vpop.f32.mrf.mxu0 }
0x28ed   : > { %v3928_v17 = vmul.f32 0.35355338, %v3923_v40  ;;  %v3931_v51 = vsel %vm1550_vm5, %v3929_v14, -inf }
0x28ee   : > { %3932 = vmax.xlane.f32.xlu0 %v3931_v51  ;;  %v5213_v53 = vpop.f32.mrf.mxu0 }
0x28ef   : > { %v3930_v4 = vadd.f32 %v3928_v17, %v6315_v13 }
0x28f1   : > { %v3934_v60 = vsel %vm1550_vm5, %v3930_v4, -inf }
0x28f2   : > { %3935 = vmax.xlane.f32.xlu1 %v3934_v60  ;;  %v7457_v60 = vld [vmem:[#allocation45_spill] sm:$0xff] }
0x2977   : > { %v3933_v22 = vpop.xlane.xlu0 %3932 }
0x2978   : > { %v3937_v6 = vsub.f32 %v3929_v14, %v3933_v22 }
0x297a   : > { %v3939_v23 = vmul.f32 1.442695, %v3937_v6 }
0x297b   : > { %v3936_v33 = vpop.xlane.xlu1 %3935 }
0x297c   : > { %5506 = vpow2.f32 %v3939_v23  ;;  %v3938_v15 = vsub.f32 %v3930_v4, %v3936_v33  ;;  %v7458_v23 = vld [vmem:[#allocation46_spill] sm:$0xff] }
0x297e   : > { %v3941_v63 = vmul.f32 1.442695, %v3938_v15 }
0x2980   : > { %5508 = vpow2.f32 %v3941_v63 }
0x2989   : > { %v5507_v10 = vpop.eup %5506 }
0x298a   : > { %v3943_v41 = vsel %vm1550_vm5, %v5507_v10, 0.0 }
0x298b   : > { %3944 = vadd.xlane.f32.xlu0 %v3943_v41 }
0x298d   : > { %v5509_v37 = vpop.eup %5508 }
0x298e   : > { %v3946_v13 = vsel %vm1550_vm5, %v5509_v37, 0.0 }
0x298f   : > { %3947 = vadd.xlane.f32.xlu0 %v3946_v13 }
0x2993   : > { %4005 = vadd.xlane.f32.xlu0 %v4004_v16 }
0x2997   : > { %4008 = vadd.xlane.f32.xlu0 %v4007_v28 }
0x2a14   : > { %v3945_v50 = vpop.xlane.xlu0 %3944 }
0x2a15   : > { %5510 = vrcp.f32 %v3945_v50 }
0x2a18   : > { %v3948_v32 = vpop.xlane.xlu0 %3947 }
0x2a19   : > { %5512 = vrcp.f32 %v3948_v32 }
0x2a1c   : > { %v4006_v1 = vpop.xlane.xlu0 %4005 }
0x2a1d   : > { %v4016_v49 = vmul.f32 0.03125, %v4006_v1 }
0x2a1f   : > { %v4020_v58 = vsub.f32 %v7212_v7, %v4016_v49  ;;  %v5551_v49 = vld [vmem:[%s6883_s29] ss:$0 sm:$0xff]  ;;  %s5570_s29 = scalar_lea.vmem %s5569_s15, 1024 }
0x2a20   : > { %v4009_v8 = vpop.xlane.xlu0 %4008  ;;  %p5572_p6 = scmp.lt.s32.totalorder %s5570_s29, %s5564_s19 }
0x2a21   : > { %v4017_v56 = vmul.f32 0.03125, %v4009_v8 }
0x2a22   : > { %v5511_v36 = vpop.eup %5510  ;;  %p5573_p7 = por %p5572_p6, %p5571_p5 }
0x2a23   : > { %v3951_v29 = vmul.f32 %v5511_v36, %v5507_v10  ;;  %v4021_v27 = vsub.f32 %v7217_v11, %v4017_v56 }
0x2a24   : > { %p5574_p8 = pnand %p5573_p7, %p5567_p4 }
0x2a25   : > { %v4025_v48 = vmul.f32 %v4021_v27, %v4021_v27 }
0x2a26   : > { %v5513_v30 = vpop.eup %5512 }
0x2a27   : > { %v3952_v5 = vmul.f32 %v5513_v30, %v5509_v37  ;;  %v4031_v35 = vsel %vm615_vm0, %v4025_v48, 0.0 }
0x2a29   : > { %v3953_v46 = vpack.c.bf16 %v3952_v5, %v3951_v29 }
0x2a2b   : > { %5223 = vmatmul.mubr.msk.bf16.vlgmr.msra.gmra.mxu1 %vm1550_vm5, %v3953_v46 }
0x2a2c   : > { %5227 = vmatpush3.bf16.msra.mxu1 %v7170_v20 }
0x2a2d   : > { %5228 = vmatprep.subr.bf16.mxu1 %v5550_v25 }
0x2a30   : > { %5229 = vmatpush3.bf16.msra.mxu1 %v5550_v25 }
0x2aeb   : > { %v3991_v62 = vpop.f32.mrf.mxu1 }
0x2aec   : > { %v3998_v61 = vadd.f32 %v3991_v62, %v3879_v39 }
0x2aed   : > { %v5224_v45 = vpop.f32.mrf.mxu1 }
0x2aee   : > { %v7227_v43 = vadd.f32 %v3998_v61, %v6908_v38  ;;  %v4024_v38 = vmul.f32 %v4020_v58, %v4020_v58 }
0x2aef   : > { %v3994_v12 = vpop.f32.mrf.mxu1 }
0x2af0   : > { %v3999_v44 = vadd.f32 %v3994_v12, %v3880_v42  ;;  %v4010_v20 = vsel %vm615_vm0, %v7227_v43, 0.0  ;;  %v4028_v24 = vsel %vm615_vm0, %v4024_v38, 0.0 }
0x2af1   : > { %4011 = vadd.xlane.f32.xlu0 %v4010_v20  ;;  %v5225_v19 = vpop.f32.mrf.mxu1 }
0x2af2   : > { %v7233_v26 = vadd.f32 %v3999_v44, %v6918_v21 }
0x2af4   : > { %v4013_v2 = vsel %vm615_vm0, %v7233_v26, 0.0 }
0x2af5   : > { %4014 = vadd.xlane.f32.xlu0 %v4013_v2 }
0x2af9   : > { %4029 = vadd.xlane.f32.xlu0 %v4028_v24 }
0x2afd   : > { %4032 = vadd.xlane.f32.xlu0 %v4031_v35 }
0x2b7a   : > { %v4012_v52 = vpop.xlane.xlu0 %4011 }
0x2b7b   : > { %v4018_v59 = vmul.f32 0.03125, %v4012_v52 }
0x2b7d   : > { %v4022_v55 = vsub.f32 %v7227_v43, %v4018_v59 }
0x2b7e   : > { %v4015_v21 = vpop.xlane.xlu0 %4014 }
0x2b7f   : > { %v4019_v9 = vmul.f32 0.03125, %v4015_v21  ;;  %v4026_v47 = vmul.f32 %v4022_v55, %v4022_v55 }
0x2b81   : > { %v4023_v39 = vsub.f32 %v7233_v26, %v4019_v9  ;;  %v4034_v34 = vsel %vm615_vm0, %v4026_v47, 0.0 }
0x2b82   : > { %4035 = vadd.xlane.f32.xlu0 %v4034_v34  ;;  %v4030_v31 = vpop.xlane.xlu0 %4029 }
0x2b83   : > { %v4040_v42 = vmul.f32 0.03125, %v4030_v31  ;;  %v4027_v0 = vmul.f32 %v4023_v39, %v4023_v39 }
0x2b85   : > { %v4044_v54 = vadd.f32 1e-05, %v4040_v42  ;;  %v4037_v3 = vsel %vm615_vm0, %v4027_v0, 0.0 }
0x2b86   : > { %4038 = vadd.xlane.f32.xlu1 %v4037_v3  ;;  %v4033_v57 = vpop.xlane.xlu0 %4032 }
0x2b87   : > { %5514 = vrsqrt.f32 %v4044_v54  ;;  %v4041_v14 = vmul.f32 0.03125, %v4033_v57 }
0x2b89   : > { %v4045_v40 = vadd.f32 1e-05, %v4041_v14 }
0x2b8b   : > { %5516 = vrsqrt.f32 %v4045_v40 }
0x2b94   : > { %v5515_v17 = vpop.eup %5514 }
0x2b95   : > { %v4052_v51 = vmul.f32 %v5515_v17, %v4020_v58 }
0x2b97   : > { %v4056_v22 = vmul.f32 %v4052_v51, %v7457_v60 }
0x2b98   : > { %v5517_v53 = vpop.eup %5516 }
0x2b99   : > { %v4053_v4 = vmul.f32 %v5517_v53, %v4021_v27  ;;  %v4060_v33 = vadd.f32 %v4056_v22, %v7458_v23 }
0x2b9b   : > { %v4057_v6 = vmul.f32 %v4053_v4, %v7457_v60 }
0x2b9d   : > { %v4061_v15 = vadd.f32 %v4057_v6, %v7458_v23 }
0x2b9f   : > { %v4064_v63 = vpack.c.bf16 %v4061_v15, %v4060_v33 }
0x2ba1   : > { %5230 = vmatprep.mubr.msk.bf16.mxu1 %vm615_vm0, %v4064_v63 }
0x2c0b   : > { %v4036_v10 = vpop.xlane.xlu0 %4035 }
0x2c0c   : > { %v4042_v41 = vmul.f32 0.03125, %v4036_v10 }
0x2c0e   : > { %v4046_v37 = vadd.f32 1e-05, %v4042_v41 }
0x2c0f   : > { %v4039_v13 = vpop.xlane.xlu1 %4038 }
0x2c10   : > { %5518 = vrsqrt.f32 %v4046_v37  ;;  %v4043_v16 = vmul.f32 0.03125, %v4039_v13 }
0x2c12   : > { %v4047_v28 = vadd.f32 1e-05, %v4043_v16 }
0x2c14   : > { %5520 = vrsqrt.f32 %v4047_v28 }
0x2c1d   : > { %v5519_v50 = vpop.eup %5518 }
0x2c1e   : > { %v4054_v32 = vmul.f32 %v5519_v50, %v4022_v55 }
0x2c20   : > { %v4058_v29 = vmul.f32 %v4054_v32, %v7457_v60 }
0x2c21   : > { %v5521_v36 = vpop.eup %5520 }
0x2c22   : > { %v4055_v30 = vmul.f32 %v5521_v36, %v4023_v39  ;;  %v4062_v46 = vadd.f32 %v4058_v29, %v7458_v23 }
0x2c24   : > { %v4059_v5 = vmul.f32 %v4055_v30, %v7457_v60 }
0x2c26   : > { %v4063_v25 = vadd.f32 %v4059_v5, %v7458_v23 }
0x2c28   : > { %v4065_v1 = vpack.c.bf16 %v4063_v25, %v4062_v46 }
0x2c2a   : > { %5231 = vmatmul.mubr.msk.bf16.vlgmr.msra.gmra.mxu1 %vm615_vm0, %v4065_v1 }
0x2cea   : > { %v5232_v62 = vpop.f32.mrf.mxu1 }
0x2ceb   : > { %v4115_v61 = vadd.f32 %v5551_v49, %v5232_v62 }
0x2cec   : > { %v4106_v8 = vpop.f32.mrf.mxu1 }
0x2ced   : > { %v4507_v45 = vmul.f32 -1.442695, %v4115_v61  ;;  %v4107_v12 = vadd.f32 %v5551_v49, %v4106_v8 }
0x2cee   : > { %v5233_v58 = vpop.f32.mrf.mxu1 }
0x2cef   : > { %v4505_v56 = vmul.f32 -1.442695, %v4107_v12  ;;  %v4118_v44 = vadd.f32 %v5551_v49, %v5233_v58  ;;  %5522 = vpow2.f32 %v4507_v45 }
0x2cf0   : > { %v4109_v20 = vpop.f32.mrf.mxu1 }
0x2cf1   : > { %5524 = vpow2.f32 %v4505_v56  ;;  %v4508_v19 = vmul.f32 -1.442695, %v4118_v44  ;;  %v4110_v27 = vadd.f32 %v5551_v49, %v4109_v20 }
0x2cf3   : > { %5526 = vpow2.f32 %v4508_v19  ;;  %v4506_v2 = vmul.f32 -1.442695, %v4110_v27 }
0x2cf5   : > { %5528 = vpow2.f32 %v4506_v2 }
0x2cfc   : > { %v5523_v38 = vpop.eup %5522 }
0x2cfd   : > { %v4135_v52 = vadd.f32 1.0, %v5523_v38 }
0x2cfe   : > { %v5525_v24 = vpop.eup %5524 }
0x2cff   : > { %v4133_v48 = vadd.f32 1.0, %v5525_v24 }
0x2d00   : > { %v5527_v35 = vpop.eup %5526 }
0x2d01   : > { %v4136_v59 = vadd.f32 1.0, %v5527_v35  ;;  %5530 = vrcp.f32 %v4133_v48 }
0x2d02   : > { %v5529_v55 = vpop.eup %5528 }
0x2d03   : > { %5532 = vrcp.f32 %v4136_v59  ;;  %v4134_v21 = vadd.f32 1.0, %v5529_v55 }
0x2d04   : > { %5534 = vrcp.f32 %v4135_v52 }
0x2d05   : > { %5536 = vrcp.f32 %v4134_v21 }
0x2d0e   : > { %v5531_v9 = vpop.eup %5530 }
0x2d0f   : > { %v4145_v42 = vmul.f32 %v5531_v9, %v4107_v12 }
0x2d10   : > { %v5533_v47 = vpop.eup %5532 }
0x2d11   : > { %v5535_v39 = vpop.eup %5534  ;;  %v4148_v31 = vmul.f32 %v5533_v47, %v4118_v44 }
0x2d12   : > { %v5537_v34 = vpop.eup %5536  ;;  %v4147_v54 = vmul.f32 %v5535_v39, %v4115_v61 }
0x2d13   : > { %v4146_v0 = vmul.f32 %v5537_v34, %v4110_v27 }
0x2d14   : > { %v4150_v57 = vpack.c.bf16 %v4148_v31, %v4147_v54 }
0x2d15   : > { %v4149_v3 = vpack.c.bf16 %v4146_v0, %v4145_v42 }
0x2d17   : > { %5242 = vmatprep.mubr.msk.bf16.mxu0 %vm1550_vm5, %v4149_v3 }
0x2d18   : > { %5243 = vmatmul.mubr.msk.bf16.vlgmr.msra.gmra.mxu0 %vm1550_vm5, %v4150_v57 }
0x2dd8   : > { %v5244_v14 = vpop.f32.mrf.mxu0 }
0x2dd9   : > { %v4208_v40 = vadd.f32 %v5244_v14, %v7227_v43 }
0x2dda   : > { %v4191_v17 = vpop.f32.mrf.mxu0 }
0x2ddb   : > { %v4212_v51 = vadd.f32 %v4208_v40, %v6900_v18  ;;  %v4206_v53 = vadd.f32 %v4191_v17, %v7212_v7 }
0x2ddc   : > { %v5245_v4 = vpop.f32.mrf.mxu0 }
0x2ddd   : > { %4216 = vst.msk [vmem:[%s486_s28 + $0x10] sm:$0xff] %vm615_vm0, %v4212_v51  ;;  %v4210_v60 = vadd.f32 %v4206_v53, %v6900_v18  ;;  %v4209_v22 = vadd.f32 %v5245_v4, %v7233_v26 }
0x2dde   : > { %v4194_v6 = vpop.f32.mrf.mxu0 }
0x2ddf   : > { %4214 = vst.msk [vmem:[%s486_s28] sm:$0xff] %vm615_vm0, %v4210_v60  ;;  %v4213_v43 = vadd.f32 %v4209_v22, %v6900_v18  ;;  %v4207_v23 = vadd.f32 %v4194_v6, %v7217_v11 }
0x2de1   : > { %4217 = vst.msk [vmem:[%s486_s28 + $0x18] sm:$0xff] %vm615_vm0, %v4213_v43  ;;  %v4211_v7 = vadd.f32 %v4207_v23, %v6900_v18 }
0x2de3   : > { %4215 = vst.msk [vmem:[%s486_s28 + $0x8] sm:$0xff] %vm615_vm0, %v4211_v7 }
0x2de4   : > { %5577 = shalt.err (!%p5574_p8)
}
0x2de5   : > { %s5578_s14 = scalar_lea.hbm %s7271_s16, 512  ;;  %s5582_s20 = scalar_lea.hbm %s7329_s11, 1024 }
0x2de6   : > { %p5579_p9 = scmp.ne.s32.totalorder %s7271_s16, %s5578_s14  ;;  %p5583_p0 = scmp.lt.s32.totalorder %s7271_s16, %s7329_s11 }
0x2de7   : > { %p5584_p1 = scmp.lt.s32.totalorder %s5582_s20, %s5578_s14 }
0x2de8   : > { %p5580_p12 = pnand %p5579_p9, %p5742_p10 }
0x2de9   : > { %p5585_p2 = por %p5584_p1, %p5583_p0 }
0x2dea   : > { %p5581_p13 = pneg %p5580_p12 }
0x2dec   : > { %p5586_p3 = pnand %p5585_p2, %p5581_p13 }
0x2dee   : > { %5589 = shalt.err (!%p5586_p3)
}
0x2def   : > { %s5639_s19 = smov 128   ;;  %s5640_s1 = smov 8  }
0x2df0   : > { %5249 = dma.vmem_to_hbm [thread:$0]  (%p5742_p10), %s7273_s18, 512, %s7271_s16, %s7278_s25, %s5639_s19, %s5639_s19, %s5640_s1  }
0x2df1 PF: > { %p5255_p4 = scmp.ge.s32.totalorder %s5626_s24, 2  ;;  %s4247_s15 = sand.u32 1, %s5614_s22  }
0x2df2   : > { %s4248_s29 = scalar_lea.sflag [#allocation5], %s4247_s15 }
0x2df3   : > { %p5252_p5 = pnand %p5255_p4, %p5746_p11 }
0x2df5   : > { %p5253_p6 = pneg %p5252_p5 }
0x2df7   : > { %5609 = dma.done.wait (%p5253_p6), %s4248_s29, 512  }
0x2df8   : > { %5611 = vsyncadd (%p5253_p6), %s4248_s29, 4294966784  ;;  %p27_p7 = scmp.ge.s32.totalorder %s5729_s27, 4   ;;  %s7459_s22 = smov %s5618_s23 }
0x2df9   : > { %s7460_s23 = smov %s5622_s0  ;;  %s7461_s0 = smov %s5740_s30 }
0x2dfa   : > { %s7462_s24 = smov %s5729_s27  ;;  %29 = sbr.rel (!%p27_p7) target bundleno = 18 (0x12), region = 122 }
0x2dff   :  { %4253 = vsyncpa [#allocation5], 1 }
0x2e00   :  { %4255 = vsyncpa [#allocation5 + $0x1], 1 }

</bundles_post_ra>
